<compile_context>
chip_gen: v6e
topology: v6e:2x2x1
jax: 0.10.0
libtpu: 0.0.40
codegen_flags: <defaults>
</compile_context>

<pallas_src>
import jax
import jax.numpy as jnp
from jax import lax
from jax.experimental import pallas as pl
from jax.experimental.pallas import tpu as pltpu

EMBED_DIM = 128          # item embedding dim; SAGEConv(embed_dim, 128)
HIDDEN = 128             # conv / lin1 output width
HIDDEN2 = 64             # lin2 output width
POOL_RATIO = 0.8
B_PAD = 8                # padded number of graphs (<= 8 graphs supported here)
NUM_ITEMS = 50           # df.item_id.max() + 1  (synthetic)
ITEMS_PAD = 56           # NUM_ITEMS rounded up to a sublane multiple

_VMEM = pl.BlockSpec(memory_space=pltpu.MemorySpace.VMEM)
_SMEM = pl.BlockSpec(memory_space=pltpu.MemorySpace.SMEM)
_NT = (((1,), (1,)), ((), ()))          # dot_general: contract last dims (A @ B^T)


def _round_up(n, m):
    return ((n + m - 1) // m) * m


# --------------------------- the single fused kernel --------------------------

def click_forward_kernel(item_ref, bcol_ref, brow_ref, src_ref, dst_ref,
                         emb_ref, cw_ref, cb_ref, pp_ref,
                         l1w_ref, l1b_ref, l2w_ref, l2b_ref, l3w_ref, l3b_ref,
                         o_ref, mx_ref):
    """Whole CLICK_Net forward for one padded batch of graphs.

    item:  (N,1) int32  item id per node (-1 for pad rows)
    bcol:  (N,1) int32  graph id per node (-1 for pad rows)
    brow:  (1,N) int32  same, row layout
    src:   (E,1) int32  edge source  (-1 for pad edges)
    dst:   (1,E) int32  edge target  (-1 for pad edges)
    emb:   (ITEMS_PAD, 128) embedding table
    cw:    (3, 256, 128) stacked SAGE weights [W_l ; W_r] per layer
    cb:    (3, 1, 128)   SAGE biases;   pp: (3, 1, 128) pooling vectors p
    l1w (256,128) l1b (1,128) l2w (128,64) l2b (1,64) l3w (1,64) l3b (1,1 SMEM)
    o:     (B_PAD, 128) lane-dense sigmoid output (value replicated over lanes)
    mx:    (B_PAD, 128) VMEM scratch for the per-graph max readout rows
    """
    f32 = jnp.float32
    n = item_ref.shape[0]
    e = src_ref.shape[0]
    c = emb_ref.shape[1]                      # 128

    # ---- embedding lookup: one-hot @ table (MXU "gather") -------------------
    items = item_ref[...]                                            # (N,1)
    it_iota = lax.broadcasted_iota(jnp.int32, (n, emb_ref.shape[0]), 1)
    x = jnp.dot((it_iota == items).astype(f32), emb_ref[...],
                preferred_element_type=f32)                          # (N,C); pad rows -> 0

    # ---- dense adjacency A[t,s] = #edges s->t, built once from the edge list
    tgt_iota = lax.broadcasted_iota(jnp.int32, (n, e), 0)
    src_iota = lax.broadcasted_iota(jnp.int32, (e, n), 1)
    a_t = (tgt_iota == dst_ref[...]).astype(f32)                     # (N,E)
    a_s = (src_iota == src_ref[...]).astype(f32)                     # (E,N)
    adj = jnp.dot(a_t, a_s, preferred_element_type=f32)              # (N,N)

    # ---- static per-batch helpers -------------------------------------------
    bcol = bcol_ref[...]                                             # (N,1)
    brow = brow_ref[...]                                             # (1,N)
    sub_i = lax.broadcasted_iota(jnp.int32, (n, n), 0)               # row index i
    lane_j = lax.broadcasted_iota(jnp.int32, (n, n), 1)              # col index j
    same_batch = (bcol == brow)                                      # (N,N)
    eye = (sub_i == lane_j).astype(f32)                              # exact transposer
    g_iota = lax.broadcasted_iota(jnp.int32, (B_PAD, n), 0)          # (B,N)

    v_col = bcol >= 0                                                # valid nodes (N,1)
    v_row = brow >= 0                                                # valid nodes (1,N)

    acc_max = jnp.zeros((B_PAD, c), f32)
    acc_mean = jnp.zeros((B_PAD, c), f32)

    for l in range(3):                                               # static unroll
        # --- SAGEConv (mean aggr) + ReLU -------------------------------------
        # x rows of invalid/dropped nodes are zero, so A @ x only sums kept
        # sources; deg counts only kept sources (lane reduce over masked A).
        deg = jnp.sum(adj * v_row.astype(f32), axis=1, keepdims=True)          # (N,1)
        agg = jnp.dot(adj, x, preferred_element_type=f32)                      # (N,C)
        agg = agg * (1.0 / jnp.maximum(deg, 1.0))

        w = cw_ref[l]                                                # (2C, C)
        b = cb_ref[l]                                                # (1, C)
        h = (jnp.dot(agg, w[0:c, :], preferred_element_type=f32) +
             jnp.dot(x,   w[c:2 * c, :], preferred_element_type=f32) + b)
        h = jnp.maximum(h, 0.0)                                      # (N,C)

        # --- TopKPooling score: s = h . (p/||p||) -----------------------------
        p = pp_ref[l]                                                # (1, C)
        pn = p * lax.rsqrt(jnp.sum(p * p, axis=-1, keepdims=True))   # EUP rsqrt
        rr = lax.dot_general(pn, h, _NT, preferred_element_type=f32)      # (1,N)
        rc = lax.dot_general(eye, rr, _NT, preferred_element_type=f32)    # (N,1) exact copy

        # --- in-kernel top-k: keep ceil(0.8*n_g) best-scored valid nodes ------
        same = same_batch & v_col & v_row                            # (N,N)
        beats_cr = (rr > rc) | ((rr == rc) & (lane_j < sub_i))       # col j beats row i
        beats_rc = (rc > rr) | ((rc == rr) & (sub_i < lane_j))       # row i beats col j
        same_f = same.astype(f32)
        rank_col = jnp.sum((same & beats_cr).astype(f32), axis=1, keepdims=True)  # (N,1)
        rank_row = jnp.sum((same & beats_rc).astype(f32), axis=0, keepdims=True)  # (1,N)
        k_col = jnp.ceil(POOL_RATIO * jnp.sum(same_f, axis=1, keepdims=True))
        k_row = jnp.ceil(POOL_RATIO * jnp.sum(same_f, axis=0, keepdims=True))
        kept_col = v_col & (rank_col < k_col)                        # (N,1)
        kept_row = v_row & (rank_row < k_row)                        # (1,N) (consistent)

        # --- gate (x' = h * tanh(score)) and drop non-selected rows ----------
        x = jnp.where(kept_col, h * jnp.tanh(rc), 0.0)               # next-layer x

        # --- readout: [global_max | global_mean] over kept nodes per graph ----
        member = ((g_iota == brow) & kept_row).astype(f32)           # (B,N)
        cnt = jnp.sum(member, axis=1, keepdims=True)                 # (B,1)
        msum = jnp.dot(member, x, preferred_element_type=f32)        # (B,C) on MXU
        acc_mean = acc_mean + msum * (1.0 / jnp.maximum(cnt, 1.0))

        for g in range(B_PAD):                                       # 8 masked maxes
            m_g = (bcol == g) & kept_col                             # (N,1)
            mx_g = jnp.max(jnp.where(m_g, x, -1e30), axis=0, keepdims=True)
            mx_ref[g:g + 1, :] = jnp.where(cnt[g:g + 1, :] > 0.0, mx_g, 0.0)
        acc_max = acc_max + mx_ref[...]

        v_col = kept_col
        v_row = kept_row

    # ---- fused MLP head: lin1+ReLU -> lin2+ReLU -> dropout(eval)=id -> sigmoid(lin3)
    h1 = (jnp.dot(acc_max,  l1w_ref[0:c, :], preferred_element_type=f32) +
          jnp.dot(acc_mean, l1w_ref[c:2 * c, :], preferred_element_type=f32) +
          l1b_ref[...])
    h1 = jnp.maximum(h1, 0.0)
    h2 = jnp.dot(h1, l2w_ref[...], preferred_element_type=f32) + l2b_ref[...]
    h2 = jnp.maximum(h2, 0.0)
    logit = jnp.sum(h2 * l3w_ref[...], axis=-1, keepdims=True) + l3b_ref[0, 0]
    o_ref[...] = jnp.broadcast_to(1.0 / (1.0 + jnp.exp(-logit)), o_ref.shape)


# --------------------------- forward pass (one pallas_call) -------------------

def click_net_forward(params, item_ids, edge_index, batch, num_graphs):
    """item_ids: (N, 1) int32; edge_index: (2, E) int32; batch: (N,) int32."""
    assert num_graphs <= B_PAD
    n = item_ids.shape[0]
    e = edge_index.shape[1]
    n_pad = _round_up(max(n, 8), 8)
    e_pad = _round_up(max(e, 8), 8)

    item_col = jnp.pad(item_ids[:, 0].astype(jnp.int32), (0, n_pad - n),
                       constant_values=-1).reshape(n_pad, 1)
    b_i = batch.astype(jnp.int32)
    batch_col = jnp.pad(b_i, (0, n_pad - n), constant_values=-1).reshape(n_pad, 1)
    batch_row = jnp.pad(b_i, (0, n_pad - n), constant_values=-1).reshape(1, n_pad)
    src_col = jnp.pad(edge_index[0].astype(jnp.int32), (0, e_pad - e),
                      constant_values=-1).reshape(e_pad, 1)
    dst_row = jnp.pad(edge_index[1].astype(jnp.int32), (0, e_pad - e),
                      constant_values=-1).reshape(1, e_pad)

    out = pl.pallas_call(
        click_forward_kernel,
        out_shape=jax.ShapeDtypeStruct((B_PAD, HIDDEN), jnp.float32),
        in_specs=[_VMEM] * 14 + [_SMEM],          # lin3_b: (1,1) scalar in SMEM
        out_specs=_VMEM,
        scratch_shapes=[pltpu.VMEM((B_PAD, HIDDEN), jnp.float32)],
    )(item_col, batch_col, batch_row, src_col, dst_row,
      params["item_emb"], params["conv_w"], params["conv_b"], params["pool_p"],
      params["lin1_w"], params["lin1_b"], params["lin2_w"], params["lin2_b"],
      params["lin3_w"], params["lin3_b"])

    return out[:num_graphs, 0]                    # per-graph sigmoid


# --------------------------- parameters --------------------------------------

def init_params(key):
    # Weights stored as (in, out) so kernels compute x @ W.
    # conv_w[l] rows 0:C   <-> PyG lin_l.weight.T (mean-agg term, carries bias),
    #           rows C:2C  <-> PyG lin_r.weight.T (root term, no bias).
    ks = jax.random.split(key, 10)

    def nrm(k, shape, scale=0.05):
        return jax.random.normal(k, shape, jnp.float32) * scale

    emb = jnp.zeros((ITEMS_PAD, EMBED_DIM), jnp.float32)
    emb = emb.at[:NUM_ITEMS].set(nrm(ks[0], (NUM_ITEMS, EMBED_DIM), 0.1))
    return {
        "item_emb": emb,
        "conv_w": jnp.stack([nrm(ks[1], (2 * EMBED_DIM, HIDDEN)),
                             nrm(ks[3], (2 * HIDDEN, HIDDEN)),
                             nrm(ks[5], (2 * HIDDEN, HIDDEN))]),      # (3,256,128)
        "conv_b": jnp.zeros((3, 1, HIDDEN), jnp.float32),
        "pool_p": jnp.stack([nrm(ks[2], (1, HIDDEN)),
                             nrm(ks[4], (1, HIDDEN)),
                             nrm(ks[6], (1, HIDDEN))]),               # (3,1,128)
        "lin1_w": nrm(ks[7], (2 * HIDDEN, HIDDEN)),
        "lin1_b": jnp.zeros((1, HIDDEN), jnp.float32),
        "lin2_w": nrm(ks[8], (HIDDEN, HIDDEN2)),
        "lin2_b": jnp.zeros((1, HIDDEN2), jnp.float32),
        "lin3_w": nrm(ks[9], (1, HIDDEN2)),                           # row vector (VPU dot)
        "lin3_b": jnp.zeros((1, 1), jnp.float32),                     # SMEM scalar
        # NOTE: bn1 / bn2 from __init__ are never used in forward() -> omitted.
    }


# --------------------------- demo --------------------------------------------

if __name__ == "__main__":
    key = jax.random.PRNGKey(0)
    pkey, dkey = jax.random.split(key)
    params = init_params(pkey)

    # Synthetic PyG-style batch: 2 graphs with 12 and 10 nodes (batch sorted).
    sizes = [12, 10]
    num_graphs = len(sizes)
    n_total = sum(sizes)

    k_item, k_e0, k_e1 = jax.random.split(dkey, 3)
    item_ids = jax.random.randint(k_item, (n_total, 1), 0, NUM_ITEMS,
                                  dtype=jnp.int32)                 # (N, 1)
    batch = jnp.concatenate(
        [jnp.full((s,), g, jnp.int32) for g, s in enumerate(sizes)])

    edges = []
    offset = 0
    for s, ke in zip(sizes, [k_e0, k_e1]):
        ed = jax.random.randint(ke, (2, 3 * s), 0, s, dtype=jnp.int32) + offset
        edges.append(ed)
        offset += s
    edge_index = jnp.concatenate(edges, axis=1)                    # (2, 66)

    fwd = jax.jit(click_net_forward, static_argnames=("num_graphs",))
    out = fwd(params, item_ids, edge_index, batch, num_graphs=num_graphs)
    out = jax.block_until_ready(out)

    assert out.shape == (num_graphs,)
    assert bool(jnp.all(jnp.isfinite(out)))
    assert bool(jnp.all((out >= 0.0) & (out <= 1.0)))
    print("KERNEL_OK")
</pallas_src>

<mosaic_0001>
module attributes {stable_mosaic.version = 11 : i64} {
  func.func @click_forward_kernel(%arg0: memref<24x1xi32, #tpu.memory_space<vmem>>, %arg1: memref<24x1xi32, #tpu.memory_space<vmem>>, %arg2: memref<1x24xi32, #tpu.memory_space<vmem>>, %arg3: memref<72x1xi32, #tpu.memory_space<vmem>>, %arg4: memref<1x72xi32, #tpu.memory_space<vmem>>, %arg5: memref<56x128xf32, #tpu.memory_space<vmem>>, %arg6: memref<3x256x128xf32, #tpu.memory_space<vmem>>, %arg7: memref<3x1x128xf32, #tpu.memory_space<vmem>>, %arg8: memref<3x1x128xf32, #tpu.memory_space<vmem>>, %arg9: memref<256x128xf32, #tpu.memory_space<vmem>>, %arg10: memref<1x128xf32, #tpu.memory_space<vmem>>, %arg11: memref<128x64xf32, #tpu.memory_space<vmem>>, %arg12: memref<1x64xf32, #tpu.memory_space<vmem>>, %arg13: memref<1x64xf32, #tpu.memory_space<vmem>>, %arg14: memref<1x1xf32, #tpu.memory_space<smem>>, %arg15: memref<8x128xf32, #tpu.memory_space<vmem>>, %arg16: memref<8x128xf32, #tpu.memory_space<vmem>>) attributes {dimension_semantics = [], scalar_prefetch = 0 : i64, scratch_operands = 1 : i64, tpu.core_type = #tpu.core_type<tc>} {
    %c0 = arith.constant 0 : index
    %c0_0 = arith.constant 0 : index
    %0 = vector.load %arg0[%c0, %c0_0] : memref<24x1xi32, #tpu.memory_space<vmem>>, vector<24x1xi32>
    %1 = tpu.iota {dimensions = array<i32: 1>} : vector<24x56xi32>
    %2 = vector.broadcast %0 : vector<24x1xi32> to vector<24x56xi32>
    %3 = arith.cmpi eq, %1, %2 : vector<24x56xi32>
    %4 = arith.extui %3 : vector<24x56xi1> to vector<24x56xi32>
    %5 = arith.sitofp %4 : vector<24x56xi32> to vector<24x56xf32>
    %c0_1 = arith.constant 0 : index
    %c0_2 = arith.constant 0 : index
    %6 = vector.load %arg5[%c0_1, %c0_2] : memref<56x128xf32, #tpu.memory_space<vmem>>, vector<56x128xf32>
    %cst = arith.constant dense<0.000000e+00> : vector<24x128xf32>
    %7 = tpu.matmul %5, %6, %cst {dimension_numbers = #tpu.dot_dimension_numbers<[1], [0], [0], [1], [0, 0, 1, 1], [], []>} : vector<24x56xf32>, vector<56x128xf32>, vector<24x128xf32> -> vector<24x128xf32>
    %8 = tpu.iota {dimensions = array<i32: 0>} : vector<24x72xi32>
    %9 = tpu.iota {dimensions = array<i32: 1>} : vector<72x24xi32>
    %c0_3 = arith.constant 0 : index
    %c0_4 = arith.constant 0 : index
    %10 = vector.load %arg4[%c0_3, %c0_4] : memref<1x72xi32, #tpu.memory_space<vmem>>, vector<1x72xi32>
    %11 = vector.broadcast %10 : vector<1x72xi32> to vector<24x72xi32>
    %12 = arith.cmpi eq, %8, %11 : vector<24x72xi32>
    %13 = arith.extui %12 : vector<24x72xi1> to vector<24x72xi32>
    %14 = arith.sitofp %13 : vector<24x72xi32> to vector<24x72xf32>
    %c0_5 = arith.constant 0 : index
    %c0_6 = arith.constant 0 : index
    %15 = vector.load %arg3[%c0_5, %c0_6] : memref<72x1xi32, #tpu.memory_space<vmem>>, vector<72x1xi32>
    %16 = vector.broadcast %15 : vector<72x1xi32> to vector<72x24xi32>
    %17 = arith.cmpi eq, %9, %16 : vector<72x24xi32>
    %18 = arith.extui %17 : vector<72x24xi1> to vector<72x24xi32>
    %19 = arith.sitofp %18 : vector<72x24xi32> to vector<72x24xf32>
    %cst_7 = arith.constant dense<0.000000e+00> : vector<24x24xf32>
    %20 = tpu.matmul %14, %19, %cst_7 {dimension_numbers = #tpu.dot_dimension_numbers<[1], [0], [0], [1], [0, 0, 1, 1], [], []>} : vector<24x72xf32>, vector<72x24xf32>, vector<24x24xf32> -> vector<24x24xf32>
    %c0_8 = arith.constant 0 : index
    %c0_9 = arith.constant 0 : index
    %21 = vector.load %arg1[%c0_8, %c0_9] : memref<24x1xi32, #tpu.memory_space<vmem>>, vector<24x1xi32>
    %c0_10 = arith.constant 0 : index
    %c0_11 = arith.constant 0 : index
    %22 = vector.load %arg2[%c0_10, %c0_11] : memref<1x24xi32, #tpu.memory_space<vmem>>, vector<1x24xi32>
    %23 = tpu.iota {dimensions = array<i32: 0>} : vector<24x24xi32>
    %24 = tpu.iota {dimensions = array<i32: 1>} : vector<24x24xi32>
    %25 = vector.broadcast %21 : vector<24x1xi32> to vector<24x24xi32>
    %26 = vector.broadcast %22 : vector<1x24xi32> to vector<24x24xi32>
    %27 = arith.cmpi eq, %25, %26 : vector<24x24xi32>
    %28 = arith.cmpi eq, %23, %24 : vector<24x24xi32>
    %29 = arith.extui %28 : vector<24x24xi1> to vector<24x24xi32>
    %30 = arith.sitofp %29 : vector<24x24xi32> to vector<24x24xf32>
    %31 = tpu.iota {dimensions = array<i32: 0>} : vector<8x24xi32>
    %c0_i32 = arith.constant 0 : i32
    %32 = vector.broadcast %c0_i32 : i32 to vector<24x1xi32>
    %33 = arith.cmpi sge, %21, %32 : vector<24x1xi32>
    %c0_i32_12 = arith.constant 0 : i32
    %34 = vector.broadcast %c0_i32_12 : i32 to vector<1x24xi32>
    %35 = arith.cmpi sge, %22, %34 : vector<1x24xi32>
    %cst_13 = arith.constant 0.000000e+00 : f32
    %36 = vector.broadcast %cst_13 : f32 to vector<8x128xf32>
    %cst_14 = arith.constant 0.000000e+00 : f32
    %37 = vector.broadcast %cst_14 : f32 to vector<8x128xf32>
    %38 = arith.extui %35 : vector<1x24xi1> to vector<1x24xi32>
    %39 = arith.sitofp %38 : vector<1x24xi32> to vector<1x24xf32>
    %40 = vector.broadcast %39 : vector<1x24xf32> to vector<24x24xf32>
    %41 = arith.mulf %20, %40 : vector<24x24xf32>
    %cst_15 = arith.constant dense<0.000000e+00> : vector<24xf32>
    %42 = vector.multi_reduction <add>, %41, %cst_15 [1] : vector<24x24xf32> to vector<24xf32>
    %43 = vector.shape_cast %42 : vector<24xf32> to vector<24x1xf32>
    %cst_16 = arith.constant dense<0.000000e+00> : vector<24x128xf32>
    %44 = tpu.matmul %20, %7, %cst_16 {dimension_numbers = #tpu.dot_dimension_numbers<[1], [0], [0], [1], [0, 0, 1, 1], [], []>} : vector<24x24xf32>, vector<24x128xf32>, vector<24x128xf32> -> vector<24x128xf32>
    %cst_17 = arith.constant 1.000000e+00 : f32
    %45 = vector.broadcast %cst_17 : f32 to vector<24x1xf32>
    %46 = arith.maximumf %43, %45 : vector<24x1xf32>
    %cst_18 = arith.constant 1.000000e+00 : f32
    %47 = vector.broadcast %cst_18 : f32 to vector<24x1xf32>
    %48 = arith.divf %47, %46 : vector<24x1xf32>
    %49 = vector.broadcast %48 : vector<24x1xf32> to vector<24x128xf32>
    %50 = arith.mulf %44, %49 : vector<24x128xf32>
    %c0_19 = arith.constant 0 : index
    %c0_20 = arith.constant 0 : index
    %c0_21 = arith.constant 0 : index
    %51 = vector.load %arg6[%c0_19, %c0_20, %c0_21] : memref<3x256x128xf32, #tpu.memory_space<vmem>>, vector<1x256x128xf32>
    %52 = vector.shape_cast %51 : vector<1x256x128xf32> to vector<256x128xf32>
    %c0_22 = arith.constant 0 : index
    %c0_23 = arith.constant 0 : index
    %c0_24 = arith.constant 0 : index
    %53 = vector.load %arg7[%c0_22, %c0_23, %c0_24] : memref<3x1x128xf32, #tpu.memory_space<vmem>>, vector<1x1x128xf32>
    %54 = vector.shape_cast %53 : vector<1x1x128xf32> to vector<1x128xf32>
    %55 = vector.extract_strided_slice %52 {offsets = [0, 0], sizes = [128, 128], strides = [1, 1]} : vector<256x128xf32> to vector<128x128xf32>
    %cst_25 = arith.constant dense<0.000000e+00> : vector<24x128xf32>
    %56 = tpu.matmul %50, %55, %cst_25 {dimension_numbers = #tpu.dot_dimension_numbers<[1], [0], [0], [1], [0, 0, 1, 1], [], []>} : vector<24x128xf32>, vector<128x128xf32>, vector<24x128xf32> -> vector<24x128xf32>
    %57 = vector.extract_strided_slice %52 {offsets = [128, 0], sizes = [128, 128], strides = [1, 1]} : vector<256x128xf32> to vector<128x128xf32>
    %cst_26 = arith.constant dense<0.000000e+00> : vector<24x128xf32>
    %58 = tpu.matmul %7, %57, %cst_26 {dimension_numbers = #tpu.dot_dimension_numbers<[1], [0], [0], [1], [0, 0, 1, 1], [], []>} : vector<24x128xf32>, vector<128x128xf32>, vector<24x128xf32> -> vector<24x128xf32>
    %59 = arith.addf %56, %58 : vector<24x128xf32>
    %60 = vector.broadcast %54 : vector<1x128xf32> to vector<24x128xf32>
    %61 = arith.addf %59, %60 : vector<24x128xf32>
    %cst_27 = arith.constant 0.000000e+00 : f32
    %62 = vector.broadcast %cst_27 : f32 to vector<24x128xf32>
    %63 = arith.maximumf %61, %62 : vector<24x128xf32>
    %c0_28 = arith.constant 0 : index
    %c0_29 = arith.constant 0 : index
    %c0_30 = arith.constant 0 : index
    %64 = vector.load %arg8[%c0_28, %c0_29, %c0_30] : memref<3x1x128xf32, #tpu.memory_space<vmem>>, vector<1x1x128xf32>
    %65 = vector.shape_cast %64 : vector<1x1x128xf32> to vector<1x128xf32>
    %66 = arith.mulf %65, %65 : vector<1x128xf32>
    %cst_31 = arith.constant dense<0.000000e+00> : vector<1xf32>
    %67 = vector.multi_reduction <add>, %66, %cst_31 [1] : vector<1x128xf32> to vector<1xf32>
    %68 = vector.shape_cast %67 : vector<1xf32> to vector<1x1xf32>
    %69 = math.rsqrt %68 : vector<1x1xf32>
    %70 = vector.broadcast %69 : vector<1x1xf32> to vector<1x128xf32>
    %71 = arith.mulf %65, %70 : vector<1x128xf32>
    %cst_32 = arith.constant dense<0.000000e+00> : vector<1x24xf32>
    %72 = tpu.matmul %71, %63, %cst_32 {dimension_numbers = #tpu.dot_dimension_numbers<[1], [1], [0], [0], [0, 0, 1, 0], [], []>} : vector<1x128xf32>, vector<24x128xf32>, vector<1x24xf32> -> vector<1x24xf32>
    %cst_33 = arith.constant dense<0.000000e+00> : vector<24x1xf32>
    %73 = tpu.matmul %30, %72, %cst_33 {dimension_numbers = #tpu.dot_dimension_numbers<[1], [1], [0], [0], [0, 0, 1, 0], [], []>} : vector<24x24xf32>, vector<1x24xf32>, vector<24x1xf32> -> vector<24x1xf32>
    %74 = vector.broadcast %33 : vector<24x1xi1> to vector<24x24xi1>
    %75 = arith.andi %27, %74 : vector<24x24xi1>
    %76 = vector.broadcast %35 : vector<1x24xi1> to vector<24x24xi1>
    %77 = arith.andi %75, %76 : vector<24x24xi1>
    %78 = vector.broadcast %72 : vector<1x24xf32> to vector<24x24xf32>
    %79 = vector.broadcast %73 : vector<24x1xf32> to vector<24x24xf32>
    %80 = arith.cmpf ogt, %78, %79 : vector<24x24xf32>
    %81 = vector.broadcast %72 : vector<1x24xf32> to vector<24x24xf32>
    %82 = vector.broadcast %73 : vector<24x1xf32> to vector<24x24xf32>
    %83 = arith.cmpf oeq, %81, %82 : vector<24x24xf32>
    %84 = arith.cmpi slt, %24, %23 : vector<24x24xi32>
    %85 = arith.andi %83, %84 : vector<24x24xi1>
    %86 = arith.ori %80, %85 : vector<24x24xi1>
    %87 = vector.broadcast %73 : vector<24x1xf32> to vector<24x24xf32>
    %88 = vector.broadcast %72 : vector<1x24xf32> to vector<24x24xf32>
    %89 = arith.cmpf ogt, %87, %88 : vector<24x24xf32>
    %90 = vector.broadcast %73 : vector<24x1xf32> to vector<24x24xf32>
    %91 = vector.broadcast %72 : vector<1x24xf32> to vector<24x24xf32>
    %92 = arith.cmpf oeq, %90, %91 : vector<24x24xf32>
    %93 = arith.cmpi slt, %23, %24 : vector<24x24xi32>
    %94 = arith.andi %92, %93 : vector<24x24xi1>
    %95 = arith.ori %89, %94 : vector<24x24xi1>
    %96 = arith.extui %77 : vector<24x24xi1> to vector<24x24xi32>
    %97 = arith.sitofp %96 : vector<24x24xi32> to vector<24x24xf32>
    %98 = arith.andi %77, %86 : vector<24x24xi1>
    %99 = arith.extui %98 : vector<24x24xi1> to vector<24x24xi32>
    %100 = arith.sitofp %99 : vector<24x24xi32> to vector<24x24xf32>
    %cst_34 = arith.constant dense<0.000000e+00> : vector<24xf32>
    %101 = vector.multi_reduction <add>, %100, %cst_34 [1] : vector<24x24xf32> to vector<24xf32>
    %102 = vector.shape_cast %101 : vector<24xf32> to vector<24x1xf32>
    %103 = arith.andi %77, %95 : vector<24x24xi1>
    %104 = arith.extui %103 : vector<24x24xi1> to vector<24x24xi32>
    %105 = arith.sitofp %104 : vector<24x24xi32> to vector<24x24xf32>
    %cst_35 = arith.constant dense<0.000000e+00> : vector<24xf32>
    %106 = vector.multi_reduction <add>, %105, %cst_35 [0] : vector<24x24xf32> to vector<24xf32>
    %107 = vector.shape_cast %106 : vector<24xf32> to vector<1x24xf32>
    %cst_36 = arith.constant dense<0.000000e+00> : vector<24xf32>
    %108 = vector.multi_reduction <add>, %97, %cst_36 [1] : vector<24x24xf32> to vector<24xf32>
    %109 = vector.shape_cast %108 : vector<24xf32> to vector<24x1xf32>
    %cst_37 = arith.constant 8.000000e-01 : f32
    %110 = vector.broadcast %cst_37 : f32 to vector<24x1xf32>
    %111 = arith.mulf %110, %109 : vector<24x1xf32>
    %112 = math.ceil %111 : vector<24x1xf32>
    %cst_38 = arith.constant dense<0.000000e+00> : vector<24xf32>
    %113 = vector.multi_reduction <add>, %97, %cst_38 [0] : vector<24x24xf32> to vector<24xf32>
    %114 = vector.shape_cast %113 : vector<24xf32> to vector<1x24xf32>
    %cst_39 = arith.constant 8.000000e-01 : f32
    %115 = vector.broadcast %cst_39 : f32 to vector<1x24xf32>
    %116 = arith.mulf %115, %114 : vector<1x24xf32>
    %117 = math.ceil %116 : vector<1x24xf32>
    %118 = arith.cmpf olt, %102, %112 : vector<24x1xf32>
    %119 = arith.andi %33, %118 : vector<24x1xi1>
    %120 = arith.cmpf olt, %107, %117 : vector<1x24xf32>
    %121 = arith.andi %35, %120 : vector<1x24xi1>
    %122 = math.tanh %73 : vector<24x1xf32>
    %123 = vector.broadcast %122 : vector<24x1xf32> to vector<24x128xf32>
    %124 = arith.mulf %63, %123 : vector<24x128xf32>
    %cst_40 = arith.constant 0.000000e+00 : f32
    %125 = vector.shape_cast %119 : vector<24x1xi1> to vector<24x1xi1>
    %126 = vector.broadcast %125 : vector<24x1xi1> to vector<24x128xi1>
    %127 = vector.broadcast %cst_40 : f32 to vector<24x128xf32>
    %128 = arith.select %126, %124, %127 : vector<24x128xi1>, vector<24x128xf32>
    %129 = vector.broadcast %22 : vector<1x24xi32> to vector<8x24xi32>
    %130 = arith.cmpi eq, %31, %129 : vector<8x24xi32>
    %131 = vector.broadcast %121 : vector<1x24xi1> to vector<8x24xi1>
    %132 = arith.andi %130, %131 : vector<8x24xi1>
    %133 = arith.extui %132 : vector<8x24xi1> to vector<8x24xi32>
    %134 = arith.sitofp %133 : vector<8x24xi32> to vector<8x24xf32>
    %cst_41 = arith.constant dense<0.000000e+00> : vector<8xf32>
    %135 = vector.multi_reduction <add>, %134, %cst_41 [1] : vector<8x24xf32> to vector<8xf32>
    %136 = vector.shape_cast %135 : vector<8xf32> to vector<8x1xf32>
    %cst_42 = arith.constant dense<0.000000e+00> : vector<8x128xf32>
    %137 = tpu.matmul %134, %128, %cst_42 {dimension_numbers = #tpu.dot_dimension_numbers<[1], [0], [0], [1], [0, 0, 1, 1], [], []>} : vector<8x24xf32>, vector<24x128xf32>, vector<8x128xf32> -> vector<8x128xf32>
    %cst_43 = arith.constant 1.000000e+00 : f32
    %138 = vector.broadcast %cst_43 : f32 to vector<8x1xf32>
    %139 = arith.maximumf %136, %138 : vector<8x1xf32>
    %cst_44 = arith.constant 1.000000e+00 : f32
    %140 = vector.broadcast %cst_44 : f32 to vector<8x1xf32>
    %141 = arith.divf %140, %139 : vector<8x1xf32>
    %142 = vector.broadcast %141 : vector<8x1xf32> to vector<8x128xf32>
    %143 = arith.mulf %137, %142 : vector<8x128xf32>
    %144 = arith.addf %37, %143 : vector<8x128xf32>
    %c0_i32_45 = arith.constant 0 : i32
    %145 = vector.broadcast %c0_i32_45 : i32 to vector<24x1xi32>
    %146 = arith.cmpi eq, %21, %145 : vector<24x1xi32>
    %147 = arith.andi %146, %119 : vector<24x1xi1>
    %cst_46 = arith.constant -1.000000e+30 : f32
    %148 = vector.shape_cast %147 : vector<24x1xi1> to vector<24x1xi1>
    %149 = vector.broadcast %148 : vector<24x1xi1> to vector<24x128xi1>
    %150 = vector.broadcast %cst_46 : f32 to vector<24x128xf32>
    %151 = arith.select %149, %128, %150 : vector<24x128xi1>, vector<24x128xf32>
    %cst_47 = arith.constant dense<0xFF800000> : vector<128xf32>
    %152 = vector.multi_reduction <maximumf>, %151, %cst_47 [0] : vector<24x128xf32> to vector<128xf32>
    %153 = vector.shape_cast %152 : vector<128xf32> to vector<1x128xf32>
    %154 = vector.extract_strided_slice %136 {offsets = [0, 0], sizes = [1, 1], strides = [1, 1]} : vector<8x1xf32> to vector<1x1xf32>
    %cst_48 = arith.constant 0.000000e+00 : f32
    %155 = vector.broadcast %cst_48 : f32 to vector<1x1xf32>
    %156 = arith.cmpf ogt, %154, %155 : vector<1x1xf32>
    %cst_49 = arith.constant 0.000000e+00 : f32
    %157 = vector.shape_cast %156 : vector<1x1xi1> to vector<1x1xi1>
    %158 = vector.broadcast %157 : vector<1x1xi1> to vector<1x128xi1>
    %159 = vector.broadcast %cst_49 : f32 to vector<1x128xf32>
    %160 = arith.select %158, %153, %159 : vector<1x128xi1>, vector<1x128xf32>
    %c0_50 = arith.constant 0 : index
    %c0_51 = arith.constant 0 : index
    %161 = vector.load %arg16[%c0_50, %c0_51] : memref<8x128xf32, #tpu.memory_space<vmem>>, vector<1x128xf32>
    tpu.vector_store %arg16[%c0_50, %c0_51], %160 {strides = array<i32>} : memref<8x128xf32, #tpu.memory_space<vmem>>, vector<1x128xf32>,
    %c1_i32 = arith.constant 1 : i32
    %162 = vector.broadcast %c1_i32 : i32 to vector<24x1xi32>
    %163 = arith.cmpi eq, %21, %162 : vector<24x1xi32>
    %164 = arith.andi %163, %119 : vector<24x1xi1>
    %cst_52 = arith.constant -1.000000e+30 : f32
    %165 = vector.shape_cast %164 : vector<24x1xi1> to vector<24x1xi1>
    %166 = vector.broadcast %165 : vector<24x1xi1> to vector<24x128xi1>
    %167 = vector.broadcast %cst_52 : f32 to vector<24x128xf32>
    %168 = arith.select %166, %128, %167 : vector<24x128xi1>, vector<24x128xf32>
    %cst_53 = arith.constant dense<0xFF800000> : vector<128xf32>
    %169 = vector.multi_reduction <maximumf>, %168, %cst_53 [0] : vector<24x128xf32> to vector<128xf32>
    %170 = vector.shape_cast %169 : vector<128xf32> to vector<1x128xf32>
    %171 = vector.extract_strided_slice %136 {offsets = [1, 0], sizes = [1, 1], strides = [1, 1]} : vector<8x1xf32> to vector<1x1xf32>
    %cst_54 = arith.constant 0.000000e+00 : f32
    %172 = vector.broadcast %cst_54 : f32 to vector<1x1xf32>
    %173 = arith.cmpf ogt, %171, %172 : vector<1x1xf32>
    %cst_55 = arith.constant 0.000000e+00 : f32
    %174 = vector.shape_cast %173 : vector<1x1xi1> to vector<1x1xi1>
    %175 = vector.broadcast %174 : vector<1x1xi1> to vector<1x128xi1>
    %176 = vector.broadcast %cst_55 : f32 to vector<1x128xf32>
    %177 = arith.select %175, %170, %176 : vector<1x128xi1>, vector<1x128xf32>
    %c1 = arith.constant 1 : index
    %c0_56 = arith.constant 0 : index
    %178 = vector.load %arg16[%c1, %c0_56] : memref<8x128xf32, #tpu.memory_space<vmem>>, vector<1x128xf32>
    tpu.vector_store %arg16[%c1, %c0_56], %177 {strides = array<i32>} : memref<8x128xf32, #tpu.memory_space<vmem>>, vector<1x128xf32>,
    %c2_i32 = arith.constant 2 : i32
    %179 = vector.broadcast %c2_i32 : i32 to vector<24x1xi32>
    %180 = arith.cmpi eq, %21, %179 : vector<24x1xi32>
    %181 = arith.andi %180, %119 : vector<24x1xi1>
    %cst_57 = arith.constant -1.000000e+30 : f32
    %182 = vector.shape_cast %181 : vector<24x1xi1> to vector<24x1xi1>
    %183 = vector.broadcast %182 : vector<24x1xi1> to vector<24x128xi1>
    %184 = vector.broadcast %cst_57 : f32 to vector<24x128xf32>
    %185 = arith.select %183, %128, %184 : vector<24x128xi1>, vector<24x128xf32>
    %cst_58 = arith.constant dense<0xFF800000> : vector<128xf32>
    %186 = vector.multi_reduction <maximumf>, %185, %cst_58 [0] : vector<24x128xf32> to vector<128xf32>
    %187 = vector.shape_cast %186 : vector<128xf32> to vector<1x128xf32>
    %188 = vector.extract_strided_slice %136 {offsets = [2, 0], sizes = [1, 1], strides = [1, 1]} : vector<8x1xf32> to vector<1x1xf32>
    %cst_59 = arith.constant 0.000000e+00 : f32
    %189 = vector.broadcast %cst_59 : f32 to vector<1x1xf32>
    %190 = arith.cmpf ogt, %188, %189 : vector<1x1xf32>
    %cst_60 = arith.constant 0.000000e+00 : f32
    %191 = vector.shape_cast %190 : vector<1x1xi1> to vector<1x1xi1>
    %192 = vector.broadcast %191 : vector<1x1xi1> to vector<1x128xi1>
    %193 = vector.broadcast %cst_60 : f32 to vector<1x128xf32>
    %194 = arith.select %192, %187, %193 : vector<1x128xi1>, vector<1x128xf32>
    %c2 = arith.constant 2 : index
    %c0_61 = arith.constant 0 : index
    %195 = vector.load %arg16[%c2, %c0_61] : memref<8x128xf32, #tpu.memory_space<vmem>>, vector<1x128xf32>
    tpu.vector_store %arg16[%c2, %c0_61], %194 {strides = array<i32>} : memref<8x128xf32, #tpu.memory_space<vmem>>, vector<1x128xf32>,
    %c3_i32 = arith.constant 3 : i32
    %196 = vector.broadcast %c3_i32 : i32 to vector<24x1xi32>
    %197 = arith.cmpi eq, %21, %196 : vector<24x1xi32>
    %198 = arith.andi %197, %119 : vector<24x1xi1>
    %cst_62 = arith.constant -1.000000e+30 : f32
    %199 = vector.shape_cast %198 : vector<24x1xi1> to vector<24x1xi1>
    %200 = vector.broadcast %199 : vector<24x1xi1> to vector<24x128xi1>
    %201 = vector.broadcast %cst_62 : f32 to vector<24x128xf32>
    %202 = arith.select %200, %128, %201 : vector<24x128xi1>, vector<24x128xf32>
    %cst_63 = arith.constant dense<0xFF800000> : vector<128xf32>
    %203 = vector.multi_reduction <maximumf>, %202, %cst_63 [0] : vector<24x128xf32> to vector<128xf32>
    %204 = vector.shape_cast %203 : vector<128xf32> to vector<1x128xf32>
    %205 = vector.extract_strided_slice %136 {offsets = [3, 0], sizes = [1, 1], strides = [1, 1]} : vector<8x1xf32> to vector<1x1xf32>
    %cst_64 = arith.constant 0.000000e+00 : f32
    %206 = vector.broadcast %cst_64 : f32 to vector<1x1xf32>
    %207 = arith.cmpf ogt, %205, %206 : vector<1x1xf32>
    %cst_65 = arith.constant 0.000000e+00 : f32
    %208 = vector.shape_cast %207 : vector<1x1xi1> to vector<1x1xi1>
    %209 = vector.broadcast %208 : vector<1x1xi1> to vector<1x128xi1>
    %210 = vector.broadcast %cst_65 : f32 to vector<1x128xf32>
    %211 = arith.select %209, %204, %210 : vector<1x128xi1>, vector<1x128xf32>
    %c3 = arith.constant 3 : index
    %c0_66 = arith.constant 0 : index
    %212 = vector.load %arg16[%c3, %c0_66] : memref<8x128xf32, #tpu.memory_space<vmem>>, vector<1x128xf32>
    tpu.vector_store %arg16[%c3, %c0_66], %211 {strides = array<i32>} : memref<8x128xf32, #tpu.memory_space<vmem>>, vector<1x128xf32>,
    %c4_i32 = arith.constant 4 : i32
    %213 = vector.broadcast %c4_i32 : i32 to vector<24x1xi32>
    %214 = arith.cmpi eq, %21, %213 : vector<24x1xi32>
    %215 = arith.andi %214, %119 : vector<24x1xi1>
    %cst_67 = arith.constant -1.000000e+30 : f32
    %216 = vector.shape_cast %215 : vector<24x1xi1> to vector<24x1xi1>
    %217 = vector.broadcast %216 : vector<24x1xi1> to vector<24x128xi1>
    %218 = vector.broadcast %cst_67 : f32 to vector<24x128xf32>
    %219 = arith.select %217, %128, %218 : vector<24x128xi1>, vector<24x128xf32>
    %cst_68 = arith.constant dense<0xFF800000> : vector<128xf32>
    %220 = vector.multi_reduction <maximumf>, %219, %cst_68 [0] : vector<24x128xf32> to vector<128xf32>
    %221 = vector.shape_cast %220 : vector<128xf32> to vector<1x128xf32>
    %222 = vector.extract_strided_slice %136 {offsets = [4, 0], sizes = [1, 1], strides = [1, 1]} : vector<8x1xf32> to vector<1x1xf32>
    %cst_69 = arith.constant 0.000000e+00 : f32
    %223 = vector.broadcast %cst_69 : f32 to vector<1x1xf32>
    %224 = arith.cmpf ogt, %222, %223 : vector<1x1xf32>
    %cst_70 = arith.constant 0.000000e+00 : f32
    %225 = vector.shape_cast %224 : vector<1x1xi1> to vector<1x1xi1>
    %226 = vector.broadcast %225 : vector<1x1xi1> to vector<1x128xi1>
    %227 = vector.broadcast %cst_70 : f32 to vector<1x128xf32>
    %228 = arith.select %226, %221, %227 : vector<1x128xi1>, vector<1x128xf32>
    %c4 = arith.constant 4 : index
    %c0_71 = arith.constant 0 : index
    %229 = vector.load %arg16[%c4, %c0_71] : memref<8x128xf32, #tpu.memory_space<vmem>>, vector<1x128xf32>
    tpu.vector_store %arg16[%c4, %c0_71], %228 {strides = array<i32>} : memref<8x128xf32, #tpu.memory_space<vmem>>, vector<1x128xf32>,
    %c5_i32 = arith.constant 5 : i32
    %230 = vector.broadcast %c5_i32 : i32 to vector<24x1xi32>
    %231 = arith.cmpi eq, %21, %230 : vector<24x1xi32>
    %232 = arith.andi %231, %119 : vector<24x1xi1>
    %cst_72 = arith.constant -1.000000e+30 : f32
    %233 = vector.shape_cast %232 : vector<24x1xi1> to vector<24x1xi1>
    %234 = vector.broadcast %233 : vector<24x1xi1> to vector<24x128xi1>
    %235 = vector.broadcast %cst_72 : f32 to vector<24x128xf32>
    %236 = arith.select %234, %128, %235 : vector<24x128xi1>, vector<24x128xf32>
    %cst_73 = arith.constant dense<0xFF800000> : vector<128xf32>
    %237 = vector.multi_reduction <maximumf>, %236, %cst_73 [0] : vector<24x128xf32> to vector<128xf32>
    %238 = vector.shape_cast %237 : vector<128xf32> to vector<1x128xf32>
    %239 = vector.extract_strided_slice %136 {offsets = [5, 0], sizes = [1, 1], strides = [1, 1]} : vector<8x1xf32> to vector<1x1xf32>
    %cst_74 = arith.constant 0.000000e+00 : f32
    %240 = vector.broadcast %cst_74 : f32 to vector<1x1xf32>
    %241 = arith.cmpf ogt, %239, %240 : vector<1x1xf32>
    %cst_75 = arith.constant 0.000000e+00 : f32
    %242 = vector.shape_cast %241 : vector<1x1xi1> to vector<1x1xi1>
    %243 = vector.broadcast %242 : vector<1x1xi1> to vector<1x128xi1>
    %244 = vector.broadcast %cst_75 : f32 to vector<1x128xf32>
    %245 = arith.select %243, %238, %244 : vector<1x128xi1>, vector<1x128xf32>
    %c5 = arith.constant 5 : index
    %c0_76 = arith.constant 0 : index
    %246 = vector.load %arg16[%c5, %c0_76] : memref<8x128xf32, #tpu.memory_space<vmem>>, vector<1x128xf32>
    tpu.vector_store %arg16[%c5, %c0_76], %245 {strides = array<i32>} : memref<8x128xf32, #tpu.memory_space<vmem>>, vector<1x128xf32>,
    %c6_i32 = arith.constant 6 : i32
    %247 = vector.broadcast %c6_i32 : i32 to vector<24x1xi32>
    %248 = arith.cmpi eq, %21, %247 : vector<24x1xi32>
    %249 = arith.andi %248, %119 : vector<24x1xi1>
    %cst_77 = arith.constant -1.000000e+30 : f32
    %250 = vector.shape_cast %249 : vector<24x1xi1> to vector<24x1xi1>
    %251 = vector.broadcast %250 : vector<24x1xi1> to vector<24x128xi1>
    %252 = vector.broadcast %cst_77 : f32 to vector<24x128xf32>
    %253 = arith.select %251, %128, %252 : vector<24x128xi1>, vector<24x128xf32>
    %cst_78 = arith.constant dense<0xFF800000> : vector<128xf32>
    %254 = vector.multi_reduction <maximumf>, %253, %cst_78 [0] : vector<24x128xf32> to vector<128xf32>
    %255 = vector.shape_cast %254 : vector<128xf32> to vector<1x128xf32>
    %256 = vector.extract_strided_slice %136 {offsets = [6, 0], sizes = [1, 1], strides = [1, 1]} : vector<8x1xf32> to vector<1x1xf32>
    %cst_79 = arith.constant 0.000000e+00 : f32
    %257 = vector.broadcast %cst_79 : f32 to vector<1x1xf32>
    %258 = arith.cmpf ogt, %256, %257 : vector<1x1xf32>
    %cst_80 = arith.constant 0.000000e+00 : f32
    %259 = vector.shape_cast %258 : vector<1x1xi1> to vector<1x1xi1>
    %260 = vector.broadcast %259 : vector<1x1xi1> to vector<1x128xi1>
    %261 = vector.broadcast %cst_80 : f32 to vector<1x128xf32>
    %262 = arith.select %260, %255, %261 : vector<1x128xi1>, vector<1x128xf32>
    %c6 = arith.constant 6 : index
    %c0_81 = arith.constant 0 : index
    %263 = vector.load %arg16[%c6, %c0_81] : memref<8x128xf32, #tpu.memory_space<vmem>>, vector<1x128xf32>
    tpu.vector_store %arg16[%c6, %c0_81], %262 {strides = array<i32>} : memref<8x128xf32, #tpu.memory_space<vmem>>, vector<1x128xf32>,
    %c7_i32 = arith.constant 7 : i32
    %264 = vector.broadcast %c7_i32 : i32 to vector<24x1xi32>
    %265 = arith.cmpi eq, %21, %264 : vector<24x1xi32>
    %266 = arith.andi %265, %119 : vector<24x1xi1>
    %cst_82 = arith.constant -1.000000e+30 : f32
    %267 = vector.shape_cast %266 : vector<24x1xi1> to vector<24x1xi1>
    %268 = vector.broadcast %267 : vector<24x1xi1> to vector<24x128xi1>
    %269 = vector.broadcast %cst_82 : f32 to vector<24x128xf32>
    %270 = arith.select %268, %128, %269 : vector<24x128xi1>, vector<24x128xf32>
    %cst_83 = arith.constant dense<0xFF800000> : vector<128xf32>
    %271 = vector.multi_reduction <maximumf>, %270, %cst_83 [0] : vector<24x128xf32> to vector<128xf32>
    %272 = vector.shape_cast %271 : vector<128xf32> to vector<1x128xf32>
    %273 = vector.extract_strided_slice %136 {offsets = [7, 0], sizes = [1, 1], strides = [1, 1]} : vector<8x1xf32> to vector<1x1xf32>
    %cst_84 = arith.constant 0.000000e+00 : f32
    %274 = vector.broadcast %cst_84 : f32 to vector<1x1xf32>
    %275 = arith.cmpf ogt, %273, %274 : vector<1x1xf32>
    %cst_85 = arith.constant 0.000000e+00 : f32
    %276 = vector.shape_cast %275 : vector<1x1xi1> to vector<1x1xi1>
    %277 = vector.broadcast %276 : vector<1x1xi1> to vector<1x128xi1>
    %278 = vector.broadcast %cst_85 : f32 to vector<1x128xf32>
    %279 = arith.select %277, %272, %278 : vector<1x128xi1>, vector<1x128xf32>
    %c7 = arith.constant 7 : index
    %c0_86 = arith.constant 0 : index
    %280 = vector.load %arg16[%c7, %c0_86] : memref<8x128xf32, #tpu.memory_space<vmem>>, vector<1x128xf32>
    tpu.vector_store %arg16[%c7, %c0_86], %279 {strides = array<i32>} : memref<8x128xf32, #tpu.memory_space<vmem>>, vector<1x128xf32>,
    %c0_87 = arith.constant 0 : index
    %c0_88 = arith.constant 0 : index
    %281 = vector.load %arg16[%c0_87, %c0_88] : memref<8x128xf32, #tpu.memory_space<vmem>>, vector<8x128xf32>
    %282 = arith.addf %36, %281 : vector<8x128xf32>
    %283 = arith.extui %121 : vector<1x24xi1> to vector<1x24xi32>
    %284 = arith.sitofp %283 : vector<1x24xi32> to vector<1x24xf32>
    %285 = vector.broadcast %284 : vector<1x24xf32> to vector<24x24xf32>
    %286 = arith.mulf %20, %285 : vector<24x24xf32>
    %cst_89 = arith.constant dense<0.000000e+00> : vector<24xf32>
    %287 = vector.multi_reduction <add>, %286, %cst_89 [1] : vector<24x24xf32> to vector<24xf32>
    %288 = vector.shape_cast %287 : vector<24xf32> to vector<24x1xf32>
    %cst_90 = arith.constant dense<0.000000e+00> : vector<24x128xf32>
    %289 = tpu.matmul %20, %128, %cst_90 {dimension_numbers = #tpu.dot_dimension_numbers<[1], [0], [0], [1], [0, 0, 1, 1], [], []>} : vector<24x24xf32>, vector<24x128xf32>, vector<24x128xf32> -> vector<24x128xf32>
    %cst_91 = arith.constant 1.000000e+00 : f32
    %290 = vector.broadcast %cst_91 : f32 to vector<24x1xf32>
    %291 = arith.maximumf %288, %290 : vector<24x1xf32>
    %cst_92 = arith.constant 1.000000e+00 : f32
    %292 = vector.broadcast %cst_92 : f32 to vector<24x1xf32>
    %293 = arith.divf %292, %291 : vector<24x1xf32>
    %294 = vector.broadcast %293 : vector<24x1xf32> to vector<24x128xf32>
    %295 = arith.mulf %289, %294 : vector<24x128xf32>
    %c1_93 = arith.constant 1 : index
    %c0_94 = arith.constant 0 : index
    %c0_95 = arith.constant 0 : index
    %296 = vector.load %arg6[%c1_93, %c0_94, %c0_95] : memref<3x256x128xf32, #tpu.memory_space<vmem>>, vector<1x256x128xf32>
    %297 = vector.shape_cast %296 : vector<1x256x128xf32> to vector<256x128xf32>
    %c1_96 = arith.constant 1 : index
    %c0_97 = arith.constant 0 : index
    %c0_98 = arith.constant 0 : index
    %298 = vector.load %arg7[%c1_96, %c0_97, %c0_98] : memref<3x1x128xf32, #tpu.memory_space<vmem>>, vector<1x1x128xf32>
    %299 = vector.shape_cast %298 : vector<1x1x128xf32> to vector<1x128xf32>
    %300 = vector.extract_strided_slice %297 {offsets = [0, 0], sizes = [128, 128], strides = [1, 1]} : vector<256x128xf32> to vector<128x128xf32>
    %cst_99 = arith.constant dense<0.000000e+00> : vector<24x128xf32>
    %301 = tpu.matmul %295, %300, %cst_99 {dimension_numbers = #tpu.dot_dimension_numbers<[1], [0], [0], [1], [0, 0, 1, 1], [], []>} : vector<24x128xf32>, vector<128x128xf32>, vector<24x128xf32> -> vector<24x128xf32>
    %302 = vector.extract_strided_slice %297 {offsets = [128, 0], sizes = [128, 128], strides = [1, 1]} : vector<256x128xf32> to vector<128x128xf32>
    %cst_100 = arith.constant dense<0.000000e+00> : vector<24x128xf32>
    %303 = tpu.matmul %128, %302, %cst_100 {dimension_numbers = #tpu.dot_dimension_numbers<[1], [0], [0], [1], [0, 0, 1, 1], [], []>} : vector<24x128xf32>, vector<128x128xf32>, vector<24x128xf32> -> vector<24x128xf32>
    %304 = arith.addf %301, %303 : vector<24x128xf32>
    %305 = vector.broadcast %299 : vector<1x128xf32> to vector<24x128xf32>
    %306 = arith.addf %304, %305 : vector<24x128xf32>
    %cst_101 = arith.constant 0.000000e+00 : f32
    %307 = vector.broadcast %cst_101 : f32 to vector<24x128xf32>
    %308 = arith.maximumf %306, %307 : vector<24x128xf32>
    %c1_102 = arith.constant 1 : index
    %c0_103 = arith.constant 0 : index
    %c0_104 = arith.constant 0 : index
    %309 = vector.load %arg8[%c1_102, %c0_103, %c0_104] : memref<3x1x128xf32, #tpu.memory_space<vmem>>, vector<1x1x128xf32>
    %310 = vector.shape_cast %309 : vector<1x1x128xf32> to vector<1x128xf32>
    %311 = arith.mulf %310, %310 : vector<1x128xf32>
    %cst_105 = arith.constant dense<0.000000e+00> : vector<1xf32>
    %312 = vector.multi_reduction <add>, %311, %cst_105 [1] : vector<1x128xf32> to vector<1xf32>
    %313 = vector.shape_cast %312 : vector<1xf32> to vector<1x1xf32>
    %314 = math.rsqrt %313 : vector<1x1xf32>
    %315 = vector.broadcast %314 : vector<1x1xf32> to vector<1x128xf32>
    %316 = arith.mulf %310, %315 : vector<1x128xf32>
    %cst_106 = arith.constant dense<0.000000e+00> : vector<1x24xf32>
    %317 = tpu.matmul %316, %308, %cst_106 {dimension_numbers = #tpu.dot_dimension_numbers<[1], [1], [0], [0], [0, 0, 1, 0], [], []>} : vector<1x128xf32>, vector<24x128xf32>, vector<1x24xf32> -> vector<1x24xf32>
    %cst_107 = arith.constant dense<0.000000e+00> : vector<24x1xf32>
    %318 = tpu.matmul %30, %317, %cst_107 {dimension_numbers = #tpu.dot_dimension_numbers<[1], [1], [0], [0], [0, 0, 1, 0], [], []>} : vector<24x24xf32>, vector<1x24xf32>, vector<24x1xf32> -> vector<24x1xf32>
    %319 = vector.broadcast %119 : vector<24x1xi1> to vector<24x24xi1>
    %320 = arith.andi %27, %319 : vector<24x24xi1>
    %321 = vector.broadcast %121 : vector<1x24xi1> to vector<24x24xi1>
    %322 = arith.andi %320, %321 : vector<24x24xi1>
    %323 = vector.broadcast %317 : vector<1x24xf32> to vector<24x24xf32>
    %324 = vector.broadcast %318 : vector<24x1xf32> to vector<24x24xf32>
    %325 = arith.cmpf ogt, %323, %324 : vector<24x24xf32>
    %326 = vector.broadcast %317 : vector<1x24xf32> to vector<24x24xf32>
    %327 = vector.broadcast %318 : vector<24x1xf32> to vector<24x24xf32>
    %328 = arith.cmpf oeq, %326, %327 : vector<24x24xf32>
    %329 = arith.cmpi slt, %24, %23 : vector<24x24xi32>
    %330 = arith.andi %328, %329 : vector<24x24xi1>
    %331 = arith.ori %325, %330 : vector<24x24xi1>
    %332 = vector.broadcast %318 : vector<24x1xf32> to vector<24x24xf32>
    %333 = vector.broadcast %317 : vector<1x24xf32> to vector<24x24xf32>
    %334 = arith.cmpf ogt, %332, %333 : vector<24x24xf32>
    %335 = vector.broadcast %318 : vector<24x1xf32> to vector<24x24xf32>
    %336 = vector.broadcast %317 : vector<1x24xf32> to vector<24x24xf32>
    %337 = arith.cmpf oeq, %335, %336 : vector<24x24xf32>
    %338 = arith.cmpi slt, %23, %24 : vector<24x24xi32>
    %339 = arith.andi %337, %338 : vector<24x24xi1>
    %340 = arith.ori %334, %339 : vector<24x24xi1>
    %341 = arith.extui %322 : vector<24x24xi1> to vector<24x24xi32>
    %342 = arith.sitofp %341 : vector<24x24xi32> to vector<24x24xf32>
    %343 = arith.andi %322, %331 : vector<24x24xi1>
    %344 = arith.extui %343 : vector<24x24xi1> to vector<24x24xi32>
    %345 = arith.sitofp %344 : vector<24x24xi32> to vector<24x24xf32>
    %cst_108 = arith.constant dense<0.000000e+00> : vector<24xf32>
    %346 = vector.multi_reduction <add>, %345, %cst_108 [1] : vector<24x24xf32> to vector<24xf32>
    %347 = vector.shape_cast %346 : vector<24xf32> to vector<24x1xf32>
    %348 = arith.andi %322, %340 : vector<24x24xi1>
    %349 = arith.extui %348 : vector<24x24xi1> to vector<24x24xi32>
    %350 = arith.sitofp %349 : vector<24x24xi32> to vector<24x24xf32>
    %cst_109 = arith.constant dense<0.000000e+00> : vector<24xf32>
    %351 = vector.multi_reduction <add>, %350, %cst_109 [0] : vector<24x24xf32> to vector<24xf32>
    %352 = vector.shape_cast %351 : vector<24xf32> to vector<1x24xf32>
    %cst_110 = arith.constant dense<0.000000e+00> : vector<24xf32>
    %353 = vector.multi_reduction <add>, %342, %cst_110 [1] : vector<24x24xf32> to vector<24xf32>
    %354 = vector.shape_cast %353 : vector<24xf32> to vector<24x1xf32>
    %cst_111 = arith.constant 8.000000e-01 : f32
    %355 = vector.broadcast %cst_111 : f32 to vector<24x1xf32>
    %356 = arith.mulf %355, %354 : vector<24x1xf32>
    %357 = math.ceil %356 : vector<24x1xf32>
    %cst_112 = arith.constant dense<0.000000e+00> : vector<24xf32>
    %358 = vector.multi_reduction <add>, %342, %cst_112 [0] : vector<24x24xf32> to vector<24xf32>
    %359 = vector.shape_cast %358 : vector<24xf32> to vector<1x24xf32>
    %cst_113 = arith.constant 8.000000e-01 : f32
    %360 = vector.broadcast %cst_113 : f32 to vector<1x24xf32>
    %361 = arith.mulf %360, %359 : vector<1x24xf32>
    %362 = math.ceil %361 : vector<1x24xf32>
    %363 = arith.cmpf olt, %347, %357 : vector<24x1xf32>
    %364 = arith.andi %119, %363 : vector<24x1xi1>
    %365 = arith.cmpf olt, %352, %362 : vector<1x24xf32>
    %366 = arith.andi %121, %365 : vector<1x24xi1>
    %367 = math.tanh %318 : vector<24x1xf32>
    %368 = vector.broadcast %367 : vector<24x1xf32> to vector<24x128xf32>
    %369 = arith.mulf %308, %368 : vector<24x128xf32>
    %cst_114 = arith.constant 0.000000e+00 : f32
    %370 = vector.shape_cast %364 : vector<24x1xi1> to vector<24x1xi1>
    %371 = vector.broadcast %370 : vector<24x1xi1> to vector<24x128xi1>
    %372 = vector.broadcast %cst_114 : f32 to vector<24x128xf32>
    %373 = arith.select %371, %369, %372 : vector<24x128xi1>, vector<24x128xf32>
    %374 = vector.broadcast %22 : vector<1x24xi32> to vector<8x24xi32>
    %375 = arith.cmpi eq, %31, %374 : vector<8x24xi32>
    %376 = vector.broadcast %366 : vector<1x24xi1> to vector<8x24xi1>
    %377 = arith.andi %375, %376 : vector<8x24xi1>
    %378 = arith.extui %377 : vector<8x24xi1> to vector<8x24xi32>
    %379 = arith.sitofp %378 : vector<8x24xi32> to vector<8x24xf32>
    %cst_115 = arith.constant dense<0.000000e+00> : vector<8xf32>
    %380 = vector.multi_reduction <add>, %379, %cst_115 [1] : vector<8x24xf32> to vector<8xf32>
    %381 = vector.shape_cast %380 : vector<8xf32> to vector<8x1xf32>
    %cst_116 = arith.constant dense<0.000000e+00> : vector<8x128xf32>
    %382 = tpu.matmul %379, %373, %cst_116 {dimension_numbers = #tpu.dot_dimension_numbers<[1], [0], [0], [1], [0, 0, 1, 1], [], []>} : vector<8x24xf32>, vector<24x128xf32>, vector<8x128xf32> -> vector<8x128xf32>
    %cst_117 = arith.constant 1.000000e+00 : f32
    %383 = vector.broadcast %cst_117 : f32 to vector<8x1xf32>
    %384 = arith.maximumf %381, %383 : vector<8x1xf32>
    %cst_118 = arith.constant 1.000000e+00 : f32
    %385 = vector.broadcast %cst_118 : f32 to vector<8x1xf32>
    %386 = arith.divf %385, %384 : vector<8x1xf32>
    %387 = vector.broadcast %386 : vector<8x1xf32> to vector<8x128xf32>
    %388 = arith.mulf %382, %387 : vector<8x128xf32>
    %389 = arith.addf %144, %388 : vector<8x128xf32>
    %c0_i32_119 = arith.constant 0 : i32
    %390 = vector.broadcast %c0_i32_119 : i32 to vector<24x1xi32>
    %391 = arith.cmpi eq, %21, %390 : vector<24x1xi32>
    %392 = arith.andi %391, %364 : vector<24x1xi1>
    %cst_120 = arith.constant -1.000000e+30 : f32
    %393 = vector.shape_cast %392 : vector<24x1xi1> to vector<24x1xi1>
    %394 = vector.broadcast %393 : vector<24x1xi1> to vector<24x128xi1>
    %395 = vector.broadcast %cst_120 : f32 to vector<24x128xf32>
    %396 = arith.select %394, %373, %395 : vector<24x128xi1>, vector<24x128xf32>
    %cst_121 = arith.constant dense<0xFF800000> : vector<128xf32>
    %397 = vector.multi_reduction <maximumf>, %396, %cst_121 [0] : vector<24x128xf32> to vector<128xf32>
    %398 = vector.shape_cast %397 : vector<128xf32> to vector<1x128xf32>
    %399 = vector.extract_strided_slice %381 {offsets = [0, 0], sizes = [1, 1], strides = [1, 1]} : vector<8x1xf32> to vector<1x1xf32>
    %cst_122 = arith.constant 0.000000e+00 : f32
    %400 = vector.broadcast %cst_122 : f32 to vector<1x1xf32>
    %401 = arith.cmpf ogt, %399, %400 : vector<1x1xf32>
    %cst_123 = arith.constant 0.000000e+00 : f32
    %402 = vector.shape_cast %401 : vector<1x1xi1> to vector<1x1xi1>
    %403 = vector.broadcast %402 : vector<1x1xi1> to vector<1x128xi1>
    %404 = vector.broadcast %cst_123 : f32 to vector<1x128xf32>
    %405 = arith.select %403, %398, %404 : vector<1x128xi1>, vector<1x128xf32>
    %c0_124 = arith.constant 0 : index
    %c0_125 = arith.constant 0 : index
    %406 = vector.load %arg16[%c0_124, %c0_125] : memref<8x128xf32, #tpu.memory_space<vmem>>, vector<1x128xf32>
    tpu.vector_store %arg16[%c0_124, %c0_125], %405 {strides = array<i32>} : memref<8x128xf32, #tpu.memory_space<vmem>>, vector<1x128xf32>,
    %c1_i32_126 = arith.constant 1 : i32
    %407 = vector.broadcast %c1_i32_126 : i32 to vector<24x1xi32>
    %408 = arith.cmpi eq, %21, %407 : vector<24x1xi32>
    %409 = arith.andi %408, %364 : vector<24x1xi1>
    %cst_127 = arith.constant -1.000000e+30 : f32
    %410 = vector.shape_cast %409 : vector<24x1xi1> to vector<24x1xi1>
    %411 = vector.broadcast %410 : vector<24x1xi1> to vector<24x128xi1>
    %412 = vector.broadcast %cst_127 : f32 to vector<24x128xf32>
    %413 = arith.select %411, %373, %412 : vector<24x128xi1>, vector<24x128xf32>
    %cst_128 = arith.constant dense<0xFF800000> : vector<128xf32>
    %414 = vector.multi_reduction <maximumf>, %413, %cst_128 [0] : vector<24x128xf32> to vector<128xf32>
    %415 = vector.shape_cast %414 : vector<128xf32> to vector<1x128xf32>
    %416 = vector.extract_strided_slice %381 {offsets = [1, 0], sizes = [1, 1], strides = [1, 1]} : vector<8x1xf32> to vector<1x1xf32>
    %cst_129 = arith.constant 0.000000e+00 : f32
    %417 = vector.broadcast %cst_129 : f32 to vector<1x1xf32>
    %418 = arith.cmpf ogt, %416, %417 : vector<1x1xf32>
    %cst_130 = arith.constant 0.000000e+00 : f32
    %419 = vector.shape_cast %418 : vector<1x1xi1> to vector<1x1xi1>
    %420 = vector.broadcast %419 : vector<1x1xi1> to vector<1x128xi1>
    %421 = vector.broadcast %cst_130 : f32 to vector<1x128xf32>
    %422 = arith.select %420, %415, %421 : vector<1x128xi1>, vector<1x128xf32>
    %c1_131 = arith.constant 1 : index
    %c0_132 = arith.constant 0 : index
    %423 = vector.load %arg16[%c1_131, %c0_132] : memref<8x128xf32, #tpu.memory_space<vmem>>, vector<1x128xf32>
    tpu.vector_store %arg16[%c1_131, %c0_132], %422 {strides = array<i32>} : memref<8x128xf32, #tpu.memory_space<vmem>>, vector<1x128xf32>,
    %c2_i32_133 = arith.constant 2 : i32
    %424 = vector.broadcast %c2_i32_133 : i32 to vector<24x1xi32>
    %425 = arith.cmpi eq, %21, %424 : vector<24x1xi32>
    %426 = arith.andi %425, %364 : vector<24x1xi1>
    %cst_134 = arith.constant -1.000000e+30 : f32
    %427 = vector.shape_cast %426 : vector<24x1xi1> to vector<24x1xi1>
    %428 = vector.broadcast %427 : vector<24x1xi1> to vector<24x128xi1>
    %429 = vector.broadcast %cst_134 : f32 to vector<24x128xf32>
    %430 = arith.select %428, %373, %429 : vector<24x128xi1>, vector<24x128xf32>
    %cst_135 = arith.constant dense<0xFF800000> : vector<128xf32>
    %431 = vector.multi_reduction <maximumf>, %430, %cst_135 [0] : vector<24x128xf32> to vector<128xf32>
    %432 = vector.shape_cast %431 : vector<128xf32> to vector<1x128xf32>
    %433 = vector.extract_strided_slice %381 {offsets = [2, 0], sizes = [1, 1], strides = [1, 1]} : vector<8x1xf32> to vector<1x1xf32>
    %cst_136 = arith.constant 0.000000e+00 : f32
    %434 = vector.broadcast %cst_136 : f32 to vector<1x1xf32>
    %435 = arith.cmpf ogt, %433, %434 : vector<1x1xf32>
    %cst_137 = arith.constant 0.000000e+00 : f32
    %436 = vector.shape_cast %435 : vector<1x1xi1> to vector<1x1xi1>
    %437 = vector.broadcast %436 : vector<1x1xi1> to vector<1x128xi1>
    %438 = vector.broadcast %cst_137 : f32 to vector<1x128xf32>
    %439 = arith.select %437, %432, %438 : vector<1x128xi1>, vector<1x128xf32>
    %c2_138 = arith.constant 2 : index
    %c0_139 = arith.constant 0 : index
    %440 = vector.load %arg16[%c2_138, %c0_139] : memref<8x128xf32, #tpu.memory_space<vmem>>, vector<1x128xf32>
    tpu.vector_store %arg16[%c2_138, %c0_139], %439 {strides = array<i32>} : memref<8x128xf32, #tpu.memory_space<vmem>>, vector<1x128xf32>,
    %c3_i32_140 = arith.constant 3 : i32
    %441 = vector.broadcast %c3_i32_140 : i32 to vector<24x1xi32>
    %442 = arith.cmpi eq, %21, %441 : vector<24x1xi32>
    %443 = arith.andi %442, %364 : vector<24x1xi1>
    %cst_141 = arith.constant -1.000000e+30 : f32
    %444 = vector.shape_cast %443 : vector<24x1xi1> to vector<24x1xi1>
    %445 = vector.broadcast %444 : vector<24x1xi1> to vector<24x128xi1>
    %446 = vector.broadcast %cst_141 : f32 to vector<24x128xf32>
    %447 = arith.select %445, %373, %446 : vector<24x128xi1>, vector<24x128xf32>
    %cst_142 = arith.constant dense<0xFF800000> : vector<128xf32>
    %448 = vector.multi_reduction <maximumf>, %447, %cst_142 [0] : vector<24x128xf32> to vector<128xf32>
    %449 = vector.shape_cast %448 : vector<128xf32> to vector<1x128xf32>
    %450 = vector.extract_strided_slice %381 {offsets = [3, 0], sizes = [1, 1], strides = [1, 1]} : vector<8x1xf32> to vector<1x1xf32>
    %cst_143 = arith.constant 0.000000e+00 : f32
    %451 = vector.broadcast %cst_143 : f32 to vector<1x1xf32>
    %452 = arith.cmpf ogt, %450, %451 : vector<1x1xf32>
    %cst_144 = arith.constant 0.000000e+00 : f32
    %453 = vector.shape_cast %452 : vector<1x1xi1> to vector<1x1xi1>
    %454 = vector.broadcast %453 : vector<1x1xi1> to vector<1x128xi1>
    %455 = vector.broadcast %cst_144 : f32 to vector<1x128xf32>
    %456 = arith.select %454, %449, %455 : vector<1x128xi1>, vector<1x128xf32>
    %c3_145 = arith.constant 3 : index
    %c0_146 = arith.constant 0 : index
    %457 = vector.load %arg16[%c3_145, %c0_146] : memref<8x128xf32, #tpu.memory_space<vmem>>, vector<1x128xf32>
    tpu.vector_store %arg16[%c3_145, %c0_146], %456 {strides = array<i32>} : memref<8x128xf32, #tpu.memory_space<vmem>>, vector<1x128xf32>,
    %c4_i32_147 = arith.constant 4 : i32
    %458 = vector.broadcast %c4_i32_147 : i32 to vector<24x1xi32>
    %459 = arith.cmpi eq, %21, %458 : vector<24x1xi32>
    %460 = arith.andi %459, %364 : vector<24x1xi1>
    %cst_148 = arith.constant -1.000000e+30 : f32
    %461 = vector.shape_cast %460 : vector<24x1xi1> to vector<24x1xi1>
    %462 = vector.broadcast %461 : vector<24x1xi1> to vector<24x128xi1>
    %463 = vector.broadcast %cst_148 : f32 to vector<24x128xf32>
    %464 = arith.select %462, %373, %463 : vector<24x128xi1>, vector<24x128xf32>
    %cst_149 = arith.constant dense<0xFF800000> : vector<128xf32>
    %465 = vector.multi_reduction <maximumf>, %464, %cst_149 [0] : vector<24x128xf32> to vector<128xf32>
    %466 = vector.shape_cast %465 : vector<128xf32> to vector<1x128xf32>
    %467 = vector.extract_strided_slice %381 {offsets = [4, 0], sizes = [1, 1], strides = [1, 1]} : vector<8x1xf32> to vector<1x1xf32>
    %cst_150 = arith.constant 0.000000e+00 : f32
    %468 = vector.broadcast %cst_150 : f32 to vector<1x1xf32>
    %469 = arith.cmpf ogt, %467, %468 : vector<1x1xf32>
    %cst_151 = arith.constant 0.000000e+00 : f32
    %470 = vector.shape_cast %469 : vector<1x1xi1> to vector<1x1xi1>
    %471 = vector.broadcast %470 : vector<1x1xi1> to vector<1x128xi1>
    %472 = vector.broadcast %cst_151 : f32 to vector<1x128xf32>
    %473 = arith.select %471, %466, %472 : vector<1x128xi1>, vector<1x128xf32>
    %c4_152 = arith.constant 4 : index
    %c0_153 = arith.constant 0 : index
    %474 = vector.load %arg16[%c4_152, %c0_153] : memref<8x128xf32, #tpu.memory_space<vmem>>, vector<1x128xf32>
    tpu.vector_store %arg16[%c4_152, %c0_153], %473 {strides = array<i32>} : memref<8x128xf32, #tpu.memory_space<vmem>>, vector<1x128xf32>,
    %c5_i32_154 = arith.constant 5 : i32
    %475 = vector.broadcast %c5_i32_154 : i32 to vector<24x1xi32>
    %476 = arith.cmpi eq, %21, %475 : vector<24x1xi32>
    %477 = arith.andi %476, %364 : vector<24x1xi1>
    %cst_155 = arith.constant -1.000000e+30 : f32
    %478 = vector.shape_cast %477 : vector<24x1xi1> to vector<24x1xi1>
    %479 = vector.broadcast %478 : vector<24x1xi1> to vector<24x128xi1>
    %480 = vector.broadcast %cst_155 : f32 to vector<24x128xf32>
    %481 = arith.select %479, %373, %480 : vector<24x128xi1>, vector<24x128xf32>
    %cst_156 = arith.constant dense<0xFF800000> : vector<128xf32>
    %482 = vector.multi_reduction <maximumf>, %481, %cst_156 [0] : vector<24x128xf32> to vector<128xf32>
    %483 = vector.shape_cast %482 : vector<128xf32> to vector<1x128xf32>
    %484 = vector.extract_strided_slice %381 {offsets = [5, 0], sizes = [1, 1], strides = [1, 1]} : vector<8x1xf32> to vector<1x1xf32>
    %cst_157 = arith.constant 0.000000e+00 : f32
    %485 = vector.broadcast %cst_157 : f32 to vector<1x1xf32>
    %486 = arith.cmpf ogt, %484, %485 : vector<1x1xf32>
    %cst_158 = arith.constant 0.000000e+00 : f32
    %487 = vector.shape_cast %486 : vector<1x1xi1> to vector<1x1xi1>
    %488 = vector.broadcast %487 : vector<1x1xi1> to vector<1x128xi1>
    %489 = vector.broadcast %cst_158 : f32 to vector<1x128xf32>
    %490 = arith.select %488, %483, %489 : vector<1x128xi1>, vector<1x128xf32>
    %c5_159 = arith.constant 5 : index
    %c0_160 = arith.constant 0 : index
    %491 = vector.load %arg16[%c5_159, %c0_160] : memref<8x128xf32, #tpu.memory_space<vmem>>, vector<1x128xf32>
    tpu.vector_store %arg16[%c5_159, %c0_160], %490 {strides = array<i32>} : memref<8x128xf32, #tpu.memory_space<vmem>>, vector<1x128xf32>,
    %c6_i32_161 = arith.constant 6 : i32
    %492 = vector.broadcast %c6_i32_161 : i32 to vector<24x1xi32>
    %493 = arith.cmpi eq, %21, %492 : vector<24x1xi32>
    %494 = arith.andi %493, %364 : vector<24x1xi1>
    %cst_162 = arith.constant -1.000000e+30 : f32
    %495 = vector.shape_cast %494 : vector<24x1xi1> to vector<24x1xi1>
    %496 = vector.broadcast %495 : vector<24x1xi1> to vector<24x128xi1>
    %497 = vector.broadcast %cst_162 : f32 to vector<24x128xf32>
    %498 = arith.select %496, %373, %497 : vector<24x128xi1>, vector<24x128xf32>
    %cst_163 = arith.constant dense<0xFF800000> : vector<128xf32>
    %499 = vector.multi_reduction <maximumf>, %498, %cst_163 [0] : vector<24x128xf32> to vector<128xf32>
    %500 = vector.shape_cast %499 : vector<128xf32> to vector<1x128xf32>
    %501 = vector.extract_strided_slice %381 {offsets = [6, 0], sizes = [1, 1], strides = [1, 1]} : vector<8x1xf32> to vector<1x1xf32>
    %cst_164 = arith.constant 0.000000e+00 : f32
    %502 = vector.broadcast %cst_164 : f32 to vector<1x1xf32>
    %503 = arith.cmpf ogt, %501, %502 : vector<1x1xf32>
    %cst_165 = arith.constant 0.000000e+00 : f32
    %504 = vector.shape_cast %503 : vector<1x1xi1> to vector<1x1xi1>
    %505 = vector.broadcast %504 : vector<1x1xi1> to vector<1x128xi1>
    %506 = vector.broadcast %cst_165 : f32 to vector<1x128xf32>
    %507 = arith.select %505, %500, %506 : vector<1x128xi1>, vector<1x128xf32>
    %c6_166 = arith.constant 6 : index
    %c0_167 = arith.constant 0 : index
    %508 = vector.load %arg16[%c6_166, %c0_167] : memref<8x128xf32, #tpu.memory_space<vmem>>, vector<1x128xf32>
    tpu.vector_store %arg16[%c6_166, %c0_167], %507 {strides = array<i32>} : memref<8x128xf32, #tpu.memory_space<vmem>>, vector<1x128xf32>,
    %c7_i32_168 = arith.constant 7 : i32
    %509 = vector.broadcast %c7_i32_168 : i32 to vector<24x1xi32>
    %510 = arith.cmpi eq, %21, %509 : vector<24x1xi32>
    %511 = arith.andi %510, %364 : vector<24x1xi1>
    %cst_169 = arith.constant -1.000000e+30 : f32
    %512 = vector.shape_cast %511 : vector<24x1xi1> to vector<24x1xi1>
    %513 = vector.broadcast %512 : vector<24x1xi1> to vector<24x128xi1>
    %514 = vector.broadcast %cst_169 : f32 to vector<24x128xf32>
    %515 = arith.select %513, %373, %514 : vector<24x128xi1>, vector<24x128xf32>
    %cst_170 = arith.constant dense<0xFF800000> : vector<128xf32>
    %516 = vector.multi_reduction <maximumf>, %515, %cst_170 [0] : vector<24x128xf32> to vector<128xf32>
    %517 = vector.shape_cast %516 : vector<128xf32> to vector<1x128xf32>
    %518 = vector.extract_strided_slice %381 {offsets = [7, 0], sizes = [1, 1], strides = [1, 1]} : vector<8x1xf32> to vector<1x1xf32>
    %cst_171 = arith.constant 0.000000e+00 : f32
    %519 = vector.broadcast %cst_171 : f32 to vector<1x1xf32>
    %520 = arith.cmpf ogt, %518, %519 : vector<1x1xf32>
    %cst_172 = arith.constant 0.000000e+00 : f32
    %521 = vector.shape_cast %520 : vector<1x1xi1> to vector<1x1xi1>
    %522 = vector.broadcast %521 : vector<1x1xi1> to vector<1x128xi1>
    %523 = vector.broadcast %cst_172 : f32 to vector<1x128xf32>
    %524 = arith.select %522, %517, %523 : vector<1x128xi1>, vector<1x128xf32>
    %c7_173 = arith.constant 7 : index
    %c0_174 = arith.constant 0 : index
    %525 = vector.load %arg16[%c7_173, %c0_174] : memref<8x128xf32, #tpu.memory_space<vmem>>, vector<1x128xf32>
    tpu.vector_store %arg16[%c7_173, %c0_174], %524 {strides = array<i32>} : memref<8x128xf32, #tpu.memory_space<vmem>>, vector<1x128xf32>,
    %c0_175 = arith.constant 0 : index
    %c0_176 = arith.constant 0 : index
    %526 = vector.load %arg16[%c0_175, %c0_176] : memref<8x128xf32, #tpu.memory_space<vmem>>, vector<8x128xf32>
    %527 = arith.addf %282, %526 : vector<8x128xf32>
    %528 = arith.extui %366 : vector<1x24xi1> to vector<1x24xi32>
    %529 = arith.sitofp %528 : vector<1x24xi32> to vector<1x24xf32>
    %530 = vector.broadcast %529 : vector<1x24xf32> to vector<24x24xf32>
    %531 = arith.mulf %20, %530 : vector<24x24xf32>
    %cst_177 = arith.constant dense<0.000000e+00> : vector<24xf32>
    %532 = vector.multi_reduction <add>, %531, %cst_177 [1] : vector<24x24xf32> to vector<24xf32>
    %533 = vector.shape_cast %532 : vector<24xf32> to vector<24x1xf32>
    %cst_178 = arith.constant dense<0.000000e+00> : vector<24x128xf32>
    %534 = tpu.matmul %20, %373, %cst_178 {dimension_numbers = #tpu.dot_dimension_numbers<[1], [0], [0], [1], [0, 0, 1, 1], [], []>} : vector<24x24xf32>, vector<24x128xf32>, vector<24x128xf32> -> vector<24x128xf32>
    %cst_179 = arith.constant 1.000000e+00 : f32
    %535 = vector.broadcast %cst_179 : f32 to vector<24x1xf32>
    %536 = arith.maximumf %533, %535 : vector<24x1xf32>
    %cst_180 = arith.constant 1.000000e+00 : f32
    %537 = vector.broadcast %cst_180 : f32 to vector<24x1xf32>
    %538 = arith.divf %537, %536 : vector<24x1xf32>
    %539 = vector.broadcast %538 : vector<24x1xf32> to vector<24x128xf32>
    %540 = arith.mulf %534, %539 : vector<24x128xf32>
    %c2_181 = arith.constant 2 : index
    %c0_182 = arith.constant 0 : index
    %c0_183 = arith.constant 0 : index
    %541 = vector.load %arg6[%c2_181, %c0_182, %c0_183] : memref<3x256x128xf32, #tpu.memory_space<vmem>>, vector<1x256x128xf32>
    %542 = vector.shape_cast %541 : vector<1x256x128xf32> to vector<256x128xf32>
    %c2_184 = arith.constant 2 : index
    %c0_185 = arith.constant 0 : index
    %c0_186 = arith.constant 0 : index
    %543 = vector.load %arg7[%c2_184, %c0_185, %c0_186] : memref<3x1x128xf32, #tpu.memory_space<vmem>>, vector<1x1x128xf32>
    %544 = vector.shape_cast %543 : vector<1x1x128xf32> to vector<1x128xf32>
    %545 = vector.extract_strided_slice %542 {offsets = [0, 0], sizes = [128, 128], strides = [1, 1]} : vector<256x128xf32> to vector<128x128xf32>
    %cst_187 = arith.constant dense<0.000000e+00> : vector<24x128xf32>
    %546 = tpu.matmul %540, %545, %cst_187 {dimension_numbers = #tpu.dot_dimension_numbers<[1], [0], [0], [1], [0, 0, 1, 1], [], []>} : vector<24x128xf32>, vector<128x128xf32>, vector<24x128xf32> -> vector<24x128xf32>
    %547 = vector.extract_strided_slice %542 {offsets = [128, 0], sizes = [128, 128], strides = [1, 1]} : vector<256x128xf32> to vector<128x128xf32>
    %cst_188 = arith.constant dense<0.000000e+00> : vector<24x128xf32>
    %548 = tpu.matmul %373, %547, %cst_188 {dimension_numbers = #tpu.dot_dimension_numbers<[1], [0], [0], [1], [0, 0, 1, 1], [], []>} : vector<24x128xf32>, vector<128x128xf32>, vector<24x128xf32> -> vector<24x128xf32>
    %549 = arith.addf %546, %548 : vector<24x128xf32>
    %550 = vector.broadcast %544 : vector<1x128xf32> to vector<24x128xf32>
    %551 = arith.addf %549, %550 : vector<24x128xf32>
    %cst_189 = arith.constant 0.000000e+00 : f32
    %552 = vector.broadcast %cst_189 : f32 to vector<24x128xf32>
    %553 = arith.maximumf %551, %552 : vector<24x128xf32>
    %c2_190 = arith.constant 2 : index
    %c0_191 = arith.constant 0 : index
    %c0_192 = arith.constant 0 : index
    %554 = vector.load %arg8[%c2_190, %c0_191, %c0_192] : memref<3x1x128xf32, #tpu.memory_space<vmem>>, vector<1x1x128xf32>
    %555 = vector.shape_cast %554 : vector<1x1x128xf32> to vector<1x128xf32>
    %556 = arith.mulf %555, %555 : vector<1x128xf32>
    %cst_193 = arith.constant dense<0.000000e+00> : vector<1xf32>
    %557 = vector.multi_reduction <add>, %556, %cst_193 [1] : vector<1x128xf32> to vector<1xf32>
    %558 = vector.shape_cast %557 : vector<1xf32> to vector<1x1xf32>
    %559 = math.rsqrt %558 : vector<1x1xf32>
    %560 = vector.broadcast %559 : vector<1x1xf32> to vector<1x128xf32>
    %561 = arith.mulf %555, %560 : vector<1x128xf32>
    %cst_194 = arith.constant dense<0.000000e+00> : vector<1x24xf32>
    %562 = tpu.matmul %561, %553, %cst_194 {dimension_numbers = #tpu.dot_dimension_numbers<[1], [1], [0], [0], [0, 0, 1, 0], [], []>} : vector<1x128xf32>, vector<24x128xf32>, vector<1x24xf32> -> vector<1x24xf32>
    %cst_195 = arith.constant dense<0.000000e+00> : vector<24x1xf32>
    %563 = tpu.matmul %30, %562, %cst_195 {dimension_numbers = #tpu.dot_dimension_numbers<[1], [1], [0], [0], [0, 0, 1, 0], [], []>} : vector<24x24xf32>, vector<1x24xf32>, vector<24x1xf32> -> vector<24x1xf32>
    %564 = vector.broadcast %364 : vector<24x1xi1> to vector<24x24xi1>
    %565 = arith.andi %27, %564 : vector<24x24xi1>
    %566 = vector.broadcast %366 : vector<1x24xi1> to vector<24x24xi1>
    %567 = arith.andi %565, %566 : vector<24x24xi1>
    %568 = vector.broadcast %562 : vector<1x24xf32> to vector<24x24xf32>
    %569 = vector.broadcast %563 : vector<24x1xf32> to vector<24x24xf32>
    %570 = arith.cmpf ogt, %568, %569 : vector<24x24xf32>
    %571 = vector.broadcast %562 : vector<1x24xf32> to vector<24x24xf32>
    %572 = vector.broadcast %563 : vector<24x1xf32> to vector<24x24xf32>
    %573 = arith.cmpf oeq, %571, %572 : vector<24x24xf32>
    %574 = arith.cmpi slt, %24, %23 : vector<24x24xi32>
    %575 = arith.andi %573, %574 : vector<24x24xi1>
    %576 = arith.ori %570, %575 : vector<24x24xi1>
    %577 = vector.broadcast %563 : vector<24x1xf32> to vector<24x24xf32>
    %578 = vector.broadcast %562 : vector<1x24xf32> to vector<24x24xf32>
    %579 = arith.cmpf ogt, %577, %578 : vector<24x24xf32>
    %580 = vector.broadcast %563 : vector<24x1xf32> to vector<24x24xf32>
    %581 = vector.broadcast %562 : vector<1x24xf32> to vector<24x24xf32>
    %582 = arith.cmpf oeq, %580, %581 : vector<24x24xf32>
    %583 = arith.cmpi slt, %23, %24 : vector<24x24xi32>
    %584 = arith.andi %582, %583 : vector<24x24xi1>
    %585 = arith.ori %579, %584 : vector<24x24xi1>
    %586 = arith.extui %567 : vector<24x24xi1> to vector<24x24xi32>
    %587 = arith.sitofp %586 : vector<24x24xi32> to vector<24x24xf32>
    %588 = arith.andi %567, %576 : vector<24x24xi1>
    %589 = arith.extui %588 : vector<24x24xi1> to vector<24x24xi32>
    %590 = arith.sitofp %589 : vector<24x24xi32> to vector<24x24xf32>
    %cst_196 = arith.constant dense<0.000000e+00> : vector<24xf32>
    %591 = vector.multi_reduction <add>, %590, %cst_196 [1] : vector<24x24xf32> to vector<24xf32>
    %592 = vector.shape_cast %591 : vector<24xf32> to vector<24x1xf32>
    %593 = arith.andi %567, %585 : vector<24x24xi1>
    %594 = arith.extui %593 : vector<24x24xi1> to vector<24x24xi32>
    %595 = arith.sitofp %594 : vector<24x24xi32> to vector<24x24xf32>
    %cst_197 = arith.constant dense<0.000000e+00> : vector<24xf32>
    %596 = vector.multi_reduction <add>, %595, %cst_197 [0] : vector<24x24xf32> to vector<24xf32>
    %597 = vector.shape_cast %596 : vector<24xf32> to vector<1x24xf32>
    %cst_198 = arith.constant dense<0.000000e+00> : vector<24xf32>
    %598 = vector.multi_reduction <add>, %587, %cst_198 [1] : vector<24x24xf32> to vector<24xf32>
    %599 = vector.shape_cast %598 : vector<24xf32> to vector<24x1xf32>
    %cst_199 = arith.constant 8.000000e-01 : f32
    %600 = vector.broadcast %cst_199 : f32 to vector<24x1xf32>
    %601 = arith.mulf %600, %599 : vector<24x1xf32>
    %602 = math.ceil %601 : vector<24x1xf32>
    %cst_200 = arith.constant dense<0.000000e+00> : vector<24xf32>
    %603 = vector.multi_reduction <add>, %587, %cst_200 [0] : vector<24x24xf32> to vector<24xf32>
    %604 = vector.shape_cast %603 : vector<24xf32> to vector<1x24xf32>
    %cst_201 = arith.constant 8.000000e-01 : f32
    %605 = vector.broadcast %cst_201 : f32 to vector<1x24xf32>
    %606 = arith.mulf %605, %604 : vector<1x24xf32>
    %607 = math.ceil %606 : vector<1x24xf32>
    %608 = arith.cmpf olt, %592, %602 : vector<24x1xf32>
    %609 = arith.andi %364, %608 : vector<24x1xi1>
    %610 = arith.cmpf olt, %597, %607 : vector<1x24xf32>
    %611 = arith.andi %366, %610 : vector<1x24xi1>
    %612 = math.tanh %563 : vector<24x1xf32>
    %613 = vector.broadcast %612 : vector<24x1xf32> to vector<24x128xf32>
    %614 = arith.mulf %553, %613 : vector<24x128xf32>
    %cst_202 = arith.constant 0.000000e+00 : f32
    %615 = vector.shape_cast %609 : vector<24x1xi1> to vector<24x1xi1>
    %616 = vector.broadcast %615 : vector<24x1xi1> to vector<24x128xi1>
    %617 = vector.broadcast %cst_202 : f32 to vector<24x128xf32>
    %618 = arith.select %616, %614, %617 : vector<24x128xi1>, vector<24x128xf32>
    %619 = vector.broadcast %22 : vector<1x24xi32> to vector<8x24xi32>
    %620 = arith.cmpi eq, %31, %619 : vector<8x24xi32>
    %621 = vector.broadcast %611 : vector<1x24xi1> to vector<8x24xi1>
    %622 = arith.andi %620, %621 : vector<8x24xi1>
    %623 = arith.extui %622 : vector<8x24xi1> to vector<8x24xi32>
    %624 = arith.sitofp %623 : vector<8x24xi32> to vector<8x24xf32>
    %cst_203 = arith.constant dense<0.000000e+00> : vector<8xf32>
    %625 = vector.multi_reduction <add>, %624, %cst_203 [1] : vector<8x24xf32> to vector<8xf32>
    %626 = vector.shape_cast %625 : vector<8xf32> to vector<8x1xf32>
    %cst_204 = arith.constant dense<0.000000e+00> : vector<8x128xf32>
    %627 = tpu.matmul %624, %618, %cst_204 {dimension_numbers = #tpu.dot_dimension_numbers<[1], [0], [0], [1], [0, 0, 1, 1], [], []>} : vector<8x24xf32>, vector<24x128xf32>, vector<8x128xf32> -> vector<8x128xf32>
    %cst_205 = arith.constant 1.000000e+00 : f32
    %628 = vector.broadcast %cst_205 : f32 to vector<8x1xf32>
    %629 = arith.maximumf %626, %628 : vector<8x1xf32>
    %cst_206 = arith.constant 1.000000e+00 : f32
    %630 = vector.broadcast %cst_206 : f32 to vector<8x1xf32>
    %631 = arith.divf %630, %629 : vector<8x1xf32>
    %632 = vector.broadcast %631 : vector<8x1xf32> to vector<8x128xf32>
    %633 = arith.mulf %627, %632 : vector<8x128xf32>
    %634 = arith.addf %389, %633 : vector<8x128xf32>
    %c0_i32_207 = arith.constant 0 : i32
    %635 = vector.broadcast %c0_i32_207 : i32 to vector<24x1xi32>
    %636 = arith.cmpi eq, %21, %635 : vector<24x1xi32>
    %637 = arith.andi %636, %609 : vector<24x1xi1>
    %cst_208 = arith.constant -1.000000e+30 : f32
    %638 = vector.shape_cast %637 : vector<24x1xi1> to vector<24x1xi1>
    %639 = vector.broadcast %638 : vector<24x1xi1> to vector<24x128xi1>
    %640 = vector.broadcast %cst_208 : f32 to vector<24x128xf32>
    %641 = arith.select %639, %618, %640 : vector<24x128xi1>, vector<24x128xf32>
    %cst_209 = arith.constant dense<0xFF800000> : vector<128xf32>
    %642 = vector.multi_reduction <maximumf>, %641, %cst_209 [0] : vector<24x128xf32> to vector<128xf32>
    %643 = vector.shape_cast %642 : vector<128xf32> to vector<1x128xf32>
    %644 = vector.extract_strided_slice %626 {offsets = [0, 0], sizes = [1, 1], strides = [1, 1]} : vector<8x1xf32> to vector<1x1xf32>
    %cst_210 = arith.constant 0.000000e+00 : f32
    %645 = vector.broadcast %cst_210 : f32 to vector<1x1xf32>
    %646 = arith.cmpf ogt, %644, %645 : vector<1x1xf32>
    %cst_211 = arith.constant 0.000000e+00 : f32
    %647 = vector.shape_cast %646 : vector<1x1xi1> to vector<1x1xi1>
    %648 = vector.broadcast %647 : vector<1x1xi1> to vector<1x128xi1>
    %649 = vector.broadcast %cst_211 : f32 to vector<1x128xf32>
    %650 = arith.select %648, %643, %649 : vector<1x128xi1>, vector<1x128xf32>
    %c0_212 = arith.constant 0 : index
    %c0_213 = arith.constant 0 : index
    %651 = vector.load %arg16[%c0_212, %c0_213] : memref<8x128xf32, #tpu.memory_space<vmem>>, vector<1x128xf32>
    tpu.vector_store %arg16[%c0_212, %c0_213], %650 {strides = array<i32>} : memref<8x128xf32, #tpu.memory_space<vmem>>, vector<1x128xf32>,
    %c1_i32_214 = arith.constant 1 : i32
    %652 = vector.broadcast %c1_i32_214 : i32 to vector<24x1xi32>
    %653 = arith.cmpi eq, %21, %652 : vector<24x1xi32>
    %654 = arith.andi %653, %609 : vector<24x1xi1>
    %cst_215 = arith.constant -1.000000e+30 : f32
    %655 = vector.shape_cast %654 : vector<24x1xi1> to vector<24x1xi1>
    %656 = vector.broadcast %655 : vector<24x1xi1> to vector<24x128xi1>
    %657 = vector.broadcast %cst_215 : f32 to vector<24x128xf32>
    %658 = arith.select %656, %618, %657 : vector<24x128xi1>, vector<24x128xf32>
    %cst_216 = arith.constant dense<0xFF800000> : vector<128xf32>
    %659 = vector.multi_reduction <maximumf>, %658, %cst_216 [0] : vector<24x128xf32> to vector<128xf32>
    %660 = vector.shape_cast %659 : vector<128xf32> to vector<1x128xf32>
    %661 = vector.extract_strided_slice %626 {offsets = [1, 0], sizes = [1, 1], strides = [1, 1]} : vector<8x1xf32> to vector<1x1xf32>
    %cst_217 = arith.constant 0.000000e+00 : f32
    %662 = vector.broadcast %cst_217 : f32 to vector<1x1xf32>
    %663 = arith.cmpf ogt, %661, %662 : vector<1x1xf32>
    %cst_218 = arith.constant 0.000000e+00 : f32
    %664 = vector.shape_cast %663 : vector<1x1xi1> to vector<1x1xi1>
    %665 = vector.broadcast %664 : vector<1x1xi1> to vector<1x128xi1>
    %666 = vector.broadcast %cst_218 : f32 to vector<1x128xf32>
    %667 = arith.select %665, %660, %666 : vector<1x128xi1>, vector<1x128xf32>
    %c1_219 = arith.constant 1 : index
    %c0_220 = arith.constant 0 : index
    %668 = vector.load %arg16[%c1_219, %c0_220] : memref<8x128xf32, #tpu.memory_space<vmem>>, vector<1x128xf32>
    tpu.vector_store %arg16[%c1_219, %c0_220], %667 {strides = array<i32>} : memref<8x128xf32, #tpu.memory_space<vmem>>, vector<1x128xf32>,
    %c2_i32_221 = arith.constant 2 : i32
    %669 = vector.broadcast %c2_i32_221 : i32 to vector<24x1xi32>
    %670 = arith.cmpi eq, %21, %669 : vector<24x1xi32>
    %671 = arith.andi %670, %609 : vector<24x1xi1>
    %cst_222 = arith.constant -1.000000e+30 : f32
    %672 = vector.shape_cast %671 : vector<24x1xi1> to vector<24x1xi1>
    %673 = vector.broadcast %672 : vector<24x1xi1> to vector<24x128xi1>
    %674 = vector.broadcast %cst_222 : f32 to vector<24x128xf32>
    %675 = arith.select %673, %618, %674 : vector<24x128xi1>, vector<24x128xf32>
    %cst_223 = arith.constant dense<0xFF800000> : vector<128xf32>
    %676 = vector.multi_reduction <maximumf>, %675, %cst_223 [0] : vector<24x128xf32> to vector<128xf32>
    %677 = vector.shape_cast %676 : vector<128xf32> to vector<1x128xf32>
    %678 = vector.extract_strided_slice %626 {offsets = [2, 0], sizes = [1, 1], strides = [1, 1]} : vector<8x1xf32> to vector<1x1xf32>
    %cst_224 = arith.constant 0.000000e+00 : f32
    %679 = vector.broadcast %cst_224 : f32 to vector<1x1xf32>
    %680 = arith.cmpf ogt, %678, %679 : vector<1x1xf32>
    %cst_225 = arith.constant 0.000000e+00 : f32
    %681 = vector.shape_cast %680 : vector<1x1xi1> to vector<1x1xi1>
    %682 = vector.broadcast %681 : vector<1x1xi1> to vector<1x128xi1>
    %683 = vector.broadcast %cst_225 : f32 to vector<1x128xf32>
    %684 = arith.select %682, %677, %683 : vector<1x128xi1>, vector<1x128xf32>
    %c2_226 = arith.constant 2 : index
    %c0_227 = arith.constant 0 : index
    %685 = vector.load %arg16[%c2_226, %c0_227] : memref<8x128xf32, #tpu.memory_space<vmem>>, vector<1x128xf32>
    tpu.vector_store %arg16[%c2_226, %c0_227], %684 {strides = array<i32>} : memref<8x128xf32, #tpu.memory_space<vmem>>, vector<1x128xf32>,
    %c3_i32_228 = arith.constant 3 : i32
    %686 = vector.broadcast %c3_i32_228 : i32 to vector<24x1xi32>
    %687 = arith.cmpi eq, %21, %686 : vector<24x1xi32>
    %688 = arith.andi %687, %609 : vector<24x1xi1>
    %cst_229 = arith.constant -1.000000e+30 : f32
    %689 = vector.shape_cast %688 : vector<24x1xi1> to vector<24x1xi1>
    %690 = vector.broadcast %689 : vector<24x1xi1> to vector<24x128xi1>
    %691 = vector.broadcast %cst_229 : f32 to vector<24x128xf32>
    %692 = arith.select %690, %618, %691 : vector<24x128xi1>, vector<24x128xf32>
    %cst_230 = arith.constant dense<0xFF800000> : vector<128xf32>
    %693 = vector.multi_reduction <maximumf>, %692, %cst_230 [0] : vector<24x128xf32> to vector<128xf32>
    %694 = vector.shape_cast %693 : vector<128xf32> to vector<1x128xf32>
    %695 = vector.extract_strided_slice %626 {offsets = [3, 0], sizes = [1, 1], strides = [1, 1]} : vector<8x1xf32> to vector<1x1xf32>
    %cst_231 = arith.constant 0.000000e+00 : f32
    %696 = vector.broadcast %cst_231 : f32 to vector<1x1xf32>
    %697 = arith.cmpf ogt, %695, %696 : vector<1x1xf32>
    %cst_232 = arith.constant 0.000000e+00 : f32
    %698 = vector.shape_cast %697 : vector<1x1xi1> to vector<1x1xi1>
    %699 = vector.broadcast %698 : vector<1x1xi1> to vector<1x128xi1>
    %700 = vector.broadcast %cst_232 : f32 to vector<1x128xf32>
    %701 = arith.select %699, %694, %700 : vector<1x128xi1>, vector<1x128xf32>
    %c3_233 = arith.constant 3 : index
    %c0_234 = arith.constant 0 : index
    %702 = vector.load %arg16[%c3_233, %c0_234] : memref<8x128xf32, #tpu.memory_space<vmem>>, vector<1x128xf32>
    tpu.vector_store %arg16[%c3_233, %c0_234], %701 {strides = array<i32>} : memref<8x128xf32, #tpu.memory_space<vmem>>, vector<1x128xf32>,
    %c4_i32_235 = arith.constant 4 : i32
    %703 = vector.broadcast %c4_i32_235 : i32 to vector<24x1xi32>
    %704 = arith.cmpi eq, %21, %703 : vector<24x1xi32>
    %705 = arith.andi %704, %609 : vector<24x1xi1>
    %cst_236 = arith.constant -1.000000e+30 : f32
    %706 = vector.shape_cast %705 : vector<24x1xi1> to vector<24x1xi1>
    %707 = vector.broadcast %706 : vector<24x1xi1> to vector<24x128xi1>
    %708 = vector.broadcast %cst_236 : f32 to vector<24x128xf32>
    %709 = arith.select %707, %618, %708 : vector<24x128xi1>, vector<24x128xf32>
    %cst_237 = arith.constant dense<0xFF800000> : vector<128xf32>
    %710 = vector.multi_reduction <maximumf>, %709, %cst_237 [0] : vector<24x128xf32> to vector<128xf32>
    %711 = vector.shape_cast %710 : vector<128xf32> to vector<1x128xf32>
    %712 = vector.extract_strided_slice %626 {offsets = [4, 0], sizes = [1, 1], strides = [1, 1]} : vector<8x1xf32> to vector<1x1xf32>
    %cst_238 = arith.constant 0.000000e+00 : f32
    %713 = vector.broadcast %cst_238 : f32 to vector<1x1xf32>
    %714 = arith.cmpf ogt, %712, %713 : vector<1x1xf32>
    %cst_239 = arith.constant 0.000000e+00 : f32
    %715 = vector.shape_cast %714 : vector<1x1xi1> to vector<1x1xi1>
    %716 = vector.broadcast %715 : vector<1x1xi1> to vector<1x128xi1>
    %717 = vector.broadcast %cst_239 : f32 to vector<1x128xf32>
    %718 = arith.select %716, %711, %717 : vector<1x128xi1>, vector<1x128xf32>
    %c4_240 = arith.constant 4 : index
    %c0_241 = arith.constant 0 : index
    %719 = vector.load %arg16[%c4_240, %c0_241] : memref<8x128xf32, #tpu.memory_space<vmem>>, vector<1x128xf32>
    tpu.vector_store %arg16[%c4_240, %c0_241], %718 {strides = array<i32>} : memref<8x128xf32, #tpu.memory_space<vmem>>, vector<1x128xf32>,
    %c5_i32_242 = arith.constant 5 : i32
    %720 = vector.broadcast %c5_i32_242 : i32 to vector<24x1xi32>
    %721 = arith.cmpi eq, %21, %720 : vector<24x1xi32>
    %722 = arith.andi %721, %609 : vector<24x1xi1>
    %cst_243 = arith.constant -1.000000e+30 : f32
    %723 = vector.shape_cast %722 : vector<24x1xi1> to vector<24x1xi1>
    %724 = vector.broadcast %723 : vector<24x1xi1> to vector<24x128xi1>
    %725 = vector.broadcast %cst_243 : f32 to vector<24x128xf32>
    %726 = arith.select %724, %618, %725 : vector<24x128xi1>, vector<24x128xf32>
    %cst_244 = arith.constant dense<0xFF800000> : vector<128xf32>
    %727 = vector.multi_reduction <maximumf>, %726, %cst_244 [0] : vector<24x128xf32> to vector<128xf32>
    %728 = vector.shape_cast %727 : vector<128xf32> to vector<1x128xf32>
    %729 = vector.extract_strided_slice %626 {offsets = [5, 0], sizes = [1, 1], strides = [1, 1]} : vector<8x1xf32> to vector<1x1xf32>
    %cst_245 = arith.constant 0.000000e+00 : f32
    %730 = vector.broadcast %cst_245 : f32 to vector<1x1xf32>
    %731 = arith.cmpf ogt, %729, %730 : vector<1x1xf32>
    %cst_246 = arith.constant 0.000000e+00 : f32
    %732 = vector.shape_cast %731 : vector<1x1xi1> to vector<1x1xi1>
    %733 = vector.broadcast %732 : vector<1x1xi1> to vector<1x128xi1>
    %734 = vector.broadcast %cst_246 : f32 to vector<1x128xf32>
    %735 = arith.select %733, %728, %734 : vector<1x128xi1>, vector<1x128xf32>
    %c5_247 = arith.constant 5 : index
    %c0_248 = arith.constant 0 : index
    %736 = vector.load %arg16[%c5_247, %c0_248] : memref<8x128xf32, #tpu.memory_space<vmem>>, vector<1x128xf32>
    tpu.vector_store %arg16[%c5_247, %c0_248], %735 {strides = array<i32>} : memref<8x128xf32, #tpu.memory_space<vmem>>, vector<1x128xf32>,
    %c6_i32_249 = arith.constant 6 : i32
    %737 = vector.broadcast %c6_i32_249 : i32 to vector<24x1xi32>
    %738 = arith.cmpi eq, %21, %737 : vector<24x1xi32>
    %739 = arith.andi %738, %609 : vector<24x1xi1>
    %cst_250 = arith.constant -1.000000e+30 : f32
    %740 = vector.shape_cast %739 : vector<24x1xi1> to vector<24x1xi1>
    %741 = vector.broadcast %740 : vector<24x1xi1> to vector<24x128xi1>
    %742 = vector.broadcast %cst_250 : f32 to vector<24x128xf32>
    %743 = arith.select %741, %618, %742 : vector<24x128xi1>, vector<24x128xf32>
    %cst_251 = arith.constant dense<0xFF800000> : vector<128xf32>
    %744 = vector.multi_reduction <maximumf>, %743, %cst_251 [0] : vector<24x128xf32> to vector<128xf32>
    %745 = vector.shape_cast %744 : vector<128xf32> to vector<1x128xf32>
    %746 = vector.extract_strided_slice %626 {offsets = [6, 0], sizes = [1, 1], strides = [1, 1]} : vector<8x1xf32> to vector<1x1xf32>
    %cst_252 = arith.constant 0.000000e+00 : f32
    %747 = vector.broadcast %cst_252 : f32 to vector<1x1xf32>
    %748 = arith.cmpf ogt, %746, %747 : vector<1x1xf32>
    %cst_253 = arith.constant 0.000000e+00 : f32
    %749 = vector.shape_cast %748 : vector<1x1xi1> to vector<1x1xi1>
    %750 = vector.broadcast %749 : vector<1x1xi1> to vector<1x128xi1>
    %751 = vector.broadcast %cst_253 : f32 to vector<1x128xf32>
    %752 = arith.select %750, %745, %751 : vector<1x128xi1>, vector<1x128xf32>
    %c6_254 = arith.constant 6 : index
    %c0_255 = arith.constant 0 : index
    %753 = vector.load %arg16[%c6_254, %c0_255] : memref<8x128xf32, #tpu.memory_space<vmem>>, vector<1x128xf32>
    tpu.vector_store %arg16[%c6_254, %c0_255], %752 {strides = array<i32>} : memref<8x128xf32, #tpu.memory_space<vmem>>, vector<1x128xf32>,
    %c7_i32_256 = arith.constant 7 : i32
    %754 = vector.broadcast %c7_i32_256 : i32 to vector<24x1xi32>
    %755 = arith.cmpi eq, %21, %754 : vector<24x1xi32>
    %756 = arith.andi %755, %609 : vector<24x1xi1>
    %cst_257 = arith.constant -1.000000e+30 : f32
    %757 = vector.shape_cast %756 : vector<24x1xi1> to vector<24x1xi1>
    %758 = vector.broadcast %757 : vector<24x1xi1> to vector<24x128xi1>
    %759 = vector.broadcast %cst_257 : f32 to vector<24x128xf32>
    %760 = arith.select %758, %618, %759 : vector<24x128xi1>, vector<24x128xf32>
    %cst_258 = arith.constant dense<0xFF800000> : vector<128xf32>
    %761 = vector.multi_reduction <maximumf>, %760, %cst_258 [0] : vector<24x128xf32> to vector<128xf32>
    %762 = vector.shape_cast %761 : vector<128xf32> to vector<1x128xf32>
    %763 = vector.extract_strided_slice %626 {offsets = [7, 0], sizes = [1, 1], strides = [1, 1]} : vector<8x1xf32> to vector<1x1xf32>
    %cst_259 = arith.constant 0.000000e+00 : f32
    %764 = vector.broadcast %cst_259 : f32 to vector<1x1xf32>
    %765 = arith.cmpf ogt, %763, %764 : vector<1x1xf32>
    %cst_260 = arith.constant 0.000000e+00 : f32
    %766 = vector.shape_cast %765 : vector<1x1xi1> to vector<1x1xi1>
    %767 = vector.broadcast %766 : vector<1x1xi1> to vector<1x128xi1>
    %768 = vector.broadcast %cst_260 : f32 to vector<1x128xf32>
    %769 = arith.select %767, %762, %768 : vector<1x128xi1>, vector<1x128xf32>
    %c7_261 = arith.constant 7 : index
    %c0_262 = arith.constant 0 : index
    %770 = vector.load %arg16[%c7_261, %c0_262] : memref<8x128xf32, #tpu.memory_space<vmem>>, vector<1x128xf32>
    tpu.vector_store %arg16[%c7_261, %c0_262], %769 {strides = array<i32>} : memref<8x128xf32, #tpu.memory_space<vmem>>, vector<1x128xf32>,
    %c0_263 = arith.constant 0 : index
    %c0_264 = arith.constant 0 : index
    %771 = vector.load %arg16[%c0_263, %c0_264] : memref<8x128xf32, #tpu.memory_space<vmem>>, vector<8x128xf32>
    %772 = arith.addf %527, %771 : vector<8x128xf32>
    %c0_265 = arith.constant 0 : index
    %c0_266 = arith.constant 0 : index
    %773 = vector.load %arg9[%c0_265, %c0_266] : memref<256x128xf32, #tpu.memory_space<vmem>>, vector<128x128xf32>
    %cst_267 = arith.constant dense<0.000000e+00> : vector<8x128xf32>
    %774 = tpu.matmul %772, %773, %cst_267 {dimension_numbers = #tpu.dot_dimension_numbers<[1], [0], [0], [1], [0, 0, 1, 1], [], []>} : vector<8x128xf32>, vector<128x128xf32>, vector<8x128xf32> -> vector<8x128xf32>
    %c128 = arith.constant 128 : index
    %c0_268 = arith.constant 0 : index
    %775 = vector.load %arg9[%c128, %c0_268] : memref<256x128xf32, #tpu.memory_space<vmem>>, vector<128x128xf32>
    %cst_269 = arith.constant dense<0.000000e+00> : vector<8x128xf32>
    %776 = tpu.matmul %634, %775, %cst_269 {dimension_numbers = #tpu.dot_dimension_numbers<[1], [0], [0], [1], [0, 0, 1, 1], [], []>} : vector<8x128xf32>, vector<128x128xf32>, vector<8x128xf32> -> vector<8x128xf32>
    %777 = arith.addf %774, %776 : vector<8x128xf32>
    %c0_270 = arith.constant 0 : index
    %c0_271 = arith.constant 0 : index
    %778 = vector.load %arg10[%c0_270, %c0_271] : memref<1x128xf32, #tpu.memory_space<vmem>>, vector<1x128xf32>
    %779 = vector.broadcast %778 : vector<1x128xf32> to vector<8x128xf32>
    %780 = arith.addf %777, %779 : vector<8x128xf32>
    %cst_272 = arith.constant 0.000000e+00 : f32
    %781 = vector.broadcast %cst_272 : f32 to vector<8x128xf32>
    %782 = arith.maximumf %780, %781 : vector<8x128xf32>
    %c0_273 = arith.constant 0 : index
    %c0_274 = arith.constant 0 : index
    %783 = vector.load %arg11[%c0_273, %c0_274] : memref<128x64xf32, #tpu.memory_space<vmem>>, vector<128x64xf32>
    %cst_275 = arith.constant dense<0.000000e+00> : vector<8x64xf32>
    %784 = tpu.matmul %782, %783, %cst_275 {dimension_numbers = #tpu.dot_dimension_numbers<[1], [0], [0], [1], [0, 0, 1, 1], [], []>} : vector<8x128xf32>, vector<128x64xf32>, vector<8x64xf32> -> vector<8x64xf32>
    %c0_276 = arith.constant 0 : index
    %c0_277 = arith.constant 0 : index
    %785 = vector.load %arg12[%c0_276, %c0_277] : memref<1x64xf32, #tpu.memory_space<vmem>>, vector<1x64xf32>
    %786 = vector.broadcast %785 : vector<1x64xf32> to vector<8x64xf32>
    %787 = arith.addf %784, %786 : vector<8x64xf32>
    %cst_278 = arith.constant 0.000000e+00 : f32
    %788 = vector.broadcast %cst_278 : f32 to vector<8x64xf32>
    %789 = arith.maximumf %787, %788 : vector<8x64xf32>
    %c0_279 = arith.constant 0 : index
    %c0_280 = arith.constant 0 : index
    %790 = vector.load %arg13[%c0_279, %c0_280] : memref<1x64xf32, #tpu.memory_space<vmem>>, vector<1x64xf32>
    %791 = vector.broadcast %790 : vector<1x64xf32> to vector<8x64xf32>
    %792 = arith.mulf %789, %791 : vector<8x64xf32>
    %cst_281 = arith.constant dense<0.000000e+00> : vector<8xf32>
    %793 = vector.multi_reduction <add>, %792, %cst_281 [1] : vector<8x64xf32> to vector<8xf32>
    %794 = vector.shape_cast %793 : vector<8xf32> to vector<8x1xf32>
    %c0_282 = arith.constant 0 : index
    %c0_283 = arith.constant 0 : index
    %795 = memref.load %arg14[%c0_282, %c0_283] : memref<1x1xf32, #tpu.memory_space<smem>>
    %796 = vector.broadcast %795 : f32 to vector<8x1xf32>
    %797 = arith.addf %794, %796 : vector<8x1xf32>
    %cst_284 = arith.constant 0.000000e+00 : f32
    %798 = vector.broadcast %cst_284 : f32 to vector<8x1xf32>
    %799 = arith.subf %798, %797 : vector<8x1xf32>
    %800 = math.exp %799 : vector<8x1xf32>
    %cst_285 = arith.constant 1.000000e+00 : f32
    %801 = vector.broadcast %cst_285 : f32 to vector<8x1xf32>
    %802 = arith.addf %801, %800 : vector<8x1xf32>
    %cst_286 = arith.constant 1.000000e+00 : f32
    %803 = vector.broadcast %cst_286 : f32 to vector<8x1xf32>
    %804 = arith.divf %803, %802 : vector<8x1xf32>
    %805 = vector.shape_cast %804 : vector<8x1xf32> to vector<8x1xf32>
    %806 = vector.broadcast %805 : vector<8x1xf32> to vector<8x128xf32>
    %c0_287 = arith.constant 0 : index
    %c0_288 = arith.constant 0 : index
    %807 = vector.load %arg15[%c0_287, %c0_288] : memref<8x128xf32, #tpu.memory_space<vmem>>, vector<8x128xf32>
    tpu.vector_store %arg15[%c0_287, %c0_288], %806 {strides = array<i32>} : memref<8x128xf32, #tpu.memory_space<vmem>>, vector<8x128xf32>,
    return
  }
}

</mosaic_0001>

<bundles_post_ra>
// kernel: click_net_forward.1
= control target key start
LH: loop header
LB: loop body
LE: loop exit
PB: predicated region body
PF: predicated region fallthrough
CT: control target
= control target key end

     0   :  { %21 = vsyncpa [#allocation5], 0  ;;  %s6660_s0 = inlined_call_operand.vmem [shape: s32[24,1], index: 0, kind: input, shape index: {}]   ;;  %s6661_s1 = inlined_call_operand.vmem [shape: s32[24,1], index: 1, kind: input, shape index: {}]   ;;  %s6662_s2 = inlined_call_operand.vmem [shape: s32[1,24], index: 2, kind: input, shape index: {}]   ;;  %s6663_s3 = inlined_call_operand.vmem [shape: s32[72,1], index: 3, kind: input, shape index: {}]   ;;  %s6664_s4 = inlined_call_operand.vmem [shape: s32[1,72], index: 4, kind: input, shape index: {}]   ;;  %s6665_s5 = inlined_call_operand.hbm [shape: f32[56,128], index: 5, kind: input, shape index: {}]   ;;  %s6666_s6 = inlined_call_operand.hbm [shape: f32[3,256,128], index: 6, kind: input, shape index: {}]   ;;  %s6667_s7 = inlined_call_operand.vmem [shape: f32[3,1,128], index: 7, kind: input, shape index: {}]   ;;  %s6668_s8 = inlined_call_operand.vmem [shape: f32[3,1,128], index: 8, kind: input, shape index: {}]   ;;  %s6669_s9 = inlined_call_operand.vmem [shape: f32[256,128], index: 9, kind: input, shape index: {}]   ;;  %s6670_s10 = inlined_call_operand.vmem [shape: f32[1,128], index: 10, kind: input, shape index: {}]   ;;  %s6671_s11 = inlined_call_operand.vmem [shape: f32[128,64], index: 11, kind: input, shape index: {}]   ;;  %s6672_s12 = inlined_call_operand.vmem [shape: f32[1,64], index: 12, kind: input, shape index: {}]   ;;  %s6673_s13 = inlined_call_operand.vmem [shape: f32[1,64], index: 13, kind: input, shape index: {}]   ;;  %s6674_s14 = inlined_call_operand.<no memory space> [shape: f32[1,1], index: 14, kind: input, shape index: {}]   ;;  %s6675_s15 = inlined_call_operand.vmem [shape: f32[8,128], index: 15, kind: output, shape index: {}]  }
   0x1   :  { %22 = vsyncpa [#allocation7], 0  ;;  %s4372_s18 = smov [#allocation4]  }
   0x2   :  { %s38_s19 = sshll.u32 %s4372_s18, 4  ;;  %s39_s19 = int_to_ptr.vmem [resolvable:$true] %s38_s19 }
   0x3   :  { %s4336_s20 = scalar_lea.vmem %s39_s19, 896  ;;  %p4341_p1 = scmp.lt.s32.totalorder %s39_s19, %s39_s19 }
   0x4   :  { %p4337_p0 = scmp.ne.s32.totalorder %s39_s19, %s4336_s20  ;;  %p4342_p2 = scmp.lt.s32.totalorder %s4336_s20, %s4336_s20 }
   0x6   :  { %p4343_p3 = por %p4342_p2, %p4341_p1 }
   0x8   :  { %p4344_p4 = pnand %p4343_p3, %p4337_p0 }
   0xa   :  { %4347 = shalt.err (!%p4344_p4)
}
   0xb   :  { %s4373_s21 = smov 128   ;;  %s4374_s22 = smov 8  }
   0xc   :  { %44 = dma.hbm_to_vmem [thread:$0]  %s6665_s5, 896, %s39_s19, [#allocation5], %s4373_s21, %s4373_s21, %s4374_s22  }
   0xd   :  { %s4375_s25 = smov [#allocation6]  }
   0xe   :  { %s50_s26 = sshll.u32 %s4375_s25, 4  ;;  %s51_s26 = int_to_ptr.vmem [resolvable:$true] %s50_s26 }
   0xf   :  { %s4356_s27 = scalar_lea.vmem %s51_s26, 12288  ;;  %p4361_p6 = scmp.lt.s32.totalorder %s51_s26, %s51_s26 }
  0x10   :  { %p4357_p5 = scmp.ne.s32.totalorder %s51_s26, %s4356_s27  ;;  %p4362_p7 = scmp.lt.s32.totalorder %s4356_s27, %s4356_s27 }
  0x12   :  { %p4363_p8 = por %p4362_p7, %p4361_p6 }
  0x14   :  { %p4364_p9 = pnand %p4363_p8, %p4357_p5 }
  0x16   :  { %4367 = shalt.err (!%p4364_p9)
}
  0x17   :  { %56 = dma.hbm_to_vmem [thread:$0]  %s6666_s6, 12288, %s51_s26, [#allocation7], %s4373_s21, %s4373_s21, %s4374_s22  }
  0x18   :  { %4368 = dma.done.wait [#allocation5], 896  }
  0x19   :  { %4369 = vsyncadd [#allocation5], 4294966400 }
  0x1a   :  { %4370 = dma.done.wait [#allocation7], 12288  }
  0x1b   :  { %4371 = vsyncadd [#allocation7], 4294955008  ;;  %v4376_v0 = vmov 0   ;;  %v4377_v1 = vmov 0.0   ;;  %vm6679_vm0 = vmmov 0   ;;  %v224_v2 = vld [vmem:[%s6663_s3 + $0x38] sm:$0xff]  ;;  %v82_v21 = vlaneseq }
  0x1c   :  { %4272 = vset.pattern.permute.xlu1 %v4376_v0  ;;  %4271 = vset.pattern.permute.xlu0 %v4376_v0  ;;  %v79_v3 = vld [vmem:[%s6660_s0] sm:$0xff]  ;;  %v223_v4 = vld [vmem:[%s6663_s3 + $0x30] sm:$0xff]  ;;  %v108_v6 = vld [vmem:[#allocation4 + $0x30] sm:$0xff]  ;;  %vm109_vm1 = vcmask 457728   ;;  %v4379_v28 = vmov 1.0   ;;  %vm280_vm14 = vcmask 588800  }
  0x1d   :  { %3763 = vmatprep.subr.mxu1 %v4377_v1  ;;  %3813 = vmatprep.subr.mxu0 %v4377_v1  ;;  %v225_v5 = vld [vmem:[%s6663_s3 + $0x40] sm:$0xff]  ;;  %v107_v7 = vld [vmem:[#allocation4 + $0x28] sm:$0xff]  ;;  %v80_v8 = vld [vmem:[%s6660_s0 + $0x8] sm:$0xff]  ;;  %v4517_v22 = vand.u32 127, %v82_v21  ;;  %v4540_v34 = vshrl.u32 %v82_v21, 7 }
  0x1e   :  { %3777 = vmatprep.mubr.msk.f32.mxu1 %vm6679_vm0, %v4377_v1  ;;  %3819 = vmatprep.mubr.msk.f32.mxu0 %vm6679_vm0, %v4377_v1  ;;  %v222_v9 = vld [vmem:[%s6663_s3 + $0x28] sm:$0xff]  ;;  %v220_v11 = vld [vmem:[%s6663_s3 + $0x18] sm:$0xff]  ;;  %v221_v12 = vld [vmem:[%s6663_s3 + $0x20] sm:$0xff] }
  0x1f   :  { %248 = vperm.xlu1 %4272, %v224_v2   ;;  %85 = vperm.xlu0 %4271, %v79_v3   ;;  %v106_v10 = vld [vmem:[#allocation4 + $0x20] sm:$0xff]  ;;  %v105_v13 = vld [vmem:[#allocation4 + $0x18] sm:$0xff]  ;;  %v104_v14 = vld [vmem:[#allocation4 + $0x10] sm:$0xff]  ;;  %v4553_v39 = vadd.s32 8, %v4540_v34  ;;  %v4563_v43 = vadd.s32 16, %v4540_v34 }
  0x20   :  { %3764 = vmatpush3.msra.mxu1 %v108_v6  ;;  %v219_v15 = vld [vmem:[%s6663_s3 + $0x10] sm:$0xff]  ;;  %v217_v18 = vld [vmem:[%s6663_s3] sm:$0xff]  ;;  %v218_v19 = vld [vmem:[%s6663_s3 + $0x8] sm:$0xff] }
  0x21   :  { %3765 = vmatprep.subr.mxu1 %v4377_v1  ;;  %v81_v16 = vld [vmem:[%s6660_s0 + $0x10] sm:$0xff]  ;;  %v102_v20 = vld [vmem:[#allocation4] sm:$0xff]  ;;  %v3430_v37 = vld [vmem:[%s6664_s4] ss:$0 sm:$0xff] }
  0x22   :  { %3766 = vmatpush3.msra.mxu1 %v107_v7  ;;  %v103_v17 = vld [vmem:[#allocation4 + $0x8] sm:$0xff]  ;;  %vm208_vm12 = vcmp.eq.s32.totalorder %v4540_v34, %v3430_v37  ;;  %v556_v44 = vld [vmem:[#allocation6 + $0xf8] sm:$0xff]  ;;  %v554_v47 = vld [vmem:[#allocation6 + $0xe8] sm:$0xff] }
  0x23   :  { %245 = vperm.xlu1 %4272, %v223_v4   ;;  %251 = vperm.xlu0 %4271, %v225_v5   ;;  %v3431_v42 = vsel %vm208_vm12, 1.0, %v4377_v1  ;;  %v555_v45 = vld [vmem:[#allocation6 + $0xf0] sm:$0xff]  ;;  %v553_v48 = vld [vmem:[#allocation6 + $0xe0] sm:$0xff]  ;;  %v552_v50 = vld [vmem:[#allocation6 + $0xd8] sm:$0xff]  ;;  %v4605_v5 = vsub.s32 0, %v4540_v34 }
  0x24   :  { %3767 = vmatprep.subr.mxu1 %v4377_v1  ;;  %v551_v51 = vld [vmem:[#allocation6 + $0xd0] sm:$0xff]  ;;  %v550_v52 = vld [vmem:[#allocation6 + $0xc8] sm:$0xff]  ;;  %v549_v53 = vld [vmem:[#allocation6 + $0xc0] sm:$0xff] }
  0x25   :  { %3768 = vmatpush3.msra.mxu1 %v106_v10  ;;  %v548_v54 = vld [vmem:[#allocation6 + $0xb8] sm:$0xff]  ;;  %v547_v55 = vld [vmem:[#allocation6 + $0xb0] sm:$0xff]  ;;  %v546_v56 = vld [vmem:[#allocation6 + $0xa8] sm:$0xff] }
  0x26   :  { %3769 = vmatprep.subr.mxu1 %v4377_v1  ;;  %v545_v57 = vld [vmem:[#allocation6 + $0xa0] sm:$0xff]  ;;  %v544_v58 = vld [vmem:[#allocation6 + $0x98] sm:$0xff]  ;;  %v543_v59 = vld [vmem:[#allocation6 + $0x90] sm:$0xff] }
  0x27   :  { %88 = vperm.xlu1 %4272, %v80_v8   ;;  %242 = vperm.xlu0 %4271, %v222_v9   ;;  %v542_v60 = vld [vmem:[#allocation6 + $0x88] sm:$0xff]  ;;  %v541_v61 = vld [vmem:[#allocation6 + $0x80] sm:$0xff] }
  0x28   :  { %3770 = vmatpush3.msra.mxu1 %v105_v13  ;;  %v4601_v4 = vld [vmem:[%s6662_s2] sm:$0x1] }
  0x29   :  { %3771 = vmatprep.subr.mxu1 %v4377_v1 }
  0x2a   :  { %3772 = vmatpush3.msra.mxu1 %v104_v14 }
  0x2b   :  { %236 = vperm.xlu1 %4272, %v220_v11   ;;  %239 = vperm.xlu0 %4271, %v221_v12  }
  0x2c   :  { %3773 = vmatprep.subr.mxu1 %v4377_v1 }
  0x2d   :  { %3774 = vmatpush3.msra.mxu1 %v103_v17  ;;  %v4634_v17 = vld [vmem:[%s6668_s8] sm:$0x1] }
  0x2e   :  { %3775 = vmatprep.subr.mxu1 %v4377_v1  ;;  %v731_v21 = vmul.f32 %v4634_v17, %v4634_v17 }
  0x2f   :  { %233 = vperm.xlu1 %4272, %v219_v15   ;;  %91 = vperm.xlu0 %4271, %v81_v16  }
  0x30   :  { %3776 = vmatpush3.msra.mxu1 %v102_v20 }
  0x31   :  { %3786 = vmatprep.subr.mxu1 %v4377_v1 }
  0x33   :  { %227 = vperm.xlu1 %4272, %v217_v18   ;;  %230 = vperm.xlu0 %4271, %v218_v19  }
  0x9a   :  { %v249_v23 = vpop.permute.xlu1 %248  ;;  %v86_v24 = vpop.permute.xlu0 %85 }
  0x9b   :  { %vm93_vm2 = vcmp.eq.s32.totalorder %v4517_v22, %v86_v24  ;;  %vm260_vm4 = vcmp.eq.s32.totalorder %v4517_v22, %v249_v23 }
  0x9c   :  { %v3424_v25 = vsel %vm93_vm2, 1.0, %v4377_v1  ;;  %vm210_vm2 = vcmp.eq.s32.totalorder %v4563_v43, %v3430_v37 }
  0x9d   :  { %3778 = vmatmul.mubr.msk.f32.vlgmr.msra.gmra.mxu1 %vm109_vm1, %v3424_v25  ;;  %v3433_v49 = vsel %vm210_vm2, 1.0, %v4377_v1 }
  0x9e   :  { %v246_v26 = vpop.permute.xlu1 %245  ;;  %v252_v27 = vpop.permute.xlu0 %251  ;;  %3780 = vmatprep.mubr.msk.f32.mxu1 %vm6679_vm0, %v4377_v1 }
  0x9f   :  { %vm261_vm3 = vcmp.eq.s32.totalorder %v4517_v22, %v252_v27  ;;  %vm259_vm5 = vcmp.eq.s32.totalorder %v4517_v22, %v246_v26  ;;  %v4651_v26 = vld [vmem:[%s6661_s1 + $0x10] sm:$0xff]  ;;  %v4657_v27 = vld [vmem:[%s6661_s1 + $0x8] sm:$0xff] }
  0xa0   :  { %3787 = vmatpush3.msk.msra.mxu1 %vm261_vm3, %v4379_v28  ;;  %vm6681_vm3 = vcmp.ge.s32.totalorder %v4601_v4, 0 }
  0xa1   :  { %3788 = vmatprep.subr.mxu1 %v4377_v1  ;;  %v3458_v7 = vsel %vm6681_vm3, 1.0, %v4377_v1 }
  0xa2   :  { %v89_v29 = vpop.permute.xlu1 %88  ;;  %3789 = vmatpush3.msk.msra.mxu1 %vm260_vm4, %v4379_v28  ;;  %v243_v30 = vpop.permute.xlu0 %242  ;;  %v409_v9 = vrot.slane %v3458_v7, %v4605_v5  ;;  %vm6693_vm4 = vcmask 195584  }
  0xa3   :  { %vm94_vm6 = vcmp.eq.s32.totalorder %v4517_v22, %v89_v29  ;;  %3790 = vmatprep.subr.mxu1 %v4377_v1  ;;  %vm258_vm7 = vcmp.eq.s32.totalorder %v4517_v22, %v243_v30  ;;  %v540_v30 = vld [vmem:[#allocation6 + $0x78] sm:$0xff] }
  0xa4   :  { %v3425_v31 = vsel %vm94_vm6, 1.0, %v4377_v1  ;;  %3791 = vmatpush3.msk.msra.mxu1 %vm259_vm5, %v4379_v28  ;;  %vm6678_vm5 = vcmask 1040384   ;;  %vm6684_vm6 = vcmp.ge.s32.totalorder %v4657_v27, 0 }
  0xa5   :  { %3781 = vmatmul.mubr.msk.f32.gmra.mxu1 %vm109_vm1, %v3425_v31  ;;  %3792 = vmatprep.subr.mxu1 %v4377_v1  ;;  %v733_v25 = vsel %vm6678_vm5, %v731_v21, 0.0  ;;  %v539_v31 = vld [vmem:[#allocation6 + $0x70] sm:$0xff] }
  0xa6   :  { %v237_v32 = vpop.permute.xlu1 %236  ;;  %3793 = vmatpush3.msk.msra.mxu1 %vm258_vm7, %v4379_v28  ;;  %v240_v33 = vpop.permute.xlu0 %239  ;;  %3783 = vmatprep.mubr.msk.f32.mxu1 %vm6679_vm0, %v4377_v1  ;;  %vm6685_vm7 = vcmp.ge.s32.totalorder %v4651_v26, 0 }
  0xa7   :  { %vm257_vm8 = vcmp.eq.s32.totalorder %v4517_v22, %v240_v33  ;;  %3794 = vmatprep.subr.mxu1 %v4377_v1  ;;  %vm256_vm9 = vcmp.eq.s32.totalorder %v4517_v22, %v237_v32  ;;  %v826_v29 = vsel %vm6685_vm7, 1, %v4376_v0  ;;  %v538_v32 = vld [vmem:[#allocation6 + $0x68] sm:$0xff]  ;;  %v537_v33 = vld [vmem:[#allocation6 + $0x60] sm:$0xff]  ;;  %vm6688_vm7 = vcmp.lt.s32.totalorder %v4517_v22, %v4553_v39 }
  0xa8   :  { %3795 = vmatpush3.msk.msra.mxu1 %vm257_vm8, %v4379_v28  ;;  %vm392_vm8 = vcmp.eq.s32.totalorder %v4563_v43, %v4517_v22 }
  0xa9   :  { %3796 = vmatprep.subr.mxu1 %v4377_v1 }
  0xaa   :  { %v234_v35 = vpop.permute.xlu1 %233  ;;  %3797 = vmatpush3.msk.msra.mxu1 %vm256_vm9, %v4379_v28  ;;  %v92_v36 = vpop.permute.xlu0 %91  ;;  %vm391_vm9 = vcmp.eq.s32.totalorder %v4553_v39, %v4517_v22 }
  0xab   :  { %vm255_vm10 = vcmp.eq.s32.totalorder %v4517_v22, %v234_v35  ;;  %vm95_vm11 = vcmp.eq.s32.totalorder %v4517_v22, %v92_v36  ;;  %3798 = vmatprep.subr.mxu1 %v4377_v1  ;;  %v536_v35 = vld [vmem:[#allocation6 + $0x58] sm:$0xff]  ;;  %v535_v36 = vld [vmem:[#allocation6 + $0x50] sm:$0xff] }
  0xac   :  { %v3426_v38 = vsel %vm95_vm11, 1.0, %v4377_v1  ;;  %3799 = vmatpush3.msk.msra.mxu1 %vm255_vm10, %v4379_v28  ;;  %vm390_vm10 = vcmp.eq.s32.totalorder %v4540_v34, %v4517_v22 }
  0xad   :  { %3784 = vmatmul.mubr.msk.f32.gmra.mxu1 %vm109_vm1, %v3426_v38  ;;  %3800 = vmatprep.subr.mxu1 %v4377_v1  ;;  %vm209_vm1 = vcmp.eq.s32.totalorder %v4553_v39, %v3430_v37  ;;  %v534_v37 = vld [vmem:[#allocation6 + $0x48] sm:$0xff]  ;;  %v533_v38 = vld [vmem:[#allocation6 + $0x40] sm:$0xff] }
  0xae   :  { %v228_v40 = vpop.permute.xlu1 %227  ;;  %v231_v41 = vpop.permute.xlu0 %230  ;;  %3804 = vmatprep.mubr.msk.f32.mxu1 %vm6679_vm0, %v4377_v1  ;;  %v3432_v46 = vsel %vm209_vm1, 1.0, %v4377_v1 }
  0xaf   :  { %vm254_vm13 = vcmp.eq.s32.totalorder %v4517_v22, %v231_v41  ;;  %vm253_vm15 = vcmp.eq.s32.totalorder %v4517_v22, %v228_v40  ;;  %v532_v40 = vld [vmem:[#allocation6 + $0x38] sm:$0xff]  ;;  %v531_v41 = vld [vmem:[#allocation6 + $0x30] sm:$0xff] }
  0xb0   :  { %3801 = vmatpush3.msk.msra.mxu1 %vm254_vm13, %v4379_v28 }
  0xb1   :  { %3802 = vmatprep.subr.mxu1 %v4377_v1 }
  0xb2   :  { %3803 = vmatpush3.msk.msra.mxu1 %vm253_vm15, %v4379_v28  ;;  %v825_v28 = vsel %vm6684_vm6, 1, %v4376_v0 }
  0xb3   :  { %3805 = vmatmul.mubr.msk.f32.vlgmr.msra.gmra.mxu1 %vm280_vm14, %v3431_v42  ;;  %3828 = vmatprep.subr.mxu1 %v4377_v1  ;;  %v530_v42 = vld [vmem:[#allocation6 + $0x28] sm:$0xff] }
  0xb4   :  { %3807 = vmatprep.mubr.msk.f32.mxu1 %vm6679_vm0, %v4377_v1  ;;  %3829 = vmatpush3.msra.mxu1 %v556_v44  ;;  %v529_v44 = vld [vmem:[#allocation6 + $0x20] sm:$0xff] }
  0xb5   :  { %3830 = vmatprep.subr.mxu1 %v4377_v1 }
  0xb6   :  { %3831 = vmatpush3.msra.mxu1 %v555_v45  ;;  %v528_v45 = vld [vmem:[#allocation6 + $0x18] sm:$0xff] }
  0xb7   :  { %3808 = vmatmul.mubr.msk.f32.gmra.mxu1 %vm280_vm14, %v3432_v46  ;;  %3832 = vmatprep.subr.mxu1 %v4377_v1  ;;  %v527_v46 = vld [vmem:[#allocation6 + $0x10] sm:$0xff] }
  0xb8   :  { %3810 = vmatprep.mubr.msk.f32.mxu1 %vm6679_vm0, %v4377_v1  ;;  %3833 = vmatpush3.msra.mxu1 %v554_v47  ;;  %v526_v47 = vld [vmem:[#allocation6 + $0x8] sm:$0xff] }
  0xb9   :  { %3834 = vmatprep.subr.mxu1 %v4377_v1 }
  0xba   :  { %3835 = vmatpush3.msra.mxu1 %v553_v48  ;;  %v525_v48 = vld [vmem:[#allocation6] sm:$0xff] }
  0xbb   :  { %3811 = vmatmul.mubr.msk.f32.gmra.mxu1 %vm280_vm14, %v3433_v49  ;;  %3836 = vmatprep.subr.mxu1 %v4377_v1 }
  0xbc   :  { %3837 = vmatpush3.msra.mxu1 %v552_v50  ;;  %3860 = vmatprep.mubr.msk.f32.mxu1 %vm6679_vm0, %v4377_v1 }
  0xbd   :  { %3838 = vmatprep.subr.mxu1 %v4377_v1 }
  0xbe   :  { %3839 = vmatpush3.msra.mxu1 %v551_v51 }
  0xbf   :  { %3840 = vmatprep.subr.mxu1 %v4377_v1 }
  0xc0   :  { %3841 = vmatpush3.msra.mxu1 %v550_v52 }
  0xc1   :  { %3842 = vmatprep.subr.mxu1 %v4377_v1 }
  0xc2   :  { %3843 = vmatpush3.msra.mxu1 %v549_v53 }
  0xc3   :  { %3844 = vmatprep.subr.mxu1 %v4377_v1 }
  0xc4   :  { %3845 = vmatpush3.msra.mxu1 %v548_v54 }
  0xc5   :  { %3846 = vmatprep.subr.mxu1 %v4377_v1 }
  0xc6   :  { %3847 = vmatpush3.msra.mxu1 %v547_v55 }
  0xc7   :  { %3848 = vmatprep.subr.mxu1 %v4377_v1 }
  0xc8   :  { %3849 = vmatpush3.msra.mxu1 %v546_v56 }
  0xc9   :  { %3850 = vmatprep.subr.mxu1 %v4377_v1 }
  0xca   :  { %3851 = vmatpush3.msra.mxu1 %v545_v57 }
  0xcb   :  { %3852 = vmatprep.subr.mxu1 %v4377_v1 }
  0xcc   :  { %3853 = vmatpush3.msra.mxu1 %v544_v58 }
  0xcd   :  { %3854 = vmatprep.subr.mxu1 %v4377_v1 }
  0xce   :  { %3855 = vmatpush3.msra.mxu1 %v543_v59 }
  0xcf   :  { %3856 = vmatprep.subr.mxu1 %v4377_v1 }
  0xd0   :  { %3857 = vmatpush3.msra.mxu1 %v542_v60 }
  0xd1   :  { %3858 = vmatprep.subr.mxu1 %v4377_v1 }
  0xd2   :  { %3859 = vmatpush3.msra.mxu1 %v541_v61 }
  0xd3   :  { %3910 = vmatprep.subr.mxu1 %v4377_v1 }
 0x15d   :  { %v185_v62 = vpop.f32.mrf.mxu1 }
 0x15e   :  { %3861 = vmatmul.mubr.f32.vlgmr.msra.gmra.mxu1 %v185_v62 }
 0x15f   :  { %v3779_v63 = vpop.f32.mrf.mxu1  ;;  %3863 = vmatprep.mubr.msk.f32.mxu1 %vm6679_vm0, %v4377_v1 }
 0x165   :  { %v190_v2 = vpop.f32.mrf.mxu1 }
 0x166   :  { %3864 = vmatmul.mubr.f32.gmra.mxu1 %v190_v2 }
 0x167   :  { %v3782_v3 = vpop.f32.mrf.mxu1  ;;  %3866 = vmatprep.mubr.msk.f32.mxu1 %vm6679_vm0, %v4377_v1 }
 0x16d   :  { %v195_v6 = vpop.f32.mrf.mxu1 }
 0x16e   :  { %3814 = vmatpush3.msra.mxu0 %v195_v6  ;;  %3867 = vmatmul.mubr.f32.gmra.mxu1 %v195_v6 }
 0x16f   :  { %v3785_v8 = vpop.f32.mrf.mxu1  ;;  %3815 = vmatprep.subr.mxu0 %v4377_v1  ;;  %3916 = vmatprep.mubr.msk.f32.mxu1 %vm6679_vm0, %v4377_v1 }
 0x170   :  { %3816 = vmatpush3.msra.mxu0 %v190_v2 }
 0x171   :  { %3817 = vmatprep.subr.mxu0 %v4377_v1 }
 0x172   :  { %3818 = vmatpush3.msra.mxu0 %v185_v62 }
 0x173   :  { %v4615_v10 = vpop.f32.mrf.mxu1  ;;  %3869 = vmatprep.subr.mxu0 %v4377_v1 }
 0x174   :  { %3820 = vmatmul.mubr.msk.f32.vlgmr.msra.gmra.mxu0 %vm6693_vm4, %v4615_v10  ;;  %v411_v11 = vmul.f32 %v409_v9, %v4615_v10 }
 0x175   :  { %v3806_v12 = vpop.f32.mrf.mxu1  ;;  %3822 = vmatprep.mubr.msk.f32.mxu0 %vm6679_vm0, %v4377_v1  ;;  %3870 = vmatpush3.msra.mxu0 %v540_v30 }
 0x176   :  { %v415_v13 = vsel %vm6693_vm4, %v411_v11, 0.0  ;;  %3871 = vmatprep.subr.mxu0 %v4377_v1 }
 0x177   :  { %416 = vadd.xlane.f32.xlu0 %v415_v13  ;;  %v4624_v14 = vpop.f32.mrf.mxu1  ;;  %3872 = vmatpush3.msra.mxu0 %v539_v31 }
 0x178   :  { %3823 = vmatmul.mubr.msk.f32.gmra.mxu0 %vm6693_vm4, %v4624_v14  ;;  %v412_v15 = vmul.f32 %v409_v9, %v4624_v14  ;;  %3873 = vmatprep.subr.mxu0 %v4377_v1 }
 0x179   :  { %v3809_v16 = vpop.f32.mrf.mxu1  ;;  %3825 = vmatprep.mubr.msk.f32.mxu0 %vm6679_vm0, %v4377_v1  ;;  %3874 = vmatpush3.msra.mxu0 %v538_v32 }
 0x17a   :  { %v418_v18 = vsel %vm6693_vm4, %v412_v15, 0.0  ;;  %3875 = vmatprep.subr.mxu0 %v4377_v1 }
 0x17b   :  { %419 = vadd.xlane.f32.xlu1 %v418_v18  ;;  %v4637_v19 = vpop.f32.mrf.mxu1  ;;  %3876 = vmatpush3.msra.mxu0 %v537_v33 }
 0x17c   :  { %3826 = vmatmul.mubr.msk.f32.gmra.mxu0 %vm6693_vm4, %v4637_v19  ;;  %v413_v20 = vmul.f32 %v409_v9, %v4637_v19  ;;  %3877 = vmatprep.subr.mxu0 %v4377_v1 }
 0x17d   :  { %v3812_v23 = vpop.f32.mrf.mxu1  ;;  %3901 = vmatprep.mubr.msk.f32.mxu0 %vm6679_vm0, %v4377_v1  ;;  %3878 = vmatpush3.msra.mxu0 %v536_v35 }
 0x17e   :  { %v421_v24 = vsel %vm6693_vm4, %v413_v20, 0.0  ;;  %3879 = vmatprep.subr.mxu0 %v4377_v1 }
 0x17f   :  { %422 = vadd.xlane.f32.xlu0 %v421_v24  ;;  %3880 = vmatpush3.msra.mxu0 %v535_v36 }
 0x180   :  { %3881 = vmatprep.subr.mxu0 %v4377_v1 }
 0x181   :  { %3882 = vmatpush3.msra.mxu0 %v534_v37 }
 0x182   :  { %3883 = vmatprep.subr.mxu0 %v4377_v1 }
 0x183   :  { %734 = vadd.xlane.f32.xlu0 %v733_v25  ;;  %3884 = vmatpush3.msra.mxu0 %v533_v38 }
 0x184   :  { %3885 = vmatprep.subr.mxu0 %v4377_v1 }
 0x185   :  { %3886 = vmatpush3.msra.mxu0 %v532_v40 }
 0x186   :  { %3887 = vmatprep.subr.mxu0 %v4377_v1 }
 0x187   :  { %3888 = vmatpush3.msra.mxu0 %v531_v41 }
 0x188   :  { %3889 = vmatprep.subr.mxu0 %v4377_v1 }
 0x189   :  { %3890 = vmatpush3.msra.mxu0 %v530_v42  ;;  %v4724_v42 = vsel %vm391_vm9, 1.0, %v4377_v1 }
 0x18a   :  { %3891 = vmatprep.subr.mxu0 %v4377_v1 }
 0x18b   :  { %3892 = vmatpush3.msra.mxu0 %v529_v44 }
 0x18c   :  { %381 = vperm.xlu1 %4272, %v4651_v26   ;;  %3893 = vmatprep.subr.mxu0 %v4377_v1 }
 0x18d   :  { %3894 = vmatpush3.msra.mxu0 %v528_v45 }
 0x18e   :  { %3895 = vmatprep.subr.mxu0 %v4377_v1 }
 0x18f   :  { %3896 = vmatpush3.msra.mxu0 %v527_v46  ;;  %v4730_v46 = vsel %vm390_vm10, 1.0, %v4377_v1 }
 0x190   :  { %378 = vperm.xlu1 %4272, %v4657_v27   ;;  %3897 = vmatprep.subr.mxu0 %v4377_v1 }
 0x191   :  { %3898 = vmatpush3.msra.mxu0 %v526_v47 }
 0x192   :  { %3899 = vmatprep.subr.mxu0 %v4377_v1 }
 0x193   :  { %3900 = vmatpush3.msra.mxu0 %v525_v48 }
 0x194   :  { %831 = vperm.xlu1 %4272, %v825_v28   ;;  %3928 = vmatprep.subr.mxu0 %v4377_v1  ;;  %v3462_v28 = vld [vmem:[%s6667_s7] ss:$0 sm:$0xff] }
 0x199   :  { %834 = vperm.xlu0 %4271, %v826_v29  }
 0x200   :  { %v417_v50 = vpop.xlane.xlu0 %416 }
 0x201   :  { %v513_v52 = vmax.f32 %v417_v50, 1.0 }
 0x203   :  { %4273 = vrcp.f32 %v513_v52 }
 0x204   :  { %v420_v53 = vpop.xlane.xlu1 %419 }
 0x205   :  { %v514_v55 = vmax.f32 %v420_v53, 1.0  ;;  %v4744_v53 = vld [vmem:[%s6661_s1] sm:$0xff] }
 0x206   :  { %vm6682_vm11 = vcmp.ge.s32.totalorder %v4744_v53, 0 }
 0x207   :  { %4275 = vrcp.f32 %v514_v55 }
 0x208   :  { %v423_v56 = vpop.xlane.xlu0 %422  ;;  %v4751_v55 = vpop.permute.xlu1 %381 }
 0x209   :  { %v515_v58 = vmax.f32 %v423_v56, 1.0 }
 0x20b   :  { %4277 = vrcp.f32 %v515_v58  ;;  %v4757_v58 = vrot.slane %v4601_v4, %v4605_v5 }
 0x20c   :  { %v735_v20 = vpop.xlane.xlu0 %734  ;;  %v4753_v56 = vpop.permute.xlu1 %378 }
 0x20d   :  { %4279 = vrsqrt.f32 %v735_v20  ;;  %vm6677_vm13 = vcmp.eq.s32.totalorder %v4751_v55, %v4757_v58  ;;  %vm6676_vm2 = vcmp.eq.s32.totalorder %v4753_v56, %v4757_v58 }
 0x210   :  { %v4274_v61 = vpop.eup %4273 }
 0x214   :  { %v4276_v3 = vpop.eup %4275 }
 0x218   :  { %v4278_v9 = vpop.eup %4277 }
 0x21a   :  { %v4280_v37 = vpop.eup %4279 }
 0x21b   :  { %v737_v40 = vmul.f32 %v4280_v37, %v4634_v17  ;;  %v4721_v17 = vsel %vm392_vm8, 1.0, %v4377_v1 }
 0x21e   :  { %v624_v49 = vpop.f32.mrf.mxu1 }
 0x220   :  { %v3862_v51 = vpop.f32.mrf.mxu1 }
 0x226   :  { %v629_v54 = vpop.f32.mrf.mxu1 }
 0x228   :  { %v3865_v57 = vpop.f32.mrf.mxu1 }
 0x229   :  { %v835_v57 = vpop.permute.xlu0 %834 }
 0x22a   :  { %vm838_vm12 = vcmp.eq.s32.totalorder %v835_v57, 1 }
 0x22b   :  { %vm841_vm14 = vmand %vm6677_vm13, %vm838_vm12  ;;  %vm6683_vm12 = vcmp.lt.s32.totalorder %v4563_v43, %v4517_v22 }
 0x22e   :  { %v634_v59 = vpop.f32.mrf.mxu1 }
 0x230   :  { %v3868_v60 = vpop.f32.mrf.mxu1 }
 0x231   :  { %v832_v60 = vpop.permute.xlu1 %831 }
 0x232   :  { %vm837_vm15 = vcmp.eq.s32.totalorder %v832_v60, 1 }
 0x233   :  { %vm840_vm9 = vmand %vm6676_vm2, %vm837_vm15  ;;  %vm6686_vm2 = vcmp.lt.s32.totalorder %v4553_v39, %v4517_v22 }
 0x234   :  { %v499_v62 = vpop.f32.mrf.mxu0 }
 0x235   :  { %v522_v63 = vmul.f32 %v4274_v61, %v499_v62 }
 0x236   :  { %v3821_v2 = vpop.f32.mrf.mxu0 }
 0x237   :  { %3902 = vmatmul.mubr.f32.vlgmr.msra.gmra.mxu0 %v522_v63 }
 0x238   :  { %v504_v6 = vpop.f32.mrf.mxu0  ;;  %3904 = vmatprep.mubr.msk.f32.mxu0 %vm6679_vm0, %v4377_v1 }
 0x239   :  { %v523_v7 = vmul.f32 %v4276_v3, %v504_v6 }
 0x23a   :  { %v3824_v8 = vpop.f32.mrf.mxu0 }
 0x23b   :  { %3905 = vmatmul.mubr.f32.gmra.mxu0 %v523_v7 }
 0x23c   :  { %v509_v11 = vpop.f32.mrf.mxu0  ;;  %3907 = vmatprep.mubr.msk.f32.mxu0 %vm6679_vm0, %v4377_v1 }
 0x23d   :  { %v524_v12 = vmul.f32 %v4278_v9, %v509_v11 }
 0x23e   :  { %v3827_v13 = vpop.f32.mrf.mxu0 }
 0x23f   :  { %3908 = vmatmul.mubr.f32.gmra.mxu0 %v524_v12 }
 0x240   :  { %3934 = vmatprep.mubr.msk.f32.mxu0 %vm6679_vm0, %v4377_v1 }
 0x2f7   :  { %v704_v15 = vpop.f32.mrf.mxu0 }
 0x2f8   :  { %v705_v31 = vadd.f32 %v704_v15, %v624_v49 }
 0x2f9   :  { %v3903_v16 = vpop.f32.mrf.mxu0 }
 0x2fa   :  { %v4701_v35 = vadd.f32 %v3462_v28, %v705_v31 }
 0x2fb   :  { %v709_v18 = vpop.f32.mrf.mxu0 }
 0x2fc   :  { %v710_v24 = vadd.f32 %v709_v18, %v629_v54  ;;  %v727_v38 = vmax.f32 %v4701_v35, 0.0  ;;  %v824_v54 = vsel %vm6682_vm11, 1, %v4376_v0  ;;  %vm6687_vm11 = vcmp.lt.s32.totalorder %v4517_v22, %v4563_v43 }
 0x2fd   :  { %v3906_v21 = vpop.f32.mrf.mxu0 }
 0x2fe   :  { %v4695_v32 = vadd.f32 %v3462_v28, %v710_v24 }
 0x2ff   :  { %v714_v23 = vpop.f32.mrf.mxu0 }
 0x300   :  { %v715_v25 = vadd.f32 %v714_v23, %v634_v59  ;;  %v728_v36 = vmax.f32 %v4695_v32, 0.0  ;;  %v403_v59 = vsel %vm6681_vm3, 1, %v4376_v0 }
 0x301   :  { %v3909_v29 = vpop.f32.mrf.mxu0  ;;  %v845_v61 = vrot.slane %v403_v59, %v4605_v5 }
 0x302   :  { %v4693_v30 = vadd.f32 %v3462_v28, %v715_v25 }
 0x303   :  { %vm4768_vm1 = vcmp.eq.s32.totalorder %v845_v61, 1 }
 0x304   :  { %v729_v33 = vmax.f32 %v4693_v30, 0.0  ;;  %vm4776_vm8 = vmand %vm841_vm14, %vm4768_vm1 }
 0x305   :  { %v3465_v2 = vsel %vm4776_vm8, 1.0, %v4377_v1  ;;  %vm4788_vm10 = vmand %vm840_vm9, %vm4768_vm1 }
 0x306   :  { %3911 = vmatpush3.xpose.msra.mxu1 %v729_v33  ;;  %v4793_v6 = vsel %vm6693_vm4, %v3465_v2, 0.0  ;;  %v3464_v7 = vsel %vm4788_vm10, 1.0, %v4377_v1 }
 0x307   :  { %3912 = vmatprep.subr.mxu1 %v4377_v1  ;;  %v927_v8 = vsel %vm6693_vm4, %v3464_v7, 0.0 }
 0x30a   :  { %3913 = vmatpush3.xpose.msra.mxu1 %v728_v36 }
 0x30b   :  { %3914 = vmatprep.subr.mxu1 %v4377_v1 }
 0x30e   :  { %3915 = vmatpush3.xpose.msra.mxu1 %v727_v38 }
 0x30f   :  { %3919 = vmatprep.subr.mxu1 %v4377_v1 }
 0x311   :  { %3917 = vmatmul.mubr.f32.vlgmr.msra.gmra.mxu1 %v737_v40 }
 0x312   :  { %3925 = vmatprep.mubr.msk.f32.mxu1 %vm6679_vm0, %v4377_v1 }
 0x3d1   :  { %v804_v41 = vpop.f32.mrf.mxu1 }
 0x3d2   :  { %v4727_v44 = vrot.slane %v804_v41, %v4605_v5 }
 0x3d3   :  { %v3918_v45 = vpop.f32.mrf.mxu1 }
 0x3d4   :  { %v814_v47 = vmul.f32 %v4721_v17, %v4727_v44  ;;  %v813_v48 = vmul.f32 %v4724_v42, %v4727_v44  ;;  %v812_v51 = vmul.f32 %v4730_v46, %v4727_v44 }
 0x3d6   :  { %v821_v49 = vsel %vm6693_vm4, %v814_v47, 0.0  ;;  %v818_v50 = vsel %vm6693_vm4, %v813_v48, 0.0  ;;  %v815_v52 = vsel %vm6693_vm4, %v812_v51, 0.0 }
 0x3d7   :  { %822 = vadd.xlane.f32.xlu1 %v821_v49  ;;  %819 = vadd.xlane.f32.xlu0 %v818_v50 }
 0x3db   :  { %816 = vadd.xlane.f32.xlu0 %v815_v52 }
 0x3e8   :  { %375 = vperm.xlu1 %4272, %v4744_v53  }
 0x3f1   :  { %828 = vperm.xlu0 %4271, %v824_v54  }
 0x40c   :  { %931 = vadd.xlane.f32.xlu1 %v4793_v6 }
 0x410   :  { %928 = vadd.xlane.f32.xlu0 %v927_v8 }
 0x460   :  { %v4802_v9 = vpop.xlane.xlu1 %822  ;;  %v4804_v11 = vpop.xlane.xlu0 %819 }
 0x461   :  { %vm867_vm14 = vcmp.gt.f32.partialorder %v4802_v9, %v4727_v44  ;;  %vm870_vm15 = vcmp.eq.f32.partialorder %v4802_v9, %v4727_v44  ;;  %vm869_vm13 = vcmp.eq.f32.partialorder %v4804_v11, %v4727_v44  ;;  %vm866_vm0 = vcmp.gt.f32.partialorder %v4804_v11, %v4727_v44 }
 0x462   :  { %vm876_vm9 = vmand %vm870_vm15, %vm6683_vm12  ;;  %vm855_vm3 = vcmp.eq.f32.partialorder %v4727_v44, %v4802_v9  ;;  %vm852_vm12 = vcmp.gt.f32.partialorder %v4727_v44, %v4802_v9  ;;  %vm854_vm6 = vcmp.eq.f32.partialorder %v4727_v44, %v4804_v11  ;;  %4281 = vtanh.f32 %v4802_v9 }
 0x463   :  { %vm4817_vm5 = vmor %vm867_vm14, %vm876_vm9  ;;  %4283 = vtanh.f32 %v4804_v11 }
 0x464   :  { %vm875_vm15 = vmand %vm869_vm13, %vm6686_vm2  ;;  %v4836_v15 = vpop.xlane.xlu0 %816  ;;  %v4853_v16 = vpop.permute.xlu1 %375 }
 0x465   :  { %vm4832_vm14 = vmor %vm866_vm0, %vm875_vm15  ;;  %vm851_vm15 = vcmp.gt.f32.partialorder %v4727_v44, %v4804_v11  ;;  %4285 = vtanh.f32 %v4836_v15 }
 0x466   :  { %vm861_vm9 = vmand %vm855_vm3, %vm6687_vm11  ;;  %vm868_vm11 = vcmp.eq.f32.partialorder %v4836_v15, %v4727_v44 }
 0x467   :  { %vm864_vm13 = vmor %vm852_vm12, %vm861_vm9  ;;  %vm6691_vm12 = vcmp.lt.s32.totalorder %v4540_v34, %v4517_v22 }
 0x468   :  { %vm888_vm2 = vmand %vm4776_vm8, %vm864_vm13 }
 0x469   :  { %v3468_v18 = vsel %vm888_vm2, 1.0, %v4377_v1  ;;  %vm860_vm3 = vmand %vm854_vm6, %vm6688_vm7  ;;  %vm6690_vm2 = vcmp.eq.s32.totalorder %v4853_v16, %v4757_v58  ;;  %vm865_vm7 = vcmp.gt.f32.partialorder %v4836_v15, %v4727_v44 }
 0x46a   :  { %v901_v20 = vsel %vm6693_vm4, %v3468_v18, 0.0  ;;  %vm863_vm9 = vmor %vm851_vm15, %vm860_vm3  ;;  %v1476_v18 = vld [vmem:[#allocation6 + $0x178] sm:$0xff] }
 0x46b   :  { %902 = vadd.xlane.f32.xlu0 %v901_v20  ;;  %vm887_vm13 = vmand %vm4788_vm10, %vm863_vm9 }
 0x46c   :  { %v829_v21 = vpop.permute.xlu0 %828  ;;  %v3467_v23 = vsel %vm887_vm13, 1.0, %v4377_v1  ;;  %vm874_vm0 = vmand %vm868_vm11, %vm6691_vm12  ;;  %vm853_vm11 = vcmp.eq.f32.partialorder %v4727_v44, %v4836_v15  ;;  %vm6692_vm13 = vcmp.lt.s32.totalorder %v4517_v22, %v4540_v34 }
 0x46d   :  { %vm836_vm6 = vcmp.eq.s32.totalorder %v829_v21, 1  ;;  %v898_v24 = vsel %vm6693_vm4, %v3467_v23, 0.0  ;;  %vm877_vm9 = vmor %vm865_vm7, %vm874_vm0 }
 0x46e   :  { %vm839_vm15 = vmand %vm6690_vm2, %vm836_vm6 }
 0x46f   :  { %vm4880_vm3 = vmand %vm839_vm15, %vm4768_vm1  ;;  %899 = vadd.xlane.f32.xlu0 %v898_v24  ;;  %vm850_vm1 = vcmp.gt.f32.partialorder %v4727_v44, %v4836_v15 }
 0x470   :  { %v3463_v28 = vsel %vm4880_vm3, 1.0, %v4377_v1  ;;  %vm904_vm6 = vmand %vm4880_vm3, %vm877_vm9 }
 0x471   :  { %v924_v29 = vsel %vm6693_vm4, %v3463_v28, 0.0  ;;  %vm905_vm7 = vmand %vm4788_vm10, %vm4832_vm14  ;;  %v3469_v31 = vsel %vm904_vm6, 1.0, %v4377_v1  ;;  %vm6752_vm6 = vcmp.ge.s32.totalorder %v4657_v27, 0 }
 0x472   :  { %925 = vadd.xlane.f32.xlu1 %v924_v29  ;;  %v939_v37 = vadd.f32 %v927_v8, %v924_v29  ;;  %v3470_v40 = vsel %vm905_vm7, 1.0, %v4377_v1  ;;  %vm6746_vm0 = vmand %vm4776_vm8, %vm4817_vm5  ;;  %v913_v44 = vsel %vm6693_vm4, %v3469_v31, 0.0  ;;  %v6750_v29 = vmov 0 }
 0x473   :  { %v3471_v41 = vsel %vm6746_vm0, 1.0, %v4377_v1  ;;  %vm859_vm15 = vmand %vm853_vm11, %vm6692_vm13  ;;  %v914_v45 = vsel %vm6693_vm4, %v3470_v40, 0.0  ;;  %vm6755_vm0 = vcmp.ge.s32.totalorder %v4744_v53, 0 }
 0x474   :  { %v940_v47 = vadd.f32 %v939_v37, %v4793_v6  ;;  %vm862_vm10 = vmor %vm850_vm1, %vm859_vm15  ;;  %v915_v48 = vadd.f32 %v914_v45, %v913_v44  ;;  %v916_v49 = vsel %vm6693_vm4, %v3471_v41, 0.0  ;;  %v6753_v41 = vmov 0 }
 0x475   :  { %vm886_vm14 = vmand %vm4880_vm3, %vm862_vm10  ;;  %vm6749_vm3 = vcmp.ge.s32.totalorder %v4651_v26, 0  ;;  %vm6758_vm10 = vcmp.ge.s32.totalorder %v4601_v4, 0 }
 0x476   :  { %v941_v50 = vrot.slane %v940_v47, 4  ;;  %v3466_v51 = vsel %vm886_vm14, 1.0, %v4377_v1  ;;  %v917_v52 = vadd.f32 %v916_v49, %v915_v48  ;;  %v6756_v49 = vmov 0 }
 0x477   :  { %v895_v54 = vsel %vm6693_vm4, %v3466_v51, 0.0 }
 0x478   :  { %v942_v57 = vadd.f32 %v941_v50, %v940_v47  ;;  %896 = vadd.xlane.f32.xlu1 %v895_v54  ;;  %v918_v59 = vrot.slane %v917_v52, 4  ;;  %v6759_v50 = vmov 0 }
 0x47a   :  { %v943_v60 = vrot.slane %v942_v57, 2  ;;  %v919_v61 = vadd.f32 %v918_v59, %v917_v52 }
 0x47c   :  { %v944_v62 = vadd.f32 %v943_v60, %v942_v57  ;;  %v920_v63 = vrot.slane %v919_v61, 2 }
 0x47e   :  { %v945_v2 = vrot.slane %v944_v62, 1  ;;  %v921_v3 = vadd.f32 %v920_v63, %v919_v61  ;;  %v4282_v61 = vpop.eup %4281 }
 0x480   :  { %v946_v6 = vadd.f32 %v945_v2, %v944_v62  ;;  %v922_v7 = vrot.slane %v921_v3, 1  ;;  %v4973_v62 = vmul.f32 %v4282_v61, %v729_v33  ;;  %v4284_v2 = vpop.eup %4283  ;;  %v1464_v61 = vld [vmem:[#allocation6 + $0x118] sm:$0xff] }
 0x481   :  { %v4996_v30 = vmul.f32 %v4284_v2, %v728_v36  ;;  %v4286_v36 = vpop.eup %4285  ;;  %v1477_v2 = vld [vmem:[#allocation6 + $0x180] sm:$0xff] }
 0x482   :  { %v947_v8 = vmul.f32 0.8, %v946_v6  ;;  %v923_v13 = vadd.f32 %v922_v7, %v921_v3  ;;  %v5028_v6 = vmul.f32 %v4286_v36, %v727_v38  ;;  %v1492_v38 = vld [vmem:[#allocation6 + $0x1f8] sm:$0xff]  ;;  %v1461_v36 = vld [vmem:[#allocation6 + $0x100] sm:$0xff] }
 0x484   :  { %v948_v12 = vceil.f32 %v947_v8 }
 0x486   :  { %vm4919_vm5 = vcmp.lt.f32.partialorder %v923_v13, %v948_v12  ;;  %v1491_v12 = vld [vmem:[#allocation6 + $0x1f0] sm:$0xff]  ;;  %v1490_v13 = vld [vmem:[#allocation6 + $0x1e8] sm:$0xff] }
 0x487   :  { %vm4954_vm14 = vmand %vm6758_vm10, %vm4919_vm5  ;;  %vm6764_vm10 = vcmask 1040384  }
 0x488   :  { %v6760_v50 = vsel %vm4954_vm14, 4294967295, %v6759_v50  ;;  %v3477_v53 = vsel %vm4954_vm14, 1.0, %v4377_v1  ;;  %v982_v3 = vsel %vm4954_vm14, 1, %v4376_v0 }
 0x489   :  { %v1354_v51 = vrot.slane %v3477_v53, %v4605_v5  ;;  %v986_v11 = vrot.slane %v982_v3, %v4605_v5  ;;  %v1468_v53 = vld [vmem:[#allocation6 + $0x138] sm:$0xff]  ;;  %v1463_v3 = vld [vmem:[#allocation6 + $0x110] sm:$0xff] }
 0x48b   :  { %v1356_v52 = vmul.f32 %v1354_v51, %v4615_v10  ;;  %v1358_v57 = vmul.f32 %v1354_v51, %v4637_v19  ;;  %v1357_v4 = vmul.f32 %v1354_v51, %v4624_v14  ;;  %v1481_v51 = vld [vmem:[#allocation6 + $0x1a0] sm:$0xff] }
 0x48d   :  { %v1359_v54 = vsel %vm6693_vm4, %v1356_v52, 0.0  ;;  %v1365_v59 = vsel %vm6693_vm4, %v1358_v57, 0.0  ;;  %v1362_v60 = vsel %vm6693_vm4, %v1357_v4, 0.0  ;;  %v1467_v52 = vld [vmem:[#allocation6 + $0x130] sm:$0xff]  ;;  %v1466_v57 = vld [vmem:[#allocation6 + $0x128] sm:$0xff]  ;;  %v1465_v4 = vld [vmem:[#allocation6 + $0x120] sm:$0xff] }
 0x495   :  { %v932_v20 = vpop.xlane.xlu1 %931 }
 0x496   :  { %v935_v21 = vmul.f32 0.8, %v932_v20  ;;  %v1489_v20 = vld [vmem:[#allocation6 + $0x1e0] sm:$0xff] }
 0x498   :  { %v938_v24 = vceil.f32 %v935_v21  ;;  %v1475_v21 = vld [vmem:[#allocation6 + $0x170] sm:$0xff] }
 0x499   :  { %v929_v23 = vpop.xlane.xlu0 %928 }
 0x49a   :  { %v934_v25 = vmul.f32 0.8, %v929_v23  ;;  %v1488_v23 = vld [vmem:[#allocation6 + $0x1d8] sm:$0xff] }
 0x49c   :  { %v937_v31 = vceil.f32 %v934_v25  ;;  %v1487_v25 = vld [vmem:[#allocation6 + $0x1d0] sm:$0xff] }
 0x4f4   :  { %v903_v28 = vpop.xlane.xlu0 %902 }
 0x4f5   :  { %vm951_vm8 = vcmp.lt.f32.partialorder %v903_v28, %v938_v24  ;;  %v1474_v24 = vld [vmem:[#allocation6 + $0x168] sm:$0xff]  ;;  %v1473_v28 = vld [vmem:[#allocation6 + $0x160] sm:$0xff] }
 0x4f6   :  { %vm4925_vm9 = vmand %vm6749_vm3, %vm951_vm8  ;;  %vm6689_vm3 = vcmp.eq.s32.totalorder %v4540_v34, %v4757_v58 }
 0x4f7   :  { %v6751_v29 = vsel %vm4925_vm9, 4294967295, %v6750_v29  ;;  %v965_v37 = vsel %vm4925_vm9, 1, %v4376_v0 }
 0x4f8   :  { %973 = vperm.xlu0 %4271, %v965_v37   ;;  %v900_v40 = vpop.xlane.xlu0 %899  ;;  %v1472_v37 = vld [vmem:[#allocation6 + $0x158] sm:$0xff] }
 0x4f9   :  { %vm950_vm11 = vcmp.lt.f32.partialorder %v900_v40, %v937_v31  ;;  %v1486_v31 = vld [vmem:[#allocation6 + $0x1c8] sm:$0xff]  ;;  %v1485_v40 = vld [vmem:[#allocation6 + $0x1c0] sm:$0xff] }
 0x4fa   :  { %vm4934_vm1 = vmand %vm6752_vm6, %vm950_vm11  ;;  %vm5017_vm11 = vcmp.eq.s32.totalorder %v986_v11, 1  ;;  %v1462_v11 = vld [vmem:[#allocation6 + $0x108] sm:$0xff] }
 0x4fb   :  { %v6754_v41 = vsel %vm4934_vm1, 4294967295, %v6753_v41  ;;  %v926_v44 = vpop.xlane.xlu1 %925  ;;  %v964_v26 = vsel %vm4934_vm1, 1, %v4376_v0  ;;  %vm988_vm6 = vmand %vm6689_vm3, %vm5017_vm11 }
 0x4fc   :  { %v933_v45 = vmul.f32 0.8, %v926_v44  ;;  %970 = vperm.xlu1 %4272, %v964_v26   ;;  %v5045_v35 = vsel %vm988_vm6, 1.0, %v4377_v1  ;;  %v1471_v44 = vld [vmem:[#allocation6 + $0x150] sm:$0xff]  ;;  %v1484_v26 = vld [vmem:[#allocation6 + $0x1b8] sm:$0xff]  ;;  %vm6765_vm6 = vcmp.eq.s32.totalorder %v4751_v55, %v4757_v58 }
 0x4fe   :  { %v936_v47 = vceil.f32 %v933_v45  ;;  %v1470_v45 = vld [vmem:[#allocation6 + $0x148] sm:$0xff] }
 0x501   :  { %v897_v48 = vpop.xlane.xlu1 %896 }
 0x502   :  { %vm949_vm7 = vcmp.lt.f32.partialorder %v897_v48, %v936_v47  ;;  %v1483_v47 = vld [vmem:[#allocation6 + $0x1b0] sm:$0xff]  ;;  %v1469_v48 = vld [vmem:[#allocation6 + $0x140] sm:$0xff] }
 0x503   :  { %vm4943_vm15 = vmand %vm6755_vm0, %vm949_vm7  ;;  %vm6763_vm0 = vmmov 0  }
 0x504   :  { %v6757_v49 = vsel %vm4943_vm15, 4294967295, %v6756_v49  ;;  %v963_v27 = vsel %vm4943_vm15, 1, %v4376_v0 }
 0x505   :  { %967 = vperm.xlu1 %4272, %v963_v27   ;;  %v1482_v27 = vld [vmem:[#allocation6 + $0x1a8] sm:$0xff] }
 0x517   :  { %1360 = vadd.xlane.f32.xlu0 %v1359_v54  ;;  %v1480_v54 = vld [vmem:[#allocation6 + $0x198] sm:$0xff] }
 0x51b   :  { %1366 = vadd.xlane.f32.xlu0 %v1365_v59  ;;  %v1479_v59 = vld [vmem:[#allocation6 + $0x190] sm:$0xff] }
 0x529   :  { %1363 = vadd.xlane.f32.xlu1 %v1362_v60  ;;  %v1478_v60 = vld [vmem:[#allocation6 + $0x188] sm:$0xff] }
 0x573   :  { %v4975_v63 = vpop.permute.xlu0 %973 }
 0x574   :  { %vm977_vm5 = vcmp.eq.s32.totalorder %v4975_v63, 1 }
 0x575   :  { %v4984_v9 = vsel %vm977_vm5, %v4973_v62, 0.0  ;;  %3920 = vmatpush3.msk.msra.mxu1 %vm977_vm5, %v4973_v62  ;;  %3929 = vmatpush3.msk.msra.mxu0 %vm977_vm5, %v4973_v62 }
 0x576   :  { %3921 = vmatprep.subr.mxu1 %v4377_v1  ;;  %3930 = vmatprep.subr.mxu0 %v4377_v1 }
 0x577   :  { %v4998_v33 = vpop.permute.xlu1 %970 }
 0x578   :  { %vm976_vm8 = vcmp.eq.s32.totalorder %v4998_v33, 1 }
 0x579   :  { %v5005_v15 = vsel %vm976_vm8, %v4996_v30, 0.0  ;;  %3922 = vmatpush3.msk.msra.mxu1 %vm976_vm8, %v4996_v30  ;;  %3931 = vmatpush3.msk.msra.mxu0 %vm976_vm8, %v4996_v30 }
 0x57a   :  { %3923 = vmatprep.subr.mxu1 %v4377_v1  ;;  %3932 = vmatprep.subr.mxu0 %v4377_v1 }
 0x580   :  { %v5030_v7 = vpop.permute.xlu1 %967 }
 0x581   :  { %vm975_vm7 = vcmp.eq.s32.totalorder %v5030_v7, 1 }
 0x582   :  { %v5036_v8 = vsel %vm975_vm7, %v5028_v6, 0.0  ;;  %3924 = vmatpush3.msk.msra.mxu1 %vm975_vm7, %v5028_v6  ;;  %3933 = vmatpush3.msk.msra.mxu0 %vm975_vm7, %v5028_v6 }
 0x583   :  { %3926 = vmatmul.mubr.msk.f32.vlgmr.msra.gmra.mxu1 %vm6693_vm4, %v5045_v35  ;;  %3935 = vmatmul.mubr.msk.f32.vlgmr.msra.gmra.mxu0 %vm6693_vm4, %v4615_v10 }
 0x584   :  { %3943 = vmatprep.subr.mxu1 %v4377_v1  ;;  %3937 = vmatprep.mubr.msk.f32.mxu0 %vm6763_vm0, %v4377_v1 }
 0x585   :  { %3944 = vmatpush3.msra.mxu1 %v1492_v38  ;;  %3975 = vmatprep.mubr.msk.f32.mxu1 %vm6763_vm0, %v4377_v1 }
 0x586   :  { %3945 = vmatprep.subr.mxu1 %v4377_v1  ;;  %3984 = vmatprep.subr.mxu0 %v4377_v1 }
 0x587   :  { %3946 = vmatpush3.msra.mxu1 %v1491_v12  ;;  %3938 = vmatmul.mubr.msk.f32.gmra.mxu0 %vm6693_vm4, %v4624_v14 }
 0x588   :  { %3947 = vmatprep.subr.mxu1 %v4377_v1  ;;  %3940 = vmatprep.mubr.msk.f32.mxu0 %vm6763_vm0, %v4377_v1 }
 0x589   :  { %3948 = vmatpush3.msra.mxu1 %v1490_v13  ;;  %3985 = vmatpush3.msra.mxu0 %v1476_v18 }
 0x58a   :  { %3949 = vmatprep.subr.mxu1 %v4377_v1  ;;  %3986 = vmatprep.subr.mxu0 %v4377_v1 }
 0x58b   :  { %3950 = vmatpush3.msra.mxu1 %v1489_v20  ;;  %3941 = vmatmul.mubr.msk.f32.gmra.mxu0 %vm6693_vm4, %v4637_v19 }
 0x58c   :  { %3951 = vmatprep.subr.mxu1 %v4377_v1  ;;  %3987 = vmatpush3.msra.mxu0 %v1475_v21 }
 0x58d   :  { %3952 = vmatpush3.msra.mxu1 %v1488_v23  ;;  %3988 = vmatprep.subr.mxu0 %v4377_v1 }
 0x58e   :  { %3953 = vmatprep.subr.mxu1 %v4377_v1  ;;  %3989 = vmatpush3.msra.mxu0 %v1474_v24 }
 0x58f   :  { %3954 = vmatpush3.msra.mxu1 %v1487_v25  ;;  %3990 = vmatprep.subr.mxu0 %v4377_v1 }
 0x590   :  { %3955 = vmatprep.subr.mxu1 %v4377_v1  ;;  %3991 = vmatpush3.msra.mxu0 %v1473_v28 }
 0x591   :  { %3956 = vmatpush3.msra.mxu1 %v1486_v31  ;;  %3992 = vmatprep.subr.mxu0 %v4377_v1 }
 0x592   :  { %3957 = vmatprep.subr.mxu1 %v4377_v1  ;;  %3993 = vmatpush3.msra.mxu0 %v1472_v37 }
 0x593   :  { %3958 = vmatpush3.msra.mxu1 %v1485_v40  ;;  %3994 = vmatprep.subr.mxu0 %v4377_v1 }
 0x594   :  { %3959 = vmatprep.subr.mxu1 %v4377_v1  ;;  %3995 = vmatpush3.msra.mxu0 %v1471_v44 }
 0x595   :  { %3960 = vmatpush3.msra.mxu1 %v1484_v26  ;;  %3996 = vmatprep.subr.mxu0 %v4377_v1 }
 0x596   :  { %3961 = vmatprep.subr.mxu1 %v4377_v1  ;;  %3997 = vmatpush3.msra.mxu0 %v1470_v45 }
 0x597   :  { %3962 = vmatpush3.msra.mxu1 %v1483_v47  ;;  %3998 = vmatprep.subr.mxu0 %v4377_v1 }
 0x598   :  { %3963 = vmatprep.subr.mxu1 %v4377_v1  ;;  %3999 = vmatpush3.msra.mxu0 %v1469_v48 }
 0x599   :  { %3964 = vmatpush3.msra.mxu1 %v1482_v27  ;;  %4000 = vmatprep.subr.mxu0 %v4377_v1 }
 0x59a   :  { %3965 = vmatprep.subr.mxu1 %v4377_v1  ;;  %4001 = vmatpush3.msra.mxu0 %v1468_v53 }
 0x59b   :  { %3966 = vmatpush3.msra.mxu1 %v1481_v51  ;;  %4002 = vmatprep.subr.mxu0 %v4377_v1 }
 0x59c   :  { %3967 = vmatprep.subr.mxu1 %v4377_v1  ;;  %4003 = vmatpush3.msra.mxu0 %v1467_v52 }
 0x59d   :  { %3968 = vmatpush3.msra.mxu1 %v1480_v54  ;;  %4004 = vmatprep.subr.mxu0 %v4377_v1 }
 0x59e   :  { %3969 = vmatprep.subr.mxu1 %v4377_v1  ;;  %4005 = vmatpush3.msra.mxu0 %v1466_v57 }
 0x59f   :  { %3970 = vmatpush3.msra.mxu1 %v1479_v59  ;;  %4006 = vmatprep.subr.mxu0 %v4377_v1 }
 0x5a0   :  { %3971 = vmatprep.subr.mxu1 %v4377_v1  ;;  %4007 = vmatpush3.msra.mxu0 %v1465_v4 }
 0x5a1   :  { %3972 = vmatpush3.msra.mxu1 %v1478_v60  ;;  %4008 = vmatprep.subr.mxu0 %v4377_v1 }
 0x5a2   :  { %3973 = vmatprep.subr.mxu1 %v4377_v1  ;;  %4009 = vmatpush3.msra.mxu0 %v1464_v61 }
 0x5a3   :  { %3974 = vmatpush3.msra.mxu1 %v1477_v2  ;;  %4010 = vmatprep.subr.mxu0 %v4377_v1 }
 0x5a4   :  { %3976 = vmatmul.mubr.msk.f32.vlgmr.msra.gmra.mxu1 %vm975_vm7, %v5028_v6  ;;  %4011 = vmatpush3.msra.mxu0 %v1463_v3 }
 0x5a5   :  { %3978 = vmatprep.mubr.msk.f32.mxu1 %vm6763_vm0, %v4377_v1  ;;  %4012 = vmatprep.subr.mxu0 %v4377_v1 }
 0x5a6   :  { %4016 = vmatprep.mubr.msk.f32.mxu0 %vm6763_vm0, %v4377_v1  ;;  %4025 = vmatprep.subr.mxu1 %v4377_v1 }
 0x5a7   :  { %4013 = vmatpush3.msra.mxu0 %v1462_v11 }
 0x5a8   :  { %3979 = vmatmul.mubr.msk.f32.gmra.mxu1 %vm976_vm8, %v4996_v30  ;;  %4014 = vmatprep.subr.mxu0 %v4377_v1  ;;  %v3489_v30 = vld [vmem:[%s6668_s8 + $0x1] sm:$0x1] }
 0x5a9   :  { %3981 = vmatprep.mubr.msk.f32.mxu1 %vm6763_vm0, %v4377_v1  ;;  %4015 = vmatpush3.msra.mxu0 %v1461_v36  ;;  %v1669_v6 = vmul.f32 %v3489_v30, %v3489_v30 }
 0x5aa   :  { %4034 = vmatprep.subr.mxu0 %v4377_v1 }
 0x5ab   :  { %v1670_v38 = vsel %vm6764_vm10, %v1669_v6, 0.0  ;;  %vm1763_vm10 = vmand %vm6765_vm6, %vm977_vm5 }
 0x5ac   :  { %3982 = vmatmul.mubr.msk.f32.gmra.mxu1 %vm977_vm5, %v4973_v62  ;;  %1671 = vadd.xlane.f32.xlu0 %v1670_v38  ;;  %v1361_v62 = vpop.xlane.xlu0 %1360  ;;  %vm5161_vm3 = vmand %vm1763_vm10, %vm5017_vm11  ;;  %vm6768_vm5 = vcmp.eq.s32.totalorder %v4753_v56, %v4757_v58 }
 0x5ad   :  { %4031 = vmatprep.mubr.msk.f32.mxu1 %vm6763_vm0, %v4377_v1  ;;  %v1448_v12 = vmax.f32 %v1361_v62, 1.0  ;;  %v3488_v62 = vld [vmem:[%s6667_s7 + $0x1] ss:$0 sm:$0xff]  ;;  %vm1762_vm6 = vmand %vm6768_vm5, %vm976_vm8 }
 0x5ae   :  { %vm5179_vm10 = vmand %vm1762_vm6, %vm5017_vm11  ;;  %vm6773_vm6 = vcmp.lt.s32.totalorder %v4517_v22, %v4563_v43 }
 0x5af   :  { %4287 = vrcp.f32 %v1448_v12  ;;  %vm1761_vm8 = vmand %vm6690_vm2, %vm975_vm7 }
 0x5b0   :  { %v1367_v20 = vpop.xlane.xlu0 %1366  ;;  %vm5195_vm5 = vmand %vm1761_vm8, %vm5017_vm11 }
 0x5b1   :  { %v1450_v21 = vmax.f32 %v1367_v20, 1.0 }
 0x5b2   :  { %v1364_v13 = vpop.xlane.xlu1 %1363 }
 0x5b3   :  { %v1449_v18 = vmax.f32 %v1364_v13, 1.0 }
 0x5b5   :  { %4289 = vrcp.f32 %v1449_v18 }
 0x5b6   :  { %4291 = vrcp.f32 %v1450_v21 }
 0x5bc   :  { %v4288_v23 = vpop.eup %4287 }
 0x5c2   :  { %v4290_v40 = vpop.eup %4289 }
 0x5c3   :  { %v4292_v47 = vpop.eup %4291 }
 0x635   :  { %v1672_v2 = vpop.xlane.xlu0 %1671 }
 0x636   :  { %4293 = vrsqrt.f32 %v1672_v2 }
 0x643   :  { %v5116_v24 = vpop.f32.mrf.mxu1  ;;  %v1434_v25 = vpop.f32.mrf.mxu0 }
 0x644   :  { %v1457_v28 = vmul.f32 %v4288_v23, %v1434_v25 }
 0x645   :  { %v3927_v31 = vpop.f32.mrf.mxu1  ;;  %v3936_v37 = vpop.f32.mrf.mxu0 }
 0x646   :  { %4017 = vmatmul.mubr.f32.vlgmr.msra.gmra.mxu0 %v1457_v28  ;;  %v4294_v28 = vpop.eup %4293 }
 0x647   :  { %v1439_v44 = vpop.f32.mrf.mxu0  ;;  %4019 = vmatprep.mubr.msk.f32.mxu0 %vm6763_vm0, %v4377_v1  ;;  %v1674_v37 = vmul.f32 %v4294_v28, %v3489_v30 }
 0x648   :  { %v1458_v26 = vmul.f32 %v4290_v40, %v1439_v44 }
 0x649   :  { %v3939_v45 = vpop.f32.mrf.mxu0 }
 0x64a   :  { %4020 = vmatmul.mubr.f32.gmra.mxu0 %v1458_v26 }
 0x64b   :  { %v1444_v48 = vpop.f32.mrf.mxu0  ;;  %4022 = vmatprep.mubr.msk.f32.mxu0 %vm6763_vm0, %v4377_v1 }
 0x64c   :  { %v1459_v27 = vmul.f32 %v4292_v47, %v1444_v48  ;;  %v6766_v47 = vmov 0 }
 0x64d   :  { %v3942_v53 = vpop.f32.mrf.mxu0  ;;  %v6767_v47 = vsel %vm5161_vm3, 4294967295, %v6766_v47 }
 0x64e   :  { %4023 = vmatmul.mubr.f32.gmra.mxu0 %v1459_v27  ;;  %v3492_v53 = vsel %vm5161_vm3, 1.0, %v4377_v1 }
 0x64f   :  { %4040 = vmatprep.mubr.msk.f32.mxu0 %vm6763_vm0, %v4377_v1 }
 0x664   :  { %v1561_v51 = vpop.f32.mrf.mxu1 }
 0x666   :  { %v3977_v52 = vpop.f32.mrf.mxu1 }
 0x668   :  { %v1566_v54 = vpop.f32.mrf.mxu1 }
 0x66a   :  { %v3980_v57 = vpop.f32.mrf.mxu1 }
 0x66c   :  { %v1571_v59 = vpop.f32.mrf.mxu1 }
 0x66e   :  { %v3983_v4 = vpop.f32.mrf.mxu1 }
 0x706   :  { %v1641_v60 = vpop.f32.mrf.mxu0 }
 0x707   :  { %v1642_v18 = vadd.f32 %v1641_v60, %v1561_v51  ;;  %v1841_v51 = vsel %vm6693_vm4, %v3492_v53, 0.0 }
 0x708   :  { %v4018_v61 = vpop.f32.mrf.mxu0 }
 0x709   :  { %v5135_v23 = vadd.f32 %v3488_v62, %v1642_v18 }
 0x70a   :  { %v1646_v3 = vpop.f32.mrf.mxu0 }
 0x70b   :  { %v1647_v6 = vadd.f32 %v1646_v3, %v1566_v54  ;;  %v1664_v31 = vmax.f32 %v5135_v23, 0.0  ;;  %v3491_v54 = vsel %vm5179_vm10, 1.0, %v4377_v1 }
 0x70c   :  { %v4021_v11 = vpop.f32.mrf.mxu0  ;;  %v1838_v7 = vsel %vm6693_vm4, %v3491_v54, 0.0 }
 0x70d   :  { %v5129_v20 = vadd.f32 %v3488_v62, %v1647_v6 }
 0x70e   :  { %v1651_v36 = vpop.f32.mrf.mxu0 }
 0x70f   :  { %v1652_v38 = vadd.f32 %v1651_v36, %v1571_v59  ;;  %v1665_v25 = vmax.f32 %v5129_v20, 0.0  ;;  %v3490_v59 = vsel %vm5195_vm5, 1.0, %v4377_v1 }
 0x710   :  { %v4024_v12 = vpop.f32.mrf.mxu0  ;;  %v1835_v4 = vsel %vm6693_vm4, %v3490_v59, 0.0 }
 0x711   :  { %v5127_v13 = vadd.f32 %v3488_v62, %v1652_v38  ;;  %v1850_v62 = vadd.f32 %v1838_v7, %v1835_v4 }
 0x713   :  { %v1666_v21 = vmax.f32 %v5127_v13, 0.0 }
 0x715   :  { %4026 = vmatpush3.xpose.msra.mxu1 %v1666_v21 }
 0x716   :  { %4027 = vmatprep.subr.mxu1 %v4377_v1 }
 0x719   :  { %4028 = vmatpush3.xpose.msra.mxu1 %v1665_v25 }
 0x71a   :  { %4029 = vmatprep.subr.mxu1 %v4377_v1 }
 0x71d   :  { %4030 = vmatpush3.xpose.msra.mxu1 %v1664_v31 }
 0x71e   :  { %4043 = vmatprep.subr.mxu1 %v4377_v1 }
 0x720   :  { %4032 = vmatmul.mubr.f32.vlgmr.msra.gmra.mxu1 %v1674_v37  ;;  %v1851_v37 = vadd.f32 %v1850_v62, %v1841_v51 }
 0x721   :  { %4049 = vmatprep.mubr.msk.f32.mxu1 %vm6763_vm0, %v4377_v1  ;;  %vm6774_vm0 = vcmp.lt.s32.totalorder %v4517_v22, %v4553_v39 }
 0x7e0   :  { %v1741_v40 = vpop.f32.mrf.mxu1 }
 0x7e1   :  { %v5153_v44 = vrot.slane %v1741_v40, %v4605_v5 }
 0x7e2   :  { %v4033_v30 = vpop.f32.mrf.mxu1 }
 0x7e3   :  { %v1751_v26 = vmul.f32 %v4721_v17, %v5153_v44  ;;  %v1750_v45 = vmul.f32 %v4724_v42, %v5153_v44  ;;  %v1749_v27 = vmul.f32 %v4730_v46, %v5153_v44 }
 0x7e5   :  { %v1758_v63 = vsel %vm6693_vm4, %v1751_v26, 0.0  ;;  %v1755_v48 = vsel %vm6693_vm4, %v1750_v45, 0.0  ;;  %v1752_v52 = vsel %vm6693_vm4, %v1749_v27, 0.0  ;;  %v1852_v26 = vrot.slane %v1851_v37, 4 }
 0x7e6   :  { %1759 = vadd.xlane.f32.xlu1 %v1758_v63  ;;  %1756 = vadd.xlane.f32.xlu0 %v1755_v48 }
 0x7e7   :  { %v1853_v48 = vadd.f32 %v1852_v26, %v1851_v37 }
 0x7ea   :  { %1842 = vadd.xlane.f32.xlu0 %v1841_v51  ;;  %1753 = vadd.xlane.f32.xlu1 %v1752_v52  ;;  %v1854_v52 = vrot.slane %v1853_v48, 2 }
 0x7ee   :  { %1839 = vadd.xlane.f32.xlu1 %v1838_v7  ;;  %v1855_v7 = vadd.f32 %v1854_v52, %v1853_v48 }
 0x7f2   :  { %1836 = vadd.xlane.f32.xlu1 %v1835_v4 }
 0x86f   :  { %v5204_v60 = vpop.xlane.xlu1 %1759  ;;  %v5206_v61 = vpop.xlane.xlu0 %1756 }
 0x870   :  { %vm1772_vm11 = vcmp.eq.f32.partialorder %v5153_v44, %v5204_v60  ;;  %vm1769_vm7 = vcmp.gt.f32.partialorder %v5153_v44, %v5204_v60  ;;  %vm1771_vm2 = vcmp.eq.f32.partialorder %v5153_v44, %v5206_v61  ;;  %vm1768_vm13 = vcmp.gt.f32.partialorder %v5153_v44, %v5206_v61 }
 0x871   :  { %vm1775_vm8 = vmand %vm1772_vm11, %vm6773_vm6  ;;  %vm6775_vm11 = vcmask 195584   ;;  %4295 = vtanh.f32 %v5204_v60 }
 0x872   :  { %vm1778_vm12 = vmor %vm1769_vm7, %vm1775_vm8  ;;  %4297 = vtanh.f32 %v5206_v61 }
 0x873   :  { %v5212_v32 = vpop.xlane.xlu1 %1753  ;;  %vm1799_vm4 = vmand %vm5161_vm3, %vm1778_vm12  ;;  %vm1781_vm3 = vcmp.gt.f32.partialorder %v5204_v60, %v5153_v44  ;;  %v1843_v27 = vpop.xlane.xlu0 %1842 }
 0x874   :  { %v3495_v2 = vsel %vm1799_vm4, 1.0, %v4377_v1  ;;  %vm1774_vm14 = vmand %vm1771_vm2, %vm6774_vm0  ;;  %vm1770_vm15 = vcmp.eq.f32.partialorder %v5153_v44, %v5212_v32  ;;  %vm1767_vm7 = vcmp.gt.f32.partialorder %v5153_v44, %v5212_v32  ;;  %vm6776_vm4 = vcmp.lt.s32.totalorder %v4517_v22, %v4540_v34 }
 0x875   :  { %v1812_v3 = vsel %vm6775_vm11, %v3495_v2, 0.0  ;;  %vm1777_vm6 = vmor %vm1768_vm13, %vm1774_vm14  ;;  %vm1782_vm14 = vcmp.eq.f32.partialorder %v5212_v32, %v5153_v44  ;;  %v1846_v54 = vmul.f32 0.8, %v1843_v27  ;;  %4299 = vtanh.f32 %v5212_v32 }
 0x876   :  { %1813 = vadd.xlane.f32.xlu0 %v1812_v3  ;;  %vm1798_vm8 = vmand %vm5179_vm10, %vm1777_vm6  ;;  %vm1783_vm6 = vcmp.eq.f32.partialorder %v5206_v61, %v5153_v44 }
 0x877   :  { %v3494_v11 = vsel %vm1798_vm8, 1.0, %v4377_v1  ;;  %vm1773_vm12 = vmand %vm1770_vm15, %vm6776_vm4  ;;  %vm1779_vm15 = vcmp.gt.f32.partialorder %v5212_v32, %v5153_v44  ;;  %vm1784_vm4 = vcmp.eq.f32.partialorder %v5204_v60, %v5153_v44  ;;  %v1840_v53 = vpop.xlane.xlu1 %1839  ;;  %v1849_v59 = vceil.f32 %v1846_v54 }
 0x878   :  { %vm1776_vm2 = vmor %vm1767_vm7, %vm1773_vm12  ;;  %vm6779_vm7 = vcmp.lt.s32.totalorder %v4540_v34, %v4517_v22  ;;  %vm1780_vm12 = vcmp.gt.f32.partialorder %v5206_v61, %v5153_v44  ;;  %v1845_v51 = vmul.f32 0.8, %v1840_v53  ;;  %v6796_v53 = vmov 0 }
 0x879   :  { %vm6777_vm0 = vmmov %vm6775_vm11 }
 0x87a   :  { %v1809_v36 = vsel %vm6777_vm0, %v3494_v11, 0.0  ;;  %vm1797_vm11 = vmand %vm5195_vm5, %vm1776_vm2  ;;  %vm6780_vm2 = vcmp.lt.s32.totalorder %v4553_v39, %v4517_v22  ;;  %v6787_v11 = vmov 0 }
 0x87b   :  { %1810 = vadd.xlane.f32.xlu0 %v1809_v36  ;;  %v3493_v6 = vsel %vm1797_vm11, 1.0, %v4377_v1  ;;  %vm6778_vm13 = vmmov %vm6777_vm0  ;;  %v1837_v57 = vpop.xlane.xlu1 %1836  ;;  %v1856_v36 = vrot.slane %v1855_v7, 1 }
 0x87c   :  { %v1806_v38 = vsel %vm6778_vm13, %v3493_v6, 0.0  ;;  %vm1785_vm8 = vmand %vm1782_vm14, %vm6779_vm7  ;;  %vm6781_vm13 = vcmp.lt.s32.totalorder %v4563_v43, %v4517_v22  ;;  %v1844_v2 = vmul.f32 0.8, %v1837_v57  ;;  %v1848_v6 = vceil.f32 %v1845_v51 }
 0x87d   :  { %1807 = vadd.xlane.f32.xlu1 %v1806_v38  ;;  %vm1786_vm0 = vmand %vm1783_vm6, %vm6780_vm2  ;;  %vm6782_vm6 = vnez %v6767_v47 }
 0x87e   :  { %vm1788_vm11 = vmor %vm1779_vm15, %vm1785_vm8  ;;  %vm6783_vm8 = vcmask 195584   ;;  %v4296_v51 = vpop.eup %4295 }
 0x87f   :  { %vm1787_vm1 = vmand %vm1784_vm4, %vm6781_vm13  ;;  %vm6792_vm13 = vnez %v6757_v49 }
 0x880   :  { %vm1789_vm9 = vmor %vm1780_vm12, %vm1786_vm0  ;;  %vm6789_vm12 = vnez %v6754_v41 }
 0x881   :  { %vm1815_vm14 = vmand %vm5195_vm5, %vm1788_vm11 }
 0x882   :  { %vm1816_vm7 = vmand %vm5179_vm10, %vm1789_vm9  ;;  %v3496_v12 = vsel %vm1815_vm14, 1.0, %v4377_v1 }
 0x883   :  { %vm1790_vm2 = vmor %vm1781_vm3, %vm1787_vm1  ;;  %v3497_v18 = vsel %vm1816_vm7, 1.0, %v4377_v1  ;;  %v1824_v28 = vsel %vm6783_vm8, %v3496_v12, 0.0  ;;  %vm6786_vm1 = vnez %v6751_v29  ;;  %v1847_v12 = vceil.f32 %v1844_v2 }
 0x884   :  { %vm1817_vm15 = vmand %vm6782_vm6, %vm1790_vm2  ;;  %vm6795_vm2 = vnez %v6760_v50 }
 0x885   :  { %vm6784_vm4 = vmmov %vm6783_vm8  ;;  %v3498_v44 = vsel %vm1817_vm15, 1.0, %v4377_v1 }
 0x886   :  { %v1825_v40 = vsel %vm6784_vm4, %v3497_v18, 0.0  ;;  %vm6785_vm5 = vmmov %vm6784_vm4 }
 0x887   :  { %v1826_v30 = vadd.f32 %v1825_v40, %v1824_v28  ;;  %v1827_v45 = vsel %vm6785_vm5, %v3498_v44, 0.0  ;;  %v6790_v28 = vmov 0  ;;  %v1857_v40 = vadd.f32 %v1856_v36, %v1855_v7  ;;  %vm6798_vm15 = vmmov %vm6784_vm4 }
 0x888   :  { %vm6799_vm8 = vmmov %vm6784_vm4 }
 0x889   :  { %v1828_v63 = vadd.f32 %v1827_v45, %v1826_v30  ;;  %v6793_v30 = vmov 0  ;;  %v1858_v45 = vmul.f32 0.8, %v1857_v40  ;;  %v2361_v40 = vld [vmem:[#allocation6 + $0x270] sm:$0xff] }
 0x88b   :  { %v1829_v33 = vrot.slane %v1828_v63, 4  ;;  %v1859_v27 = vceil.f32 %v1858_v45  ;;  %v2359_v45 = vld [vmem:[#allocation6 + $0x260] sm:$0xff] }
 0x88d   :  { %v1830_v47 = vadd.f32 %v1829_v33, %v1828_v63 }
 0x88f   :  { %v1831_v3 = vrot.slane %v1830_v47, 2 }
 0x891   :  { %v1832_v18 = vadd.f32 %v1831_v3, %v1830_v47  ;;  %v5328_v3 = vmul.f32 %v4296_v51, %v1666_v21  ;;  %v2366_v51 = vld [vmem:[#allocation6 + $0x298] sm:$0xff] }
 0x893   :  { %v1833_v26 = vrot.slane %v1832_v18, 1 }
 0x895   :  { %v1834_v48 = vadd.f32 %v1833_v26, %v1832_v18  ;;  %v2376_v18 = vld [vmem:[#allocation6 + $0x2e8] sm:$0xff] }
 0x896   :  { %v2360_v26 = vld [vmem:[#allocation6 + $0x268] sm:$0xff] }
 0x897   :  { %vm1866_vm7 = vcmp.lt.f32.partialorder %v1834_v48, %v1859_v27  ;;  %v2358_v48 = vld [vmem:[#allocation6 + $0x258] sm:$0xff]  ;;  %v2357_v27 = vld [vmem:[#allocation6 + $0x250] sm:$0xff] }
 0x898   :  { %vm5305_vm6 = vmand %vm6795_vm2, %vm1866_vm7 }
 0x899   :  { %v6797_v53 = vsel %vm5305_vm6, 4294967295, %v6796_v53  ;;  %v3504_v33 = vsel %vm5305_vm6, 1.0, %v4377_v1 }
 0x89a   :  { %v2240_v52 = vrot.slane %v3504_v33, %v4605_v5  ;;  %v2370_v33 = vld [vmem:[#allocation6 + $0x2b8] sm:$0xff] }
 0x89c   :  { %v2242_v54 = vmul.f32 %v2240_v52, %v4615_v10  ;;  %v2244_v57 = vmul.f32 %v2240_v52, %v4637_v19  ;;  %v2243_v50 = vmul.f32 %v2240_v52, %v4624_v14  ;;  %v2356_v52 = vld [vmem:[#allocation6 + $0x248] sm:$0xff] }
 0x89e   :  { %v2245_v47 = vsel %vm6798_vm15, %v2242_v54, 0.0  ;;  %v2251_v7 = vsel %vm6799_vm8, %v2244_v57, 0.0  ;;  %vm6803_vm15 = vmmov %vm6784_vm4  ;;  %v2369_v54 = vld [vmem:[#allocation6 + $0x2b0] sm:$0xff]  ;;  %v2368_v57 = vld [vmem:[#allocation6 + $0x2a8] sm:$0xff] }
 0x89f   :  { %vm6804_vm8 = vmmov %vm6784_vm4 }
 0x8ff   :  { %v1814_v4 = vpop.xlane.xlu0 %1813 }
 0x900   :  { %vm1862_vm9 = vcmp.lt.f32.partialorder %v1814_v4, %v1849_v59  ;;  %v2248_v59 = vsel %vm6784_vm4, %v2243_v50, 0.0  ;;  %v1892_v4 = vsel %vm5305_vm6, 1, %v4376_v0  ;;  %vm6805_vm4 = vmmov 0   ;;  %v2367_v50 = vld [vmem:[#allocation6 + $0x2a0] sm:$0xff] }
 0x901   :  { %vm5278_vm3 = vmand %vm6786_vm1, %vm1862_vm9  ;;  %v1896_v2 = vrot.slane %v1892_v4, %v4605_v5  ;;  %v2352_v4 = vld [vmem:[#allocation6 + $0x228] sm:$0xff]  ;;  %vm6824_vm6 = vcmp.lt.s32.totalorder %v4517_v22, %v4553_v39 }
 0x902   :  { %v6788_v11 = vsel %vm5278_vm3, 4294967295, %v6787_v11  ;;  %v1876_v38 = vsel %vm5278_vm3, 1, %v4376_v0 }
 0x903   :  { %1884 = vperm.xlu0 %4271, %v1876_v38   ;;  %vm5352_vm9 = vcmp.eq.s32.totalorder %v1896_v2, 1  ;;  %v2365_v2 = vld [vmem:[#allocation6 + $0x290] sm:$0xff] }
 0x904   :  { %v1811_v62 = vpop.xlane.xlu0 %1810 }
 0x905   :  { %vm1861_vm10 = vcmp.lt.f32.partialorder %v1811_v62, %v1848_v6  ;;  %v4298_v6 = vpop.eup %4297 }
 0x906   :  { %vm5287_vm0 = vmand %vm6789_vm12, %vm1861_vm10  ;;  %v1808_v37 = vpop.xlane.xlu1 %1807  ;;  %v5348_v13 = vmul.f32 %v4298_v6, %v1665_v25  ;;  %v4300_v32 = vpop.eup %4299  ;;  %v2351_v6 = vld [vmem:[#allocation6 + $0x220] sm:$0xff] }
 0x907   :  { %v6791_v28 = vsel %vm5287_vm0, 4294967295, %v6790_v28  ;;  %vm1860_vm11 = vcmp.lt.f32.partialorder %v1808_v37, %v1847_v12  ;;  %v1875_v44 = vsel %vm5287_vm0, 1, %v4376_v0  ;;  %v5377_v20 = vmul.f32 %v4300_v32, %v1664_v31  ;;  %v2378_v31 = vld [vmem:[#allocation6 + $0x2f8] sm:$0xff]  ;;  %v2377_v12 = vld [vmem:[#allocation6 + $0x2f0] sm:$0xff]  ;;  %v2364_v32 = vld [vmem:[#allocation6 + $0x288] sm:$0xff] }
 0x908   :  { %vm5296_vm14 = vmand %vm6792_vm13, %vm1860_vm11  ;;  %1881 = vperm.xlu1 %4272, %v1875_v44   ;;  %vm6802_vm11 = vcmp.eq.s32.totalorder %v4540_v34, %v4757_v58  ;;  %v2362_v37 = vld [vmem:[#allocation6 + $0x278] sm:$0xff] }
 0x909   :  { %v6794_v30 = vsel %vm5296_vm14, 4294967295, %v6793_v30  ;;  %v1874_v63 = vsel %vm5296_vm14, 1, %v4376_v0  ;;  %vm1898_vm7 = vmand %vm6802_vm11, %vm5352_vm9  ;;  %v2374_v44 = vld [vmem:[#allocation6 + $0x2d8] sm:$0xff] }
 0x90a   :  { %v5394_v23 = vsel %vm1898_vm7, 1.0, %v4377_v1  ;;  %vm6806_vm11 = vmmov %vm6804_vm8 }
 0x90b   :  { %vm6807_vm7 = vmmov %vm6804_vm8 }
 0x90c   :  { %1878 = vperm.xlu1 %4272, %v1874_v63   ;;  %v2372_v63 = vld [vmem:[#allocation6 + $0x2c8] sm:$0xff] }
 0x922   :  { %2246 = vadd.xlane.f32.xlu0 %v2245_v47  ;;  %v2355_v47 = vld [vmem:[#allocation6 + $0x240] sm:$0xff] }
 0x926   :  { %2252 = vadd.xlane.f32.xlu0 %v2251_v7  ;;  %v2354_v7 = vld [vmem:[#allocation6 + $0x238] sm:$0xff] }
 0x930   :  { %2249 = vadd.xlane.f32.xlu1 %v2248_v59  ;;  %v2353_v59 = vld [vmem:[#allocation6 + $0x230] sm:$0xff] }
 0x97e   :  { %v5330_v36 = vpop.permute.xlu0 %1884 }
 0x97f   :  { %vm1888_vm5 = vcmp.eq.s32.totalorder %v5330_v36, 1 }
 0x980   :  { %v5336_v60 = vsel %vm1888_vm5, %v5328_v3, 0.0  ;;  %4035 = vmatpush3.msk.msra.mxu0 %vm1888_vm5, %v5328_v3  ;;  %4044 = vmatpush3.msk.msra.mxu1 %vm1888_vm5, %v5328_v3 }
 0x981   :  { %4036 = vmatprep.subr.mxu0 %v4377_v1  ;;  %4045 = vmatprep.subr.mxu1 %v4377_v1 }
 0x983   :  { %v5350_v21 = vpop.permute.xlu1 %1881 }
 0x984   :  { %vm1887_vm10 = vcmp.eq.s32.totalorder %v5350_v21, 1 }
 0x985   :  { %v5360_v38 = vsel %vm1887_vm10, %v5348_v13, 0.0  ;;  %4037 = vmatpush3.msk.msra.mxu0 %vm1887_vm10, %v5348_v13  ;;  %4046 = vmatpush3.msk.msra.mxu1 %vm1887_vm10, %v5348_v13 }
 0x986   :  { %4038 = vmatprep.subr.mxu0 %v4377_v1  ;;  %4047 = vmatprep.subr.mxu1 %v4377_v1 }
 0x987   :  { %v5379_v25 = vpop.permute.xlu1 %1878 }
 0x988   :  { %vm6703_vm2 = vcmp.eq.s32.totalorder %v5379_v25, 1 }
 0x989   :  { %v5385_v62 = vsel %vm6703_vm2, %v5377_v20, 0.0  ;;  %4039 = vmatpush3.msk.msra.mxu0 %vm6703_vm2, %v5377_v20  ;;  %4048 = vmatpush3.msk.msra.mxu1 %vm6703_vm2, %v5377_v20 }
 0x98a   :  { %4041 = vmatmul.mubr.msk.f32.vlgmr.msra.gmra.mxu0 %vm6803_vm15, %v5394_v23  ;;  %4050 = vmatmul.mubr.msk.f32.vlgmr.msra.gmra.mxu1 %vm6804_vm8, %v4615_v10  ;;  %v2375_v10 = vld [vmem:[#allocation6 + $0x2e0] sm:$0xff]  ;;  %vm6808_vm15 = vcmask 1040384   ;;  %vm6809_vm8 = vcmp.eq.s32.totalorder %v4751_v55, %v4757_v58 }
 0x98b   :  { %4058 = vmatprep.subr.mxu0 %v4377_v1  ;;  %4052 = vmatprep.mubr.msk.f32.mxu1 %vm6805_vm4, %v4377_v1 }
 0x98c   :  { %4059 = vmatpush3.msra.mxu0 %v2378_v31  ;;  %4090 = vmatprep.mubr.msk.f32.mxu0 %vm6805_vm4, %v4377_v1  ;;  %v2350_v31 = vld [vmem:[#allocation6 + $0x218] sm:$0xff] }
 0x98d   :  { %4060 = vmatprep.subr.mxu0 %v4377_v1  ;;  %4099 = vmatprep.subr.mxu1 %v4377_v1 }
 0x98e   :  { %4061 = vmatpush3.msra.mxu0 %v2377_v12  ;;  %4053 = vmatmul.mubr.msk.f32.gmra.mxu1 %vm6806_vm11, %v4624_v14  ;;  %v2373_v14 = vld [vmem:[#allocation6 + $0x2d0] sm:$0xff]  ;;  %v2363_v12 = vld [vmem:[#allocation6 + $0x280] sm:$0xff]  ;;  %vm2649_vm11 = vmand %vm6809_vm8, %vm1888_vm5  ;;  %vm6813_vm8 = vcmask 195584  }
 0x98f   :  { %4062 = vmatprep.subr.mxu0 %v4377_v1  ;;  %4055 = vmatprep.mubr.msk.f32.mxu1 %vm6805_vm4, %v4377_v1 }
 0x990   :  { %4063 = vmatpush3.msra.mxu0 %v2376_v18  ;;  %4100 = vmatpush3.msra.mxu1 %v2362_v37  ;;  %v2349_v18 = vld [vmem:[#allocation6 + $0x210] sm:$0xff]  ;;  %v2347_v37 = vld [vmem:[#allocation6 + $0x200] sm:$0xff] }
 0x991   :  { %4064 = vmatprep.subr.mxu0 %v4377_v1  ;;  %4101 = vmatprep.subr.mxu1 %v4377_v1 }
 0x992   :  { %4065 = vmatpush3.msra.mxu0 %v2375_v10  ;;  %4056 = vmatmul.mubr.msk.f32.gmra.mxu1 %vm6807_vm7, %v4637_v19  ;;  %v2371_v19 = vld [vmem:[#allocation6 + $0x2c0] sm:$0xff]  ;;  %vm5510_vm7 = vmand %vm2649_vm11, %vm5352_vm9 }
 0x993   :  { %4066 = vmatprep.subr.mxu0 %v4377_v1  ;;  %4102 = vmatpush3.msra.mxu1 %v2361_v40 }
 0x994   :  { %4067 = vmatpush3.msra.mxu0 %v2374_v44  ;;  %4103 = vmatprep.subr.mxu1 %v4377_v1 }
 0x995   :  { %4068 = vmatprep.subr.mxu0 %v4377_v1  ;;  %4104 = vmatpush3.msra.mxu1 %v2360_v26 }
 0x996   :  { %4069 = vmatpush3.msra.mxu0 %v2373_v14  ;;  %4105 = vmatprep.subr.mxu1 %v4377_v1 }
 0x997   :  { %4070 = vmatprep.subr.mxu0 %v4377_v1  ;;  %4106 = vmatpush3.msra.mxu1 %v2359_v45 }
 0x998   :  { %4071 = vmatpush3.msra.mxu0 %v2372_v63  ;;  %4107 = vmatprep.subr.mxu1 %v4377_v1 }
 0x999   :  { %4072 = vmatprep.subr.mxu0 %v4377_v1  ;;  %4108 = vmatpush3.msra.mxu1 %v2358_v48 }
 0x99a   :  { %4073 = vmatpush3.msra.mxu0 %v2371_v19  ;;  %4109 = vmatprep.subr.mxu1 %v4377_v1 }
 0x99b   :  { %4074 = vmatprep.subr.mxu0 %v4377_v1  ;;  %4110 = vmatpush3.msra.mxu1 %v2357_v27 }
 0x99c   :  { %4075 = vmatpush3.msra.mxu0 %v2370_v33  ;;  %4111 = vmatprep.subr.mxu1 %v4377_v1 }
 0x99d   :  { %4076 = vmatprep.subr.mxu0 %v4377_v1  ;;  %4112 = vmatpush3.msra.mxu1 %v2356_v52 }
 0x99e   :  { %4077 = vmatpush3.msra.mxu0 %v2369_v54  ;;  %4113 = vmatprep.subr.mxu1 %v4377_v1 }
 0x99f   :  { %4078 = vmatprep.subr.mxu0 %v4377_v1  ;;  %4114 = vmatpush3.msra.mxu1 %v2355_v47 }
 0x9a0   :  { %4079 = vmatpush3.msra.mxu0 %v2368_v57  ;;  %4115 = vmatprep.subr.mxu1 %v4377_v1 }
 0x9a1   :  { %4080 = vmatprep.subr.mxu0 %v4377_v1  ;;  %4116 = vmatpush3.msra.mxu1 %v2354_v7 }
 0x9a2   :  { %4081 = vmatpush3.msra.mxu0 %v2367_v50  ;;  %4117 = vmatprep.subr.mxu1 %v4377_v1 }
 0x9a3   :  { %4082 = vmatprep.subr.mxu0 %v4377_v1  ;;  %4118 = vmatpush3.msra.mxu1 %v2353_v59 }
 0x9a4   :  { %4083 = vmatpush3.msra.mxu0 %v2366_v51  ;;  %4119 = vmatprep.subr.mxu1 %v4377_v1 }
 0x9a5   :  { %4084 = vmatprep.subr.mxu0 %v4377_v1  ;;  %4120 = vmatpush3.msra.mxu1 %v2352_v4 }
 0x9a6   :  { %4085 = vmatpush3.msra.mxu0 %v2365_v2  ;;  %4121 = vmatprep.subr.mxu1 %v4377_v1 }
 0x9a7   :  { %4086 = vmatprep.subr.mxu0 %v4377_v1  ;;  %4122 = vmatpush3.msra.mxu1 %v2351_v6 }
 0x9a8   :  { %4087 = vmatpush3.msra.mxu0 %v2364_v32  ;;  %4123 = vmatprep.subr.mxu1 %v4377_v1 }
 0x9a9   :  { %4088 = vmatprep.subr.mxu0 %v4377_v1  ;;  %4124 = vmatpush3.msra.mxu1 %v2350_v31 }
 0x9aa   :  { %4089 = vmatpush3.msra.mxu0 %v2363_v12  ;;  %4125 = vmatprep.subr.mxu1 %v4377_v1 }
 0x9ab   :  { %4091 = vmatmul.mubr.msk.f32.vlgmr.msra.gmra.mxu0 %vm6703_vm2, %v5377_v20  ;;  %4126 = vmatpush3.msra.mxu1 %v2349_v18  ;;  %v2348_v20 = vld [vmem:[#allocation6 + $0x208] sm:$0xff]  ;;  %vm6814_vm2 = vmmov %vm6813_vm8 }
 0x9ac   :  { %4093 = vmatprep.mubr.msk.f32.mxu0 %vm6805_vm4, %v4377_v1  ;;  %4127 = vmatprep.subr.mxu1 %v4377_v1 }
 0x9ad   :  { %4131 = vmatprep.mubr.msk.f32.mxu1 %vm6805_vm4, %v4377_v1  ;;  %4140 = vmatprep.subr.mxu0 %v4377_v1 }
 0x9ae   :  { %4128 = vmatpush3.msra.mxu1 %v2348_v20 }
 0x9af   :  { %4094 = vmatmul.mubr.msk.f32.gmra.mxu0 %vm1887_vm10, %v5348_v13  ;;  %4129 = vmatprep.subr.mxu1 %v4377_v1  ;;  %v3516_v13 = vld [vmem:[%s6668_s8 + $0x2] sm:$0x1] }
 0x9b0   :  { %4096 = vmatprep.mubr.msk.f32.mxu0 %vm6805_vm4, %v4377_v1  ;;  %4130 = vmatpush3.msra.mxu1 %v2347_v37  ;;  %v2555_v10 = vmul.f32 %v3516_v13, %v3516_v13 }
 0x9b1   :  { %4149 = vmatprep.subr.mxu1 %v4377_v1 }
 0x9b2   :  { %v2556_v40 = vsel %vm6808_vm15, %v2555_v10, 0.0 }
 0x9b3   :  { %4097 = vmatmul.mubr.msk.f32.gmra.mxu0 %vm1888_vm5, %v5328_v3  ;;  %2557 = vadd.xlane.f32.xlu0 %v2556_v40  ;;  %v2247_v3 = vpop.xlane.xlu0 %2246  ;;  %vm6812_vm5 = vcmp.eq.s32.totalorder %v4753_v56, %v4757_v58 }
 0x9b4   :  { %4146 = vmatprep.mubr.msk.f32.mxu0 %vm6805_vm4, %v4377_v1  ;;  %v2334_v44 = vmax.f32 %v2247_v3, 1.0  ;;  %vm2648_vm15 = vmand %vm6812_vm5, %vm1887_vm10  ;;  %vm6817_vm10 = vcmp.eq.s32.totalorder %v5379_v25, 1 }
 0x9b5   :  { %vm5528_vm11 = vmand %vm2648_vm15, %vm5352_vm9 }
 0x9b6   :  { %4301 = vrcp.f32 %v2334_v44 }
 0x9b7   :  { %v2253_v45 = vpop.xlane.xlu0 %2252 }
 0x9b8   :  { %v2336_v63 = vmax.f32 %v2253_v45, 1.0 }
 0x9b9   :  { %v2250_v26 = vpop.xlane.xlu1 %2249 }
 0x9ba   :  { %v2335_v14 = vmax.f32 %v2250_v26, 1.0 }
 0x9bc   :  { %4303 = vrcp.f32 %v2335_v14 }
 0x9bd   :  { %4305 = vrcp.f32 %v2336_v63  ;;  %v3515_v63 = vld [vmem:[%s6667_s7 + $0x2] ss:$0 sm:$0xff] }
 0x9c3   :  { %v4302_v48 = vpop.eup %4301 }
 0x9c9   :  { %v4304_v47 = vpop.eup %4303 }
 0x9ca   :  { %v4306_v59 = vpop.eup %4305 }
 0xa3c   :  { %v2558_v40 = vpop.xlane.xlu0 %2557 }
 0xa3d   :  { %4307 = vrsqrt.f32 %v2558_v40 }
 0xa4a   :  { %v5465_v19 = vpop.f32.mrf.mxu0  ;;  %v2320_v27 = vpop.f32.mrf.mxu1 }
 0xa4b   :  { %v2343_v33 = vmul.f32 %v4302_v48, %v2320_v27 }
 0xa4c   :  { %v4042_v52 = vpop.f32.mrf.mxu0  ;;  %v4051_v54 = vpop.f32.mrf.mxu1 }
 0xa4d   :  { %4132 = vmatmul.mubr.f32.vlgmr.msra.gmra.mxu1 %v2343_v33 }
 0xa4e   :  { %v2325_v57 = vpop.f32.mrf.mxu1  ;;  %4134 = vmatprep.mubr.msk.f32.mxu1 %vm6805_vm4, %v4377_v1 }
 0xa4f   :  { %v2344_v7 = vmul.f32 %v4304_v47, %v2325_v57 }
 0xa50   :  { %v4054_v50 = vpop.f32.mrf.mxu1 }
 0xa51   :  { %4135 = vmatmul.mubr.f32.gmra.mxu1 %v2344_v7  ;;  %v4308_v7 = vpop.eup %4307 }
 0xa52   :  { %v2330_v51 = vpop.f32.mrf.mxu1  ;;  %4137 = vmatprep.mubr.msk.f32.mxu1 %vm6805_vm4, %v4377_v1 }
 0xa53   :  { %v2345_v4 = vmul.f32 %v4306_v59, %v2330_v51  ;;  %v2560_v59 = vmul.f32 %v4308_v7, %v3516_v13 }
 0xa54   :  { %v4057_v2 = vpop.f32.mrf.mxu1 }
 0xa55   :  { %4138 = vmatmul.mubr.f32.gmra.mxu1 %v2345_v4 }
 0xa56   :  { %4155 = vmatprep.mubr.msk.f32.mxu1 %vm6805_vm4, %v4377_v1 }
 0xa6b   :  { %v2447_v6 = vpop.f32.mrf.mxu0 }
 0xa6d   :  { %v4092_v32 = vpop.f32.mrf.mxu0 }
 0xa6e   :  { %v6810_v32 = vmov 0 }
 0xa6f   :  { %v2452_v31 = vpop.f32.mrf.mxu0  ;;  %v6811_v32 = vsel %vm5510_vm7, 4294967295, %v6810_v32 }
 0xa71   :  { %v4095_v12 = vpop.f32.mrf.mxu0 }
 0xa73   :  { %v2457_v18 = vpop.f32.mrf.mxu0 }
 0xa75   :  { %v4098_v20 = vpop.f32.mrf.mxu0 }
 0xb0d   :  { %v2527_v37 = vpop.f32.mrf.mxu1 }
 0xb0e   :  { %v2528_v33 = vadd.f32 %v2527_v37, %v2447_v6 }
 0xb0f   :  { %v4133_v10 = vpop.f32.mrf.mxu1 }
 0xb10   :  { %v5484_v47 = vadd.f32 %v3515_v63, %v2528_v33 }
 0xb11   :  { %v2532_v3 = vpop.f32.mrf.mxu1 }
 0xb12   :  { %v2533_v14 = vadd.f32 %v2532_v3, %v2452_v31  ;;  %v2550_v50 = vmax.f32 %v5484_v47, 0.0  ;;  %v3518_v31 = vsel %vm5528_vm11, 1.0, %v4377_v1 }
 0xb13   :  { %v4136_v44 = vpop.f32.mrf.mxu1 }
 0xb14   :  { %v5478_v52 = vadd.f32 %v3515_v63, %v2533_v14 }
 0xb15   :  { %v2537_v26 = vpop.f32.mrf.mxu1 }
 0xb16   :  { %v2538_v45 = vadd.f32 %v2537_v26, %v2457_v18  ;;  %v2551_v57 = vmax.f32 %v5478_v52, 0.0 }
 0xb17   :  { %v4139_v48 = vpop.f32.mrf.mxu1 }
 0xb18   :  { %v5476_v27 = vadd.f32 %v3515_v63, %v2538_v45  ;;  %v5598_v45 = vld [vmem:[%s6661_s1 + $0x8] sm:$0xff] }
 0xb1a   :  { %v2552_v54 = vmax.f32 %v5476_v27, 0.0 }
 0xb1c   :  { %4141 = vmatpush3.xpose.msra.mxu0 %v2552_v54 }
 0xb1d   :  { %4142 = vmatprep.subr.mxu0 %v4377_v1 }
 0xb20   :  { %4143 = vmatpush3.xpose.msra.mxu0 %v2551_v57 }
 0xb21   :  { %4144 = vmatprep.subr.mxu0 %v4377_v1 }
 0xb24   :  { %4145 = vmatpush3.xpose.msra.mxu0 %v2550_v50 }
 0xb25   :  { %4158 = vmatprep.subr.mxu0 %v4377_v1 }
 0xb27   :  { %4147 = vmatmul.mubr.f32.vlgmr.msra.gmra.mxu0 %v2560_v59 }
 0xb28   :  { %4190 = vmatprep.mubr.msk.f32.mxu0 %vm6805_vm4, %v4377_v1  ;;  %vm6819_vm4 = vmmov %vm6813_vm8 }
 0xb29   :  { %vm6822_vm13 = vmmov %vm6819_vm4 }
 0xbe7   :  { %v2627_v51 = vpop.f32.mrf.mxu0 }
 0xbe8   :  { %v5502_v4 = vrot.slane %v2627_v51, %v4605_v5 }
 0xbe9   :  { %v4148_v13 = vpop.f32.mrf.mxu0 }
 0xbea   :  { %v2637_v2 = vmul.f32 %v4721_v17, %v5502_v4  ;;  %v2636_v6 = vmul.f32 %v4724_v42, %v5502_v4  ;;  %v2635_v17 = vmul.f32 %v4730_v46, %v5502_v4  ;;  %v3519_v42 = vsel %vm5510_vm7, 1.0, %v4377_v1 }
 0xbeb   :  { %v5538_v46 = vsel %vm6813_vm8, %v3519_v42, 0.0 }
 0xbec   :  { %v2644_v55 = vsel %vm6813_vm8, %v2637_v2, 0.0  ;;  %v2641_v36 = vsel %vm6814_vm2, %v2636_v6, 0.0  ;;  %vm6818_vm2 = vcmp.eq.s32.totalorder %v4853_v16, %v4757_v58  ;;  %v2638_v56 = vsel %vm6819_vm4, %v2635_v17, 0.0 }
 0xbed   :  { %2645 = vadd.xlane.f32.xlu1 %v2644_v55  ;;  %2642 = vadd.xlane.f32.xlu0 %v2641_v36  ;;  %vm2647_vm5 = vmand %vm6818_vm2, %vm6817_vm10  ;;  %v2724_v16 = vsel %vm6822_vm13, %v3518_v31, 0.0  ;;  %vm6823_vm13 = vcmp.lt.s32.totalorder %v4517_v22, %v4563_v43 }
 0xbee   :  { %vm5547_vm15 = vmand %vm2647_vm5, %vm5352_vm9 }
 0xbef   :  { %v3517_v12 = vsel %vm5547_vm15, 1.0, %v4377_v1 }
 0xbf0   :  { %v2721_v18 = vsel %vm6819_vm4, %v3517_v12, 0.0 }
 0xbf1   :  { %2728 = vadd.xlane.f32.xlu0 %v5538_v46  ;;  %2639 = vadd.xlane.f32.xlu1 %v2638_v56  ;;  %v2736_v7 = vadd.f32 %v2724_v16, %v2721_v18 }
 0xbf5   :  { %2725 = vadd.xlane.f32.xlu1 %v2724_v16 }
 0xbf9   :  { %2722 = vadd.xlane.f32.xlu1 %v2721_v18 }
 0xc76   :  { %v5556_v20 = vpop.xlane.xlu1 %2645  ;;  %v5558_v37 = vpop.xlane.xlu0 %2642 }
 0xc77   :  { %vm2658_vm9 = vcmp.eq.f32.partialorder %v5502_v4, %v5556_v20  ;;  %vm2655_vm10 = vcmp.gt.f32.partialorder %v5502_v4, %v5556_v20  ;;  %vm2657_vm5 = vcmp.eq.f32.partialorder %v5502_v4, %v5558_v37  ;;  %vm2654_vm4 = vcmp.gt.f32.partialorder %v5502_v4, %v5558_v37 }
 0xc78   :  { %vm2661_vm2 = vmand %vm2658_vm9, %vm6823_vm13  ;;  %vm6825_vm9 = vcmask 195584   ;;  %4309 = vtanh.f32 %v5556_v20 }
 0xc79   :  { %vm2664_vm8 = vmor %vm2655_vm10, %vm2661_vm2  ;;  %4311 = vtanh.f32 %v5558_v37 }
 0xc7a   :  { %v5564_v61 = vpop.xlane.xlu1 %2639  ;;  %vm2685_vm1 = vmand %vm5510_vm7, %vm2664_vm8  ;;  %vm2667_vm7 = vcmp.gt.f32.partialorder %v5556_v20, %v5502_v4  ;;  %v2729_v55 = vpop.xlane.xlu0 %2728 }
 0xc7b   :  { %v3522_v10 = vsel %vm2685_vm1, 1.0, %v4377_v1  ;;  %vm2660_vm14 = vmand %vm2657_vm5, %vm6824_vm6  ;;  %vm2656_vm0 = vcmp.eq.f32.partialorder %v5502_v4, %v5564_v61  ;;  %vm2653_vm10 = vcmp.gt.f32.partialorder %v5502_v4, %v5564_v61  ;;  %vm6826_vm1 = vcmp.lt.s32.totalorder %v4517_v22, %v4540_v34 }
 0xc7c   :  { %v2698_v40 = vsel %vm6825_vm9, %v3522_v10, 0.0  ;;  %vm2663_vm13 = vmor %vm2654_vm4, %vm2660_vm14  ;;  %vm6712_vm4 = vcmp.eq.s32.totalorder %v5598_v45, 0  ;;  %v2732_v21 = vmul.f32 0.8, %v2729_v55  ;;  %4313 = vtanh.f32 %v5564_v61 }
 0xc7d   :  { %2699 = vadd.xlane.f32.xlu0 %v2698_v40  ;;  %vm2684_vm2 = vmand %vm5528_vm11, %vm2663_vm13  ;;  %vm6711_vm13 = vcmp.eq.s32.totalorder %v5598_v45, 1 }
 0xc7e   :  { %v3521_v3 = vsel %vm2684_vm2, 1.0, %v4377_v1  ;;  %vm2659_vm8 = vmand %vm2656_vm0, %vm6826_vm1  ;;  %vm6710_vm2 = vcmp.eq.s32.totalorder %v5598_v45, 2  ;;  %v2726_v36 = vpop.xlane.xlu1 %2725  ;;  %v2735_v25 = vceil.f32 %v2732_v21 }
 0xc7f   :  { %vm2662_vm6 = vmor %vm2653_vm10, %vm2659_vm8  ;;  %vm2668_vm8 = vcmp.eq.f32.partialorder %v5564_v61, %v5502_v4  ;;  %v2731_v16 = vmul.f32 0.8, %v2726_v36 }
 0xc80   :  { %vm6827_vm5 = vmmov %vm6825_vm9 }
 0xc81   :  { %v2695_v44 = vsel %vm6827_vm5, %v3521_v3, 0.0  ;;  %vm2683_vm9 = vmand %vm5547_vm15, %vm2662_vm6  ;;  %vm2669_vm6 = vcmp.eq.f32.partialorder %v5558_v37, %v5502_v4  ;;  %v2734_v3 = vceil.f32 %v2731_v16 }
 0xc82   :  { %2696 = vadd.xlane.f32.xlu0 %v2695_v44  ;;  %v3520_v26 = vsel %vm2683_vm9, 1.0, %v4377_v1  ;;  %vm6828_vm14 = vmmov %vm6827_vm5  ;;  %vm2665_vm5 = vcmp.gt.f32.partialorder %v5564_v61, %v5502_v4  ;;  %vm6829_vm9 = vcmp.lt.s32.totalorder %v4540_v34, %v4517_v22  ;;  %v2723_v31 = vpop.xlane.xlu1 %2722 }
 0xc83   :  { %v2692_v14 = vsel %vm6828_vm14, %v3520_v26, 0.0  ;;  %vm1076_vm0 = vmand %vm6712_vm4, %vm6789_vm12  ;;  %vm6831_vm4 = vcmp.lt.s32.totalorder %v4563_v43, %v4517_v22  ;;  %v2737_v43 = vadd.f32 %v2736_v7, %v5538_v46  ;;  %v2730_v18 = vmul.f32 0.8, %v2723_v31 }
 0xc84   :  { %2693 = vadd.xlane.f32.xlu1 %v2692_v14  ;;  %v1079_v63 = vsel %vm1076_vm0, 1, %v4376_v0  ;;  %vm1113_vm10 = vmand %vm6711_vm13, %vm6789_vm12  ;;  %vm2670_vm0 = vcmp.eq.f32.partialorder %v5556_v20, %v5502_v4 }
 0xc85   :  { %v1116_v48 = vsel %vm1113_vm10, 1, %v4376_v0  ;;  %vm1147_vm1 = vmand %vm6710_vm2, %vm6789_vm12  ;;  %vm2666_vm10 = vcmp.gt.f32.partialorder %v5558_v37, %v5502_v4  ;;  %v2738_v2 = vrot.slane %v2737_v43, 4 }
 0xc86   :  { %v1150_v33 = vsel %vm1147_vm1, 1, %v4376_v0  ;;  %vm2671_vm14 = vmand %vm2668_vm8, %vm6829_vm9  ;;  %vm6830_vm1 = vcmp.lt.s32.totalorder %v4553_v39, %v4517_v22 }
 0xc87   :  { %vm2672_vm2 = vmand %vm2669_vm6, %vm6830_vm1  ;;  %vm6832_vm6 = vnez %v6811_v32  ;;  %v2739_v42 = vadd.f32 %v2738_v2, %v2737_v43 }
 0xc88   :  { %vm2674_vm13 = vmor %vm2665_vm5, %vm2671_vm14 }
 0xc89   :  { %vm2673_vm12 = vmand %vm2670_vm0, %vm6831_vm4  ;;  %vm6833_vm4 = vcmask 195584   ;;  %v2740_v32 = vrot.slane %v2739_v42, 2 }
 0xc8a   :  { %vm2675_vm3 = vmor %vm2666_vm10, %vm2672_vm2  ;;  %vm6842_vm10 = vnez %v6794_v30 }
 0xc8b   :  { %vm2701_vm8 = vmand %vm5547_vm15, %vm2674_vm13  ;;  %v2741_v10 = vadd.f32 %v2740_v32, %v2739_v42  ;;  %vm6839_vm13 = vnez %v6791_v28 }
 0xc8c   :  { %vm2702_vm9 = vmand %vm5528_vm11, %vm2675_vm3  ;;  %v3523_v39 = vsel %vm2701_vm8, 1.0, %v4377_v1 }
 0xc8d   :  { %vm2676_vm1 = vmor %vm2667_vm7, %vm2673_vm12  ;;  %v3524_v59 = vsel %vm2702_vm9, 1.0, %v4377_v1  ;;  %v2710_v22 = vsel %vm6833_vm4, %v3523_v39, 0.0  ;;  %vm6836_vm7 = vnez %v6788_v11  ;;  %vm6722_vm9 = vcmp.eq.s32.totalorder %v5598_v45, 3 }
 0xc8e   :  { %vm2703_vm5 = vmand %vm6832_vm6, %vm2676_vm1  ;;  %vm6845_vm6 = vnez %v6754_v41 }
 0xc8f   :  { %vm6834_vm2 = vmmov %vm6833_vm4  ;;  %v3525_v4 = vsel %vm2703_vm5, 1.0, %v4377_v1  ;;  %vm6717_vm4 = vcmp.eq.s32.totalorder %v5598_v45, 4 }
 0xc90   :  { %v2711_v51 = vsel %vm6834_vm2, %v3524_v59, 0.0  ;;  %vm6835_vm3 = vmmov %vm6834_vm2 }
 0xc91   :  { %v2712_v13 = vadd.f32 %v2711_v51, %v2710_v22  ;;  %v2713_v6 = vsel %vm6835_vm3, %v3525_v4, 0.0  ;;  %vm1181_vm5 = vmand %vm6722_vm9, %vm6845_vm6 }
 0xc92   :  { %v1184_v36 = vsel %vm1181_vm5, 1, %v4376_v0  ;;  %vm1215_vm3 = vmand %vm6717_vm4, %vm6845_vm6  ;;  %vm6846_vm5 = vnez %v6797_v53  ;;  %vm6718_vm4 = vcmp.eq.s32.totalorder %v5598_v45, 7  ;;  %v5720_v53 = vld [vmem:[%s6661_s1 + $0x10] sm:$0xff] }
 0xc93   :  { %v2714_v17 = vadd.f32 %v2713_v6, %v2712_v13 }
 0xc95   :  { %1085 = vperm.xlu1 %4272, %v1079_v63   ;;  %v2715_v56 = vrot.slane %v2714_v17, 4  ;;  %v2733_v63 = vceil.f32 %v2730_v18 }
 0xc97   :  { %v2716_v46 = vadd.f32 %v2715_v56, %v2714_v17  ;;  %v1218_v56 = vsel %vm1215_vm3, 1, %v4376_v0 }
 0xc99   :  { %1122 = vperm.xlu1 %4272, %v1116_v48   ;;  %v2717_v14 = vrot.slane %v2716_v46, 2  ;;  %v2742_v48 = vrot.slane %v2741_v10, 1 }
 0xc9b   :  { %v2718_v22 = vadd.f32 %v2717_v14, %v2716_v46  ;;  %v2743_v43 = vadd.f32 %v2742_v48, %v2741_v10 }
 0xc9d   :  { %1156 = vperm.xlu1 %4272, %v1150_v33   ;;  %v2719_v2 = vrot.slane %v2718_v22, 1  ;;  %v2744_v55 = vmul.f32 0.8, %v2743_v43 }
 0xc9f   :  { %v2720_v42 = vadd.f32 %v2719_v2, %v2718_v22  ;;  %v2745_v21 = vceil.f32 %v2744_v55 }
 0xd06   :  { %v2700_v12 = vpop.xlane.xlu0 %2699 }
 0xd07   :  { %vm2748_vm12 = vcmp.lt.f32.partialorder %v2700_v12, %v2735_v25 }
 0xd08   :  { %vm5654_vm11 = vmand %vm6836_vm7, %vm2748_vm12  ;;  %vm6720_vm12 = vcmp.eq.s32.totalorder %v5598_v45, 5 }
 0xd09   :  { %v2762_v44 = vsel %vm5654_vm11, 1, %v4376_v0 }
 0xd0a   :  { %2770 = vperm.xlu0 %4271, %v2762_v44   ;;  %v5777_v44 = vld [vmem:[%s6661_s1] sm:$0xff] }
 0xd0b   :  { %v2697_v26 = vpop.xlane.xlu0 %2696 }
 0xd0c   :  { %vm2747_vm15 = vcmp.lt.f32.partialorder %v2697_v26, %v2734_v3 }
 0xd0d   :  { %vm5663_vm14 = vmand %vm6839_vm13, %vm2747_vm15  ;;  %v2694_v7 = vpop.xlane.xlu1 %2693 }
 0xd0e   :  { %vm2746_vm0 = vcmp.lt.f32.partialorder %v2694_v7, %v2733_v63  ;;  %v2761_v39 = vsel %vm5663_vm14, 1, %v4376_v0  ;;  %vm1249_vm15 = vmand %vm6720_vm12, %vm6845_vm6 }
 0xd0f   :  { %vm5672_vm8 = vmand %vm6842_vm10, %vm2746_vm0  ;;  %2767 = vperm.xlu1 %4272, %v2761_v39   ;;  %vm2752_vm0 = vcmp.lt.f32.partialorder %v2720_v42, %v2745_v21  ;;  %v1252_v32 = vsel %vm1249_vm15, 1, %v4376_v0 }
 0xd10   :  { %v2760_v4 = vsel %vm5672_vm8, 1, %v4376_v0  ;;  %vm1317_vm15 = vmand %vm6718_vm4, %vm6845_vm6  ;;  %vm6848_vm4 = vcmask 195584  }
 0xd11   :  { %v1086_v51 = vpop.permute.xlu1 %1085  ;;  %v1320_v12 = vsel %vm1317_vm15, 1, %v4376_v0  ;;  %v991_v41 = vsel %vm6848_vm4, %v5045_v35, 0.0  ;;  %vm6850_vm9 = vmmov %vm6848_vm4 }
 0xd12   :  { %vm1091_vm1 = vcmp.eq.s32.totalorder %v1086_v51, 1 }
 0xd13   :  { %v5681_v13 = vsel %vm1091_vm1, %v5005_v15, -1e+30  ;;  %2764 = vperm.xlu1 %4272, %v2760_v4   ;;  %vm6719_vm1 = vcmp.eq.s32.totalorder %v5598_v45, 6 }
 0xd14   :  { %vm1283_vm3 = vmand %vm6719_vm1, %vm6845_vm6  ;;  %vm6849_vm1 = vcmp.eq.s32.totalorder %v4540_v34, %v4757_v58 }
 0xd15   :  { %v1123_v6 = vpop.permute.xlu1 %1122  ;;  %v1286_v25 = vsel %vm1283_vm3, 1, %v4376_v0  ;;  %vm6731_vm3 = vcmp.eq.s32.totalorder %v5720_v53, 3 }
 0xd16   :  { %vm1128_vm2 = vcmp.eq.s32.totalorder %v1123_v6, 1 }
 0xd17   :  { %v5690_v17 = vsel %vm1128_vm2, %v5005_v15, -1e+30  ;;  %1190 = vperm.xlu1 %4272, %v1184_v36   ;;  %vm2753_vm2 = vmand %vm6846_vm5, %vm2752_vm0  ;;  %vm6721_vm0 = vcmp.eq.s32.totalorder %v5720_v53, 1  ;;  %vm6847_vm5 = vnez %v6751_v29 }
 0xd18   :  { %v2778_v31 = vsel %vm2753_vm2, 1, %v4376_v0  ;;  %vm1114_vm2 = vmand %vm6721_vm0, %vm6847_vm5  ;;  %vm6724_vm0 = vcmp.eq.s32.totalorder %v5720_v53, 5 }
 0xd19   :  { %v2782_v16 = vrot.slane %v2778_v31, %v4605_v5  ;;  %v1117_v46 = vsel %vm1114_vm2, 1, %v4376_v0  ;;  %vm1182_vm15 = vmand %vm6731_vm3, %vm6847_vm5  ;;  %v1901_v5 = vsel %vm6850_vm9, %v5394_v23, 0.0  ;;  %vm6723_vm2 = vcmp.eq.s32.totalorder %v5720_v53, 7 }
 0xd1a   :  { %v1185_v35 = vsel %vm1182_vm15, 1, %v4376_v0  ;;  %vm1250_vm4 = vmand %vm6724_vm0, %vm6847_vm5  ;;  %vm6853_vm15 = vcmp.eq.s32.totalorder %v5598_v45, 1 }
 0xd1b   :  { %1224 = vperm.xlu1 %4272, %v1218_v56   ;;  %vm2783_vm6 = vcmp.eq.s32.totalorder %v2782_v16, 1  ;;  %v1253_v58 = vsel %vm1250_vm4, 1, %v4376_v0  ;;  %vm2017_vm4 = vmand %vm6853_vm15, %vm6839_vm13 }
 0xd1c   :  { %vm2784_vm12 = vmand %vm6849_vm1, %vm2783_vm6  ;;  %v2020_v3 = vsel %vm2017_vm4, 1, %v4376_v0  ;;  %vm6856_vm4 = vnez %v6757_v49 }
 0xd1d   :  { %v5745_v18 = vsel %vm2784_vm12, 1.0, %v4377_v1  ;;  %vm6851_vm1 = vmmov %vm6850_vm9  ;;  %vm6852_vm12 = vcmp.eq.s32.totalorder %v5598_v45, 0 }
 0xd1e   :  { %v2787_v34 = vsel %vm6851_vm1, %v5745_v18, 0.0  ;;  %vm1318_vm9 = vmand %vm6723_vm2, %vm6847_vm5  ;;  %vm6854_vm1 = vcmp.eq.s32.totalorder %v5598_v45, 2  ;;  %vm6726_vm2 = vcmp.eq.s32.totalorder %v5777_v44, 1 }
 0xd1f   :  { %1258 = vperm.xlu1 %4272, %v1252_v32   ;;  %v1321_v23 = vsel %vm1318_vm9, 1, %v4376_v0  ;;  %vm1983_vm6 = vmand %vm6852_vm12, %vm6839_vm13  ;;  %vm6725_vm12 = vcmp.eq.s32.totalorder %v5777_v44, 0 }
 0xd20   :  { %v1986_v10 = vsel %vm1983_vm6, 1, %v4376_v0  ;;  %vm2048_vm9 = vmand %vm6854_vm1, %vm6839_vm13  ;;  %vm6855_vm6 = vcmp.eq.s32.totalorder %v5598_v45, 3 }
 0xd21   :  { %v2051_v26 = vsel %vm2048_vm9, 1, %v4376_v0  ;;  %vm2079_vm15 = vmand %vm6855_vm6, %vm6839_vm13  ;;  %vm6857_vm9 = vcmp.eq.s32.totalorder %v5598_v45, 4 }
 0xd22   :  { %vm1075_vm1 = vmand %vm6725_vm12, %vm6856_vm4  ;;  %v2082_v14 = vsel %vm2079_vm15, 1, %v4376_v0  ;;  %vm6727_vm12 = vcmp.eq.s32.totalorder %v5777_v44, 2  ;;  %vm6858_vm15 = vcmp.eq.s32.totalorder %v5598_v45, 5 }
 0xd23   :  { %1292 = vperm.xlu1 %4272, %v1286_v25   ;;  %v1078_v63 = vsel %vm1075_vm1, 1, %v4376_v0  ;;  %vm2110_vm0 = vmand %vm6857_vm9, %vm6839_vm13 }
 0xd24   :  { %vm1112_vm6 = vmand %vm6726_vm2, %vm6856_vm4  ;;  %v2113_v48 = vsel %vm2110_vm0, 1, %v4376_v0  ;;  %vm6728_vm2 = vcmp.eq.s32.totalorder %v5777_v44, 3  ;;  %vm6859_vm0 = vcmp.eq.s32.totalorder %v5598_v45, 6 }
 0xd25   :  { %v1115_v7 = vsel %vm1112_vm6, 1, %v4376_v0  ;;  %vm2141_vm1 = vmand %vm6858_vm15, %vm6839_vm13 }
 0xd26   :  { %vm1146_vm9 = vmand %vm6727_vm12, %vm6856_vm4  ;;  %v2144_v39 = vsel %vm2141_vm1, 1, %v4376_v0  ;;  %vm6729_vm12 = vcmp.eq.s32.totalorder %v5777_v44, 4  ;;  %vm6860_vm1 = vcmp.eq.s32.totalorder %v5598_v45, 7 }
 0xd27   :  { %1326 = vperm.xlu1 %4272, %v1320_v12   ;;  %v1149_v22 = vsel %vm1146_vm9, 1, %v4376_v0  ;;  %vm2172_vm6 = vmand %vm6859_vm0, %vm6839_vm13 }
 0xd28   :  { %vm1180_vm15 = vmand %vm6728_vm2, %vm6856_vm4  ;;  %v2175_v43 = vsel %vm2172_vm6, 1, %v4376_v0  ;;  %vm6730_vm2 = vcmp.eq.s32.totalorder %v5777_v44, 5  ;;  %vm6732_vm6 = vcmp.eq.s32.totalorder %v5720_v53, 0 }
 0xd29   :  { %992 = vadd.xlane.f32.xlu0 %v991_v41  ;;  %v1183_v51 = vsel %vm1180_vm15, 1, %v4376_v0  ;;  %vm2203_vm9 = vmand %vm6860_vm1, %vm6839_vm13  ;;  %vm1279_vm1 = vcmp.eq.s32.totalorder %v5777_v44, 6 }
 0xd2a   :  { %vm1214_vm0 = vmand %vm6729_vm12, %vm6856_vm4  ;;  %v2206_v4 = vsel %vm2203_vm9, 1, %v4376_v0  ;;  %vm6861_vm9 = vcmp.eq.s32.totalorder %v5720_v53, 1 }
 0xd2b   :  { %1125 = vperm.xlu1 %4272, %v1117_v46   ;;  %v1217_v2 = vsel %vm1214_vm0, 1, %v4376_v0  ;;  %vm1984_vm13 = vmand %vm6732_vm6, %vm6836_vm7 }
 0xd2c   :  { %vm1248_vm15 = vmand %vm6730_vm2, %vm6856_vm4  ;;  %v1987_v28 = vsel %vm1984_vm13, 1, %v4376_v0  ;;  %vm1313_vm2 = vcmp.eq.s32.totalorder %v5777_v44, 7  ;;  %vm1145_vm13 = vcmp.eq.s32.totalorder %v5720_v53, 2 }
 0xd2d   :  { %1902 = vadd.xlane.f32.xlu0 %v1901_v5  ;;  %v1251_v6 = vsel %vm1248_vm15, 1, %v4376_v0  ;;  %vm2018_vm0 = vmand %vm6861_vm9, %vm6836_vm7 }
 0xd2e   :  { %vm1282_vm12 = vmand %vm1279_vm1, %vm6856_vm4  ;;  %v2021_v55 = vsel %vm2018_vm0, 1, %v4376_v0 }
 0xd2f   :  { %1193 = vperm.xlu1 %4272, %v1185_v35   ;;  %v1285_v36 = vsel %vm1282_vm12, 1, %v4376_v0  ;;  %vm2049_vm15 = vmand %vm1145_vm13, %vm6836_vm7 }
 0xd30   :  { %vm1316_vm9 = vmand %vm1313_vm2, %vm6856_vm4  ;;  %v2052_v42 = vsel %vm2049_vm15, 1, %v4376_v0  ;;  %vm6733_vm4 = vcmp.eq.s32.totalorder %v5720_v53, 4 }
 0xd31   :  { %2788 = vadd.xlane.f32.xlu0 %v2787_v34  ;;  %v1319_v21 = vsel %vm1316_vm9, 1, %v4376_v0  ;;  %vm2080_vm12 = vmand %vm6731_vm3, %vm6836_vm7  ;;  %v4310_v34 = vpop.eup %4309 }
 0xd32   :  { %vm1077_vm0 = vmand %vm6732_vm6, %vm6847_vm5  ;;  %v2083_v49 = vsel %vm2080_vm12, 1, %v4376_v0  ;;  %vm6862_vm12 = vcmp.eq.s32.totalorder %v5720_v53, 5  ;;  %vm1281_vm6 = vcmp.eq.s32.totalorder %v5720_v53, 6 }
 0xd33   :  { %1261 = vperm.xlu1 %4272, %v1253_v58   ;;  %v1080_v56 = vsel %vm1077_vm0, 1, %v4376_v0  ;;  %vm2111_vm15 = vmand %vm6733_vm4, %vm6836_vm7  ;;  %v5963_v58 = vpop.permute.xlu1 %1156 }
 0xd34   :  { %vm1148_vm9 = vmand %vm1145_vm13, %vm6847_vm5  ;;  %v2114_v32 = vsel %vm2111_vm15, 1, %v4376_v0 }
 0xd35   :  { %v1151_v31 = vsel %vm1148_vm9, 1, %v4376_v0  ;;  %vm2142_vm0 = vmand %vm6862_vm12, %vm6836_vm7 }
 0xd36   :  { %vm1216_vm3 = vmand %vm6733_vm4, %vm6847_vm5  ;;  %v2145_v25 = vsel %vm2142_vm0, 1, %v4376_v0  ;;  %vm6864_vm0 = vcmp.eq.s32.totalorder %v5777_v44, 0 }
 0xd37   :  { %1329 = vperm.xlu1 %4272, %v1321_v23   ;;  %v1219_v16 = vsel %vm1216_vm3, 1, %v4376_v0  ;;  %vm2173_vm15 = vmand %vm1281_vm6, %vm6836_vm7  ;;  %vm6863_vm3 = vcmp.eq.s32.totalorder %v5720_v53, 7  ;;  %v2759_v23 = vmul.f32 %v4310_v34, %v2552_v54 }
 0xd38   :  { %vm1284_vm9 = vmand %vm1281_vm6, %vm6847_vm5  ;;  %v2176_v12 = vsel %vm2173_vm15, 1, %v4376_v0 }
 0xd39   :  { %v1287_v41 = vsel %vm1284_vm9, 1, %v4376_v0  ;;  %vm2204_vm12 = vmand %vm6863_vm3, %vm6836_vm7  ;;  %vm6866_vm7 = vcmp.eq.s32.totalorder %v5777_v44, 1 }
 0xd3a   :  { %vm1982_vm4 = vmand %vm6864_vm0, %vm6842_vm10  ;;  %v2207_v29 = vsel %vm2204_vm12, 1, %v4376_v0  ;;  %vm6868_vm12 = vcmp.eq.s32.totalorder %v5777_v44, 2 }
 0xd3b   :  { %1992 = vperm.xlu1 %4272, %v1986_v10   ;;  %v1985_v46 = vsel %vm1982_vm4, 1, %v4376_v0  ;;  %vm6865_vm5 = vmmov %vm6864_vm0 }
 0xd3c   :  { %vm2868_vm15 = vmand %vm6865_vm5, %vm5672_vm8  ;;  %vm6869_vm5 = vcmp.eq.s32.totalorder %v5598_v45, 1 }
 0xd3d   :  { %vm2016_vm9 = vmand %vm6866_vm7, %vm6842_vm10  ;;  %v2871_v11 = vsel %vm2868_vm15, 1, %v4376_v0 }
 0xd3e   :  { %v2019_v20 = vsel %vm2016_vm9, 1, %v4376_v0  ;;  %vm6867_vm4 = vmmov %vm6866_vm7  ;;  %vm6870_vm7 = vcmp.eq.s32.totalorder %v5777_v44, 3 }
 0xd3f   :  { %2026 = vperm.xlu1 %4272, %v2020_v3   ;;  %vm2902_vm3 = vmand %vm6867_vm4, %vm5672_vm8 }
 0xd40   :  { %vm2047_vm0 = vmand %vm6868_vm12, %vm6842_vm10  ;;  %v2905_v37 = vsel %vm2902_vm3, 1, %v4376_v0 }
 0xd41   :  { %v2050_v5 = vsel %vm2047_vm0, 1, %v4376_v0  ;;  %vm2903_vm15 = vmand %vm6869_vm5, %vm5663_vm14 }
 0xd42   :  { %vm2078_vm9 = vmand %vm6870_vm7, %vm6842_vm10  ;;  %v2906_v35 = vsel %vm2903_vm15, 1, %v4376_v0  ;;  %vm6873_vm15 = vcmp.eq.s32.totalorder %v5598_v45, 2 }
 0xd43   :  { %2057 = vperm.xlu1 %4272, %v2051_v26   ;;  %v2081_v61 = vsel %vm2078_vm9, 1, %v4376_v0  ;;  %vm6871_vm4 = vmmov %vm6868_vm12  ;;  %vm6872_vm12 = vcmp.eq.s32.totalorder %v5777_v44, 4  ;;  %v4312_v26 = vpop.eup %4311  ;;  %vm6874_vm9 = vcmp.eq.s32.totalorder %v5777_v44, 5 }
 0xd44   :  { %vm2933_vm3 = vmand %vm6871_vm4, %vm5672_vm8  ;;  %v2758_v27 = vmul.f32 %v4312_v26, %v2551_v57 }
 0xd45   :  { %vm2109_vm0 = vmand %vm6872_vm12, %vm6842_vm10  ;;  %v2936_v3 = vsel %vm2933_vm3, 1, %v4376_v0  ;;  %vm6875_vm12 = vcmp.eq.s32.totalorder %v5777_v44, 3 }
 0xd46   :  { %vm2934_vm7 = vmand %vm6873_vm15, %vm5663_vm14 }
 0xd47   :  { %2088 = vperm.xlu1 %4272, %v2082_v14   ;;  %1082 = vperm.xlu0 %4271, %v1078_v63   ;;  %v2112_v14 = vsel %vm2109_vm0, 1, %v4376_v0  ;;  %vm2140_vm4 = vmand %vm6874_vm9, %vm6842_vm10 }
 0xd48   :  { %vm2964_vm0 = vmand %vm6875_vm12, %vm5672_vm8  ;;  %vm6878_vm12 = vmmov 0  }
 0xd4b   :  { %2119 = vperm.xlu1 %4272, %v2113_v48   ;;  %1119 = vperm.xlu0 %4271, %v1115_v7   ;;  %v2937_v48 = vsel %vm2934_vm7, 1, %v4376_v0  ;;  %v4314_v7 = vpop.eup %4313  ;;  %vm6876_vm7 = vcmp.eq.s32.totalorder %v5598_v45, 3 }
 0xd4c   :  { %v2757_v52 = vmul.f32 %v4314_v7, %v2550_v50  ;;  %vm2965_vm9 = vmand %vm6876_vm7, %vm5663_vm14 }
 0xd4d   :  { %v2968_v50 = vsel %vm2965_vm9, 1, %v4376_v0  ;;  %vm6881_vm9 = vcmp.eq.s32.totalorder %v5598_v45, 5 }
 0xd4f   :  { %2150 = vperm.xlu1 %4272, %v2144_v39   ;;  %1153 = vperm.xlu0 %4271, %v1149_v22   ;;  %v2143_v39 = vsel %vm2140_vm4, 1, %v4376_v0  ;;  %vm2202_vm4 = vmand %vm1313_vm2, %vm6842_vm10 }
 0xd53   :  { %2181 = vperm.xlu1 %4272, %v2175_v43   ;;  %1187 = vperm.xlu0 %4271, %v1183_v51   ;;  %v2967_v43 = vsel %vm2964_vm0, 1, %v4376_v0  ;;  %vm6879_vm0 = vcmp.eq.s32.totalorder %v5598_v45, 4 }
 0xd57   :  { %2212 = vperm.xlu1 %4272, %v2206_v4   ;;  %1221 = vperm.xlu0 %4271, %v1217_v2   ;;  %v2205_v2 = vsel %vm2202_vm4, 1, %v4376_v0  ;;  %vm3027_vm4 = vmand %vm6881_vm9, %vm5663_vm14 }
 0xd5b   :  { %1995 = vperm.xlu1 %4272, %v1987_v28   ;;  %1255 = vperm.xlu0 %4271, %v1251_v6  }
 0xd5f   :  { %2029 = vperm.xlu1 %4272, %v2021_v55   ;;  %1289 = vperm.xlu0 %4271, %v1285_v36   ;;  %v3030_v36 = vsel %vm3027_vm4, 1, %v4376_v0  ;;  %vm6885_vm4 = vcmp.eq.s32.totalorder %v5598_v45, 7 }
 0xd63   :  { %2060 = vperm.xlu1 %4272, %v2052_v42   ;;  %1323 = vperm.xlu0 %4271, %v1319_v21  }
 0xd67   :  { %2091 = vperm.xlu1 %4272, %v2083_v49   ;;  %1088 = vperm.xlu0 %4271, %v1080_v56  }
 0xd6b   :  { %2122 = vperm.xlu1 %4272, %v2114_v32   ;;  %1159 = vperm.xlu0 %4271, %v1151_v31  }
 0xd6f   :  { %2153 = vperm.xlu1 %4272, %v2145_v25   ;;  %1227 = vperm.xlu0 %4271, %v1219_v16  }
 0xd73   :  { %2184 = vperm.xlu1 %4272, %v2176_v12   ;;  %1295 = vperm.xlu0 %4271, %v1287_v41  }
 0xd77   :  { %2215 = vperm.xlu1 %4272, %v2207_v29   ;;  %1989 = vperm.xlu0 %4271, %v1985_v46  }
 0xd7b   :  { %2875 = vperm.xlu1 %4272, %v2871_v11   ;;  %2023 = vperm.xlu0 %4271, %v2019_v20  }
 0xd7f   :  { %2909 = vperm.xlu1 %4272, %v2905_v37   ;;  %2054 = vperm.xlu0 %4271, %v2050_v5  }
 0xd83   :  { %2912 = vperm.xlu1 %4272, %v2906_v35   ;;  %2085 = vperm.xlu0 %4271, %v2081_v61  }
 0xd85   :  { %v2771_v10 = vpop.permute.xlu0 %2770 }
 0xd86   :  { %vm2774_vm5 = vcmp.eq.s32.totalorder %v2771_v10, 1 }
 0xd87   :  { %2940 = vperm.xlu1 %4272, %v2936_v3   ;;  %v5973_v63 = vsel %vm2774_vm5, %v2759_v23, 0.0  ;;  %4150 = vmatpush3.msk.msra.mxu1 %vm2774_vm5, %v2759_v23  ;;  %vm2171_vm5 = vmand %vm1279_vm1, %vm6842_vm10 }
 0xd88   :  { %2116 = vperm.xlu0 %4271, %v2112_v14   ;;  %4151 = vmatprep.subr.mxu1 %v4377_v1  ;;  %v2174_v51 = vsel %vm2171_vm5, 1, %v4376_v0  ;;  %vm2996_vm10 = vmand %vm6879_vm0, %vm5663_vm14  ;;  %vm6880_vm5 = vcmp.eq.s32.totalorder %v5598_v45, 0 }
 0xd8a   :  { %v2768_v54 = vpop.permute.xlu1 %2767 }
 0xd8b   :  { %vm2773_vm3 = vcmp.eq.s32.totalorder %v2768_v54, 1  ;;  %2943 = vperm.xlu1 %4272, %v2937_v48  }
 0xd8c   :  { %v5988_v22 = vsel %vm2773_vm3, %v2758_v27, 0.0  ;;  %2147 = vperm.xlu0 %4271, %v2143_v39   ;;  %4152 = vmatpush3.msk.msra.mxu1 %vm2773_vm3, %v2758_v27  ;;  %vm6877_vm3 = vcmask 195584  }
 0xd8d   :  { %4153 = vmatprep.subr.mxu1 %v4377_v1 }
 0xd8e   :  { %v2765_v57 = vpop.permute.xlu1 %2764 }
 0xd8f   :  { %vm2772_vm15 = vcmp.eq.s32.totalorder %v2765_v57, 1  ;;  %2971 = vperm.xlu1 %4272, %v2967_v43  }
 0xd90   :  { %v6003_v4 = vsel %vm2772_vm15, %v2757_v52, 0.0  ;;  %2178 = vperm.xlu0 %4271, %v2174_v51   ;;  %4154 = vmatpush3.msk.msra.mxu1 %vm2772_vm15, %v2757_v52  ;;  %vm2869_vm15 = vmand %vm6880_vm5, %vm5663_vm14  ;;  %v3136_v51 = vld [vmem:[%s6669_s9 + $0x78] sm:$0xff] }
 0xd91   :  { %4156 = vmatmul.mubr.msk.f32.vlgmr.msra.gmra.mxu1 %vm6877_vm3, %v5745_v18  ;;  %4193 = vmatprep.subr.mxu1 %v4377_v1  ;;  %v2999_v18 = vsel %vm2996_vm10, 1, %v4376_v0  ;;  %v2872_v28 = vsel %vm2869_vm15, 1, %v4376_v0  ;;  %vm6882_vm3 = vcmp.eq.s32.totalorder %v5777_v44, 4  ;;  %vm6883_vm10 = vcmp.eq.s32.totalorder %v5598_v45, 6 }
 0xd92   :  { %v6012_v47 = vpop.permute.xlu1 %1190  ;;  %4225 = vmatprep.mubr.msk.f32.mxu1 %vm6878_vm12, %v4377_v1  ;;  %vm2995_vm0 = vmand %vm6882_vm3, %vm5672_vm8  ;;  %vm6884_vm15 = vcmp.eq.s32.totalorder %v5777_v44, 5  ;;  %4194 = vmatpush3.msra.mxu1 %v3136_v51 }
 0xd93   :  { %2974 = vperm.xlu1 %4272, %v2968_v50   ;;  %v2998_v42 = vsel %vm2995_vm0, 1, %v4376_v0  ;;  %vm3058_vm5 = vmand %vm6883_vm10, %vm5663_vm14  ;;  %v3151_v50 = vld [vmem:[%s6669_s9 + $0xf0] sm:$0xff]  ;;  %4195 = vmatprep.subr.mxu1 %v4377_v1 }
 0xd94   :  { %2209 = vperm.xlu0 %4271, %v2205_v2   ;;  %v3061_v49 = vsel %vm3058_vm5, 1, %v4376_v0  ;;  %vm3089_vm3 = vmand %vm6885_vm4, %vm5663_vm14  ;;  %vm6886_vm14 = vcmp.eq.s32.totalorder %v5720_v53, 0 }
 0xd95   :  { %vm3057_vm0 = vmand %vm1279_vm1, %vm5672_vm8  ;;  %v3092_v25 = vsel %vm3089_vm3, 1, %v4376_v0  ;;  %vm6887_vm1 = vcmp.eq.s32.totalorder %v5720_v53, 1 }
 0xd96   :  { %v1225_v30 = vpop.permute.xlu1 %1224  ;;  %v3060_v16 = vsel %vm3057_vm0, 1, %v4376_v0  ;;  %vm2870_vm10 = vmand %vm6886_vm14, %vm5654_vm11  ;;  %vm6891_vm14 = vcmp.eq.s32.totalorder %v5720_v53, 5 }
 0xd97   :  { %vm1230_vm7 = vcmp.eq.s32.totalorder %v1225_v30, 1  ;;  %3005 = vperm.xlu1 %4272, %v2999_v18   ;;  %vm3088_vm5 = vmand %vm1313_vm2, %vm5672_vm8  ;;  %v2873_v33 = vsel %vm2870_vm10, 1, %v4376_v0  ;;  %vm6889_vm2 = vcmp.eq.s32.totalorder %v5720_v53, 3 }
 0xd98   :  { %v6033_v6 = vsel %vm1230_vm7, %v5005_v15, -1e+30  ;;  %2878 = vperm.xlu0 %4271, %v2872_v28   ;;  %vm3026_vm7 = vmand %vm6884_vm15, %vm5672_vm8  ;;  %v3091_v12 = vsel %vm3088_vm5, 1, %v4376_v0  ;;  %v3135_v28 = vld [vmem:[%s6669_s9 + $0x70] sm:$0xff] }
 0xd99   :  { %v3029_v56 = vsel %vm3026_vm7, 1, %v4376_v0  ;;  %vm2904_vm15 = vmand %vm6887_vm1, %vm5654_vm11  ;;  %vm6888_vm7 = vcmp.eq.s32.totalorder %v5720_v53, 7  ;;  %4196 = vmatpush3.msra.mxu1 %v3135_v28 }
 0xd9a   :  { %v6039_v55 = vpop.permute.xlu1 %1258  ;;  %v2907_v44 = vsel %vm2904_vm15, 1, %v4376_v0  ;;  %vm2935_vm8 = vmand %vm1145_vm13, %vm5654_vm11  ;;  %vm6890_vm13 = vcmp.eq.s32.totalorder %v5720_v53, 4  ;;  %vm1162_vm15 = vcmp.eq.s32.totalorder %v5963_v58, 1  ;;  %4197 = vmatprep.subr.mxu1 %v4377_v1  ;;  %v3148_v58 = vld [vmem:[%s6669_s9 + $0xd8] sm:$0xff] }
 0xd9b   :  { %3036 = vperm.xlu1 %4272, %v3030_v36   ;;  %v2938_v46 = vsel %vm2935_vm8, 1, %v4376_v0  ;;  %vm2966_vm4 = vmand %vm6889_vm2, %vm5654_vm11 }
 0xd9c   :  { %3002 = vperm.xlu0 %4271, %v2998_v42   ;;  %v2969_v20 = vsel %vm2966_vm4, 1, %v4376_v0  ;;  %vm2997_vm3 = vmand %vm6890_vm13, %vm5654_vm11  ;;  %vm1264_vm13 = vcmp.eq.s32.totalorder %v6039_v55, 1  ;;  %v3142_v55 = vld [vmem:[%s6669_s9 + $0xa8] sm:$0xff] }
 0xd9d   :  { %v3000_v34 = vsel %vm2997_vm3, 1, %v4376_v0  ;;  %vm3028_vm10 = vmand %vm6891_vm14, %vm5654_vm11 }
 0xd9e   :  { %v1293_v21 = vpop.permute.xlu1 %1292  ;;  %v3031_v26 = vsel %vm3028_vm10, 1, %v4376_v0  ;;  %vm3059_vm5 = vmand %vm1281_vm6, %vm5654_vm11 }
 0xd9f   :  { %vm1298_vm9 = vcmp.eq.s32.totalorder %v1293_v21, 1  ;;  %3067 = vperm.xlu1 %4272, %v3061_v49   ;;  %v3062_v27 = vsel %vm3059_vm5, 1, %v4376_v0 }
 0xda0   :  { %v6058_v32 = vsel %vm1298_vm9, %v5005_v15, -1e+30  ;;  %3033 = vperm.xlu0 %4271, %v3029_v56   ;;  %vm3090_vm9 = vmand %vm6888_vm7, %vm5654_vm11  ;;  %v3134_v56 = vld [vmem:[%s6669_s9 + $0x68] sm:$0xff] }
 0xda1   :  { %v3093_v41 = vsel %vm3090_vm9, 1, %v4376_v0  ;;  %v3152_v0 = vld [vmem:[%s6669_s9 + $0xf8] sm:$0xff]  ;;  %4198 = vmatpush3.msra.mxu1 %v3134_v56  ;;  %vm1196_vm9 = vcmp.eq.s32.totalorder %v6012_v47, 1  ;;  %v3130_v47 = vld [vmem:[%s6669_s9 + $0x48] sm:$0xff] }
 0xda2   :  { %v6064_v31 = vpop.permute.xlu1 %1326  ;;  %4159 = vmatpush3.msra.mxu0 %v3152_v0  ;;  %4199 = vmatprep.subr.mxu1 %v4377_v1 }
 0xda3   :  { %3098 = vperm.xlu1 %4272, %v3092_v25   ;;  %4160 = vmatprep.subr.mxu0 %v4377_v1  ;;  %v3149_v25 = vld [vmem:[%s6669_s9 + $0xe0] sm:$0xff]  ;;  %vm1332_vm5 = vcmp.eq.s32.totalorder %v6064_v31, 1  ;;  %v3138_v31 = vld [vmem:[%s6669_s9 + $0x88] sm:$0xff] }
 0xda4   :  { %3064 = vperm.xlu0 %4271, %v3060_v16   ;;  %4161 = vmatpush3.msra.mxu0 %v3151_v50  ;;  %v6186_v16 = vsel %vm1162_vm15, %v5005_v15, -1e+30 }
 0xda5   :  { %4162 = vmatprep.subr.mxu0 %v4377_v1 }
 0xda6   :  { %v6076_v45 = vpop.permute.xlu1 %1125 }
 0xda7   :  { %2881 = vperm.xlu1 %4272, %v2873_v33   ;;  %vm1129_vm11 = vcmp.eq.s32.totalorder %v6076_v45, 1  ;;  %v3133_v33 = vld [vmem:[%s6669_s9 + $0x60] sm:$0xff] }
 0xda8   :  { %3095 = vperm.xlu0 %4271, %v3091_v12   ;;  %4200 = vmatpush3.msra.mxu1 %v3133_v33  ;;  %v3143_v33 = vld [vmem:[%s6669_s9 + $0xb0] sm:$0xff] }
 0xda9   :  { %4201 = vmatprep.subr.mxu1 %v4377_v1 }
 0xdaa   :  { %v6088_v59 = vpop.permute.xlu1 %1193 }
 0xdab   :  { %2915 = vperm.xlu1 %4272, %v2907_v44   ;;  %vm1197_vm8 = vcmp.eq.s32.totalorder %v6088_v59, 1 }
 0xdac   :  { %3101 = vperm.xlu0 %4271, %v3093_v41  }
 0xdae   :  { %v6096_v29 = vpop.permute.xlu1 %1261 }
 0xdaf   :  { %2946 = vperm.xlu1 %4272, %v2938_v46   ;;  %v3132_v46 = vld [vmem:[%s6669_s9 + $0x58] sm:$0xff]  ;;  %vm1265_vm3 = vcmp.eq.s32.totalorder %v6096_v29, 1  ;;  %v3125_v29 = vld [vmem:[%s6669_s9 + $0x20] sm:$0xff] }
 0xdb0   :  { %4202 = vmatpush3.msra.mxu1 %v3132_v46 }
 0xdb1   :  { %4203 = vmatprep.subr.mxu1 %v4377_v1 }
 0xdb2   :  { %v6103_v11 = vpop.permute.xlu1 %1329  ;;  %v6106_v37 = vpop.xlane.xlu0 %992 }
 0xdb3   :  { %2977 = vperm.xlu1 %4272, %v2969_v20   ;;  %v1067_v5 = vmax.f32 %v6106_v37, 1.0  ;;  %vm1104_vm14 = vcmp.gt.f32.partialorder %v6106_v37, 0.0 }
 0xdb5   :  { %4315 = vrcp.f32 %v1067_v5 }
 0xdb6   :  { %v1993_v35 = vpop.permute.xlu1 %1992  ;;  %v6114_v61 = vpop.xlane.xlu0 %1902 }
 0xdb7   :  { %vm1998_vm0 = vcmp.eq.s32.totalorder %v1993_v35, 1  ;;  %3008 = vperm.xlu1 %4272, %v3000_v34   ;;  %v1977_v10 = vmax.f32 %v6114_v61, 1.0  ;;  %v3147_v35 = vld [vmem:[%s6669_s9 + $0xd0] sm:$0xff] }
 0xdb8   :  { %v6121_v23 = vsel %vm1998_vm0, %v5360_v38, -1e+30  ;;  %v3131_v34 = vld [vmem:[%s6669_s9 + $0x50] sm:$0xff] }
 0xdb9   :  { %4317 = vrcp.f32 %v1977_v10  ;;  %v1199_v10 = vsel %vm1196_vm9, %v5005_v15, -1e+30  ;;  %4204 = vmatpush3.msra.mxu1 %v3131_v34 }
 0xdba   :  { %v6124_v3 = vpop.permute.xlu1 %2026  ;;  %v6134_v54 = vpop.xlane.xlu0 %2788  ;;  %4205 = vmatprep.subr.mxu1 %v4377_v1 }
 0xdbb   :  { %3039 = vperm.xlu1 %4272, %v3031_v26   ;;  %4206 = vmatpush3.msra.mxu1 %v3130_v47  ;;  %v3141_v47 = vld [vmem:[%s6669_s9 + $0xa0] sm:$0xff]  ;;  %vm2032_vm9 = vcmp.eq.s32.totalorder %v6124_v3, 1 }
 0xdbc   :  { %4207 = vmatprep.subr.mxu1 %v4377_v1 }
 0xdbe   :  { %v6131_v14 = vpop.permute.xlu1 %2057 }
 0xdbf   :  { %3070 = vperm.xlu1 %4272, %v3062_v27  }
 0xdc2   :  { %v6136_v48 = vpop.permute.xlu1 %2088  ;;  %v1083_v7 = vpop.permute.xlu0 %1082 }
 0xdc3   :  { %vm1090_vm1 = vcmp.eq.s32.totalorder %v1083_v7, 1  ;;  %v4316_v39 = vpop.eup %4315 }
 0xdc4   :  { %v6139_v52 = vsel %vm1090_vm1, %v5036_v8, -1e+30  ;;  %v1070_v2 = vmul.f32 %v4316_v39, %v5116_v24  ;;  %vm1333_vm1 = vcmp.eq.s32.totalorder %v6103_v11, 1  ;;  %v3121_v11 = vld [vmem:[%s6669_s9] sm:$0xff] }
 0xdc5   :  { %v1096_v40 = vmax.f32 %v6139_v52, %v5681_v13 }
 0xdc6   :  { %v6143_v53 = vpop.permute.xlu1 %2119  ;;  %v4318_v57 = vpop.eup %4317 }
 0xdc7   :  { %v1120_v43 = vpop.permute.xlu0 %1119  ;;  %v1980_v30 = vmul.f32 %v4318_v57, %v5465_v19  ;;  %v1132_v19 = vsel %vm1129_vm11, %v4984_v9, -1e+30  ;;  %v3146_v57 = vld [vmem:[%s6669_s9 + $0xc8] sm:$0xff] }
 0xdc8   :  { %vm1127_vm6 = vcmp.eq.s32.totalorder %v1120_v43, 1  ;;  %v1200_v43 = vsel %vm1197_vm8, %v4984_v9, -1e+30  ;;  %vm2063_vm8 = vcmp.eq.s32.totalorder %v6131_v14, 1 }
 0xdc9   :  { %v1130_v18 = vsel %vm1127_vm6, %v5036_v8, -1e+30  ;;  %v6167_v24 = vadd.f32 %v1980_v30, %v1070_v2  ;;  %v3145_v2 = vld [vmem:[%s6669_s9 + $0xc0] sm:$0xff] }
 0xdca   :  { %v1133_v36 = vmax.f32 %v1130_v18, %v5690_v17  ;;  %v6163_v42 = vpop.permute.xlu1 %2150  ;;  %v3150_v17 = vld [vmem:[%s6669_s9 + $0xe8] sm:$0xff]  ;;  %v3129_v30 = vld [vmem:[%s6669_s9 + $0x40] sm:$0xff] }
 0xdcb   :  { %v1154_v21 = vpop.permute.xlu0 %1153  ;;  %4163 = vmatpush3.msra.mxu0 %v3150_v17  ;;  %4208 = vmatpush3.msra.mxu1 %v3129_v30  ;;  %v3140_v30 = vld [vmem:[%s6669_s9 + $0x98] sm:$0xff] }
 0xdcc   :  { %v1134_v49 = vmax.f32 %v1133_v36, %v1132_v19  ;;  %vm1161_vm7 = vcmp.eq.s32.totalorder %v1154_v21, 1  ;;  %4164 = vmatprep.subr.mxu0 %v4377_v1  ;;  %v3144_v21 = vld [vmem:[%s6669_s9 + $0xb8] sm:$0xff]  ;;  %4209 = vmatprep.subr.mxu1 %v4377_v1 }
 0xdcd   :  { %v6189_v45 = vsel %vm1161_vm7, %v5036_v8, -1e+30  ;;  %4165 = vmatpush3.msra.mxu0 %v3149_v25 }
 0xdce   :  { %v1135_v12 = vrot.slane %v1134_v49, 4  ;;  %v1167_v44 = vmax.f32 %v6189_v45, %v6186_v16  ;;  %v6197_v41 = vpop.permute.xlu1 %2181  ;;  %4166 = vmatprep.subr.mxu0 %v4377_v1 }
 0xdcf   :  { %v1188_v20 = vpop.permute.xlu0 %1187  ;;  %4167 = vmatpush3.msra.mxu0 %v3148_v58  ;;  %v1267_v58 = vsel %vm1264_vm13, %v5005_v15, -1e+30 }
 0xdd0   :  { %v1136_v5 = vmax.f32 %v1134_v49, %v1135_v12  ;;  %vm1195_vm2 = vcmp.eq.s32.totalorder %v1188_v20, 1  ;;  %4168 = vmatprep.subr.mxu0 %v4377_v1  ;;  %v3128_v49 = vld [vmem:[%s6669_s9 + $0x38] sm:$0xff]  ;;  %v3127_v12 = vld [vmem:[%s6669_s9 + $0x30] sm:$0xff] }
 0xdd1   :  { %v1198_v26 = vsel %vm1195_vm2, %v5036_v8, -1e+30  ;;  %4169 = vmatpush3.msra.mxu0 %v3147_v35  ;;  %4210 = vmatpush3.msra.mxu1 %v3128_v49 }
 0xdd2   :  { %v1137_v27 = vrot.slane %v1136_v5, 2  ;;  %v1201_v7 = vmax.f32 %v1198_v26, %v1199_v10  ;;  %v6220_v39 = vpop.permute.xlu1 %2212  ;;  %4170 = vmatprep.subr.mxu0 %v4377_v1  ;;  %4211 = vmatprep.subr.mxu1 %v4377_v1  ;;  %v3126_v10 = vld [vmem:[%s6669_s9 + $0x28] sm:$0xff]  ;;  %v1268_v26 = vsel %vm1265_vm3, %v4984_v9, -1e+30  ;;  %vm2094_vm3 = vcmp.eq.s32.totalorder %v6136_v48, 1 }
 0xdd3   :  { %v1222_v0 = vpop.permute.xlu0 %1221  ;;  %4171 = vmatpush3.msra.mxu0 %v3146_v57  ;;  %4212 = vmatpush3.msra.mxu1 %v3127_v12  ;;  %v2097_v48 = vsel %vm2094_vm3, %v5360_v38, -1e+30 }
 0xdd4   :  { %v1138_v51 = vmax.f32 %v1136_v5, %v1137_v27  ;;  %v1202_v50 = vmax.f32 %v1201_v7, %v1200_v43  ;;  %vm1229_vm4 = vcmp.eq.s32.totalorder %v1222_v0, 1  ;;  %4172 = vmatprep.subr.mxu0 %v4377_v1  ;;  %4213 = vmatprep.subr.mxu1 %v4377_v1 }
 0xdd5   :  { %v6242_v59 = vsel %vm1229_vm4, %v5036_v8, -1e+30  ;;  %4173 = vmatpush3.msra.mxu0 %v3145_v2  ;;  %4214 = vmatpush3.msra.mxu1 %v3126_v10  ;;  %v3137_v10 = vld [vmem:[%s6669_s9 + $0x80] sm:$0xff] }
 0xdd6   :  { %v1139_v18 = vrot.slane %v1138_v51, 1  ;;  %v1203_v28 = vrot.slane %v1202_v50, 4  ;;  %v1235_v36 = vmax.f32 %v6242_v59, %v6033_v6  ;;  %v6247_v19 = vpop.permute.xlu1 %1995  ;;  %4174 = vmatprep.subr.mxu0 %v4377_v1  ;;  %4215 = vmatprep.subr.mxu1 %v4377_v1 }
 0xdd7   :  { %v1256_v17 = vpop.permute.xlu0 %1255  ;;  %4175 = vmatpush3.msra.mxu0 %v3144_v21  ;;  %4216 = vmatpush3.msra.mxu1 %v3125_v29  ;;  %vm1999_vm4 = vcmp.eq.s32.totalorder %v6247_v19, 1 }
 0xdd8   :  { %v1140_v56 = vmax.f32 %v1138_v51, %v1139_v18  ;;  %v1204_v25 = vmax.f32 %v1202_v50, %v1203_v28  ;;  %vm1263_vm0 = vcmp.eq.s32.totalorder %v1256_v17, 1  ;;  %4176 = vmatprep.subr.mxu0 %v4377_v1  ;;  %v3124_v18 = vld [vmem:[%s6669_s9 + $0x18] sm:$0xff]  ;;  %4217 = vmatprep.subr.mxu1 %v4377_v1  ;;  %v3139_v17 = vld [vmem:[%s6669_s9 + $0x90] sm:$0xff] }
 0xdd9   :  { %v1266_v46 = vsel %vm1263_vm0, %v5036_v8, -1e+30  ;;  %4177 = vmatpush3.msra.mxu0 %v3143_v33  ;;  %4218 = vmatpush3.msra.mxu1 %v3124_v18  ;;  %vm2125_vm0 = vcmp.eq.s32.totalorder %v6143_v53, 1 }
 0xdda   :  { %v1141_v20 = vsel %vm1104_vm14, %v1140_v56, 0.0  ;;  %v1205_v5 = vrot.slane %v1204_v25, 2  ;;  %v1269_v35 = vmax.f32 %v1266_v46, %v1267_v58  ;;  %v6273_v34 = vpop.permute.xlu1 %2029  ;;  %4178 = vmatprep.subr.mxu0 %v4377_v1  ;;  %v3123_v56 = vld [vmem:[%s6669_s9 + $0x10] sm:$0xff]  ;;  %4219 = vmatprep.subr.mxu1 %v4377_v1 }
 0xddb   :  { %1142 = vst [vmem:[#allocation2] sm:$0x2] %v1141_v20  ;;  %v1290_v27 = vpop.permute.xlu0 %1289  ;;  %4179 = vmatpush3.msra.mxu0 %v3142_v55  ;;  %4220 = vmatpush3.msra.mxu1 %v3123_v56 }
 0xddc   :  { %v1206_v7 = vmax.f32 %v1204_v25, %v1205_v5  ;;  %v1270_v57 = vmax.f32 %v1269_v35, %v1268_v26  ;;  %vm1297_vm10 = vcmp.eq.s32.totalorder %v1290_v27, 1  ;;  %4180 = vmatprep.subr.mxu0 %v4377_v1  ;;  %v1335_v25 = vsel %vm1332_vm5, %v5005_v15, -1e+30  ;;  %v3122_v15 = vld [vmem:[%s6669_s9 + $0x8] sm:$0xff]  ;;  %4221 = vmatprep.subr.mxu1 %v4377_v1 }
 0xddd   :  { %v6295_v43 = vsel %vm1297_vm10, %v5036_v8, -1e+30  ;;  %4181 = vmatpush3.msra.mxu0 %v3141_v47  ;;  %4222 = vmatpush3.msra.mxu1 %v3122_v15  ;;  %vm2156_vm10 = vcmp.eq.s32.totalorder %v6163_v42, 1  ;;  %vm2033_vm5 = vcmp.eq.s32.totalorder %v6273_v34, 1 }
 0xdde   :  { %v1207_v0 = vrot.slane %v1206_v7, 1  ;;  %v1271_v51 = vrot.slane %v1270_v57, 4  ;;  %v1303_v50 = vmax.f32 %v6295_v43, %v6058_v32  ;;  %v6300_v2 = vpop.permute.xlu1 %2060  ;;  %4182 = vmatprep.subr.mxu0 %v4377_v1  ;;  %4223 = vmatprep.subr.mxu1 %v4377_v1 }
 0xddf   :  { %v1324_v28 = vpop.permute.xlu0 %1323  ;;  %4183 = vmatpush3.msra.mxu0 %v3140_v30  ;;  %4224 = vmatpush3.msra.mxu1 %v3121_v11 }
 0xde0   :  { %v1208_v21 = vmax.f32 %v1206_v7, %v1207_v0  ;;  %v1272_v49 = vmax.f32 %v1270_v57, %v1271_v51  ;;  %vm1331_vm11 = vcmp.eq.s32.totalorder %v1324_v28, 1  ;;  %4184 = vmatprep.subr.mxu0 %v4377_v1 }
 0xde1   :  { %v1334_v33 = vsel %vm1331_vm11, %v5036_v8, -1e+30  ;;  %v1336_v8 = vsel %vm1333_vm1, %v4984_v9, -1e+30  ;;  %4185 = vmatpush3.msra.mxu0 %v3139_v17  ;;  %vm2064_vm11 = vcmp.eq.s32.totalorder %v6300_v2, 1 }
 0xde2   :  { %v1209_v12 = vsel %vm1104_vm14, %v1208_v21, 0.0  ;;  %v1273_v58 = vrot.slane %v1272_v49, 2  ;;  %v1337_v46 = vmax.f32 %v1334_v33, %v1335_v25  ;;  %v6325_v20 = vpop.permute.xlu1 %2091  ;;  %4186 = vmatprep.subr.mxu0 %v4377_v1  ;;  %v2067_v53 = vsel %vm2064_vm11, %v5336_v60, -1e+30 }
 0xde3   :  { %1210 = vst [vmem:[#allocation2] sm:$0x8] %v1209_v12  ;;  %v1089_v5 = vpop.permute.xlu0 %1088  ;;  %4187 = vmatpush3.msra.mxu0 %v3138_v31 }
 0xde4   :  { %v1274_v35 = vmax.f32 %v1272_v49, %v1273_v58  ;;  %v1338_v55 = vmax.f32 %v1337_v46, %v1336_v8  ;;  %vm1092_vm6 = vcmp.eq.s32.totalorder %v1089_v5, 1  ;;  %4188 = vmatprep.subr.mxu0 %v4377_v1 }
 0xde5   :  { %v1095_v26 = vsel %vm1092_vm6, %v4984_v9, -1e+30  ;;  %4189 = vmatpush3.msra.mxu0 %v3137_v10 }
 0xde6   :  { %v1275_v27 = vrot.slane %v1274_v35, 1  ;;  %v1339_v7 = vrot.slane %v1338_v55, 4  ;;  %v1097_v57 = vmax.f32 %v1096_v40, %v1095_v26  ;;  %v6350_v47 = vpop.permute.xlu1 %2122  ;;  %4228 = vmatprep.subr.mxu0 %v4377_v1 }
 0xde7   :  { %v1160_v29 = vpop.permute.xlu0 %1159 }
 0xde8   :  { %v1276_v0 = vmax.f32 %v1274_v35, %v1275_v27  ;;  %v1340_v51 = vmax.f32 %v1338_v55, %v1339_v7  ;;  %v1098_v30 = vrot.slane %v1097_v57, 4  ;;  %vm1163_vm15 = vcmp.eq.s32.totalorder %v1160_v29, 1 }
 0xde9   :  { %v1166_v40 = vsel %vm1163_vm15, %v4984_v9, -1e+30  ;;  %vm2011_vm15 = vcmp.gt.f32.partialorder %v6114_v61, 0.0 }
 0xdea   :  { %v1277_v18 = vsel %vm1104_vm14, %v1276_v0, 0.0  ;;  %v1341_v13 = vrot.slane %v1340_v51, 2  ;;  %v1099_v52 = vmax.f32 %v1097_v57, %v1098_v30  ;;  %v6358_v28 = vpop.permute.xlu1 %2153  ;;  %v1168_v21 = vmax.f32 %v1167_v44, %v1166_v40 }
 0xdeb   :  { %1278 = vst [vmem:[#allocation2] sm:$0x20] %v1277_v18  ;;  %v1228_v49 = vpop.permute.xlu0 %1227 }
 0xdec   :  { %v1342_v17 = vmax.f32 %v1340_v51, %v1341_v13  ;;  %v1100_v56 = vrot.slane %v1099_v52, 2  ;;  %vm1231_vm7 = vcmp.eq.s32.totalorder %v1228_v49, 1  ;;  %v1169_v25 = vrot.slane %v1168_v21, 4 }
 0xded   :  { %v1234_v33 = vsel %vm1231_vm7, %v4984_v9, -1e+30  ;;  %vm2187_vm7 = vcmp.eq.s32.totalorder %v6197_v41, 1 }
 0xdee   :  { %v1343_v12 = vrot.slane %v1342_v17, 1  ;;  %v1101_v58 = vmax.f32 %v1099_v52, %v1100_v56  ;;  %v1236_v46 = vmax.f32 %v1235_v36, %v1234_v33  ;;  %v6367_v31 = vpop.permute.xlu1 %2184  ;;  %v1170_v15 = vmax.f32 %v1168_v21, %v1169_v25 }
 0xdef   :  { %v1296_v8 = vpop.permute.xlu0 %1295  ;;  %v2035_v36 = vsel %vm2032_vm9, %v5360_v38, -1e+30  ;;  %v6403_v25 = vsel %vm2125_vm0, %v5360_v38, -1e+30  ;;  %v6408_v33 = vsel %vm2156_vm10, %v5360_v38, -1e+30 }
 0xdf0   :  { %v1344_v16 = vmax.f32 %v1342_v17, %v1343_v12  ;;  %v1102_v45 = vrot.slane %v1101_v58, 1  ;;  %v1237_v44 = vrot.slane %v1236_v46, 4  ;;  %v1171_v5 = vrot.slane %v1170_v15, 2 }
 0xdf1   :  { %vm1299_vm2 = vcmp.eq.s32.totalorder %v1296_v8, 1  ;;  %v2036_v12 = vsel %vm2033_vm5, %v5336_v60, -1e+30  ;;  %vm2157_vm0 = vcmp.eq.s32.totalorder %v6358_v28, 1  ;;  %vm2188_vm11 = vcmp.eq.s32.totalorder %v6367_v31, 1 }
 0xdf2   :  { %v1345_v35 = vsel %vm1104_vm14, %v1344_v16, 0.0  ;;  %v1103_v55 = vmax.f32 %v1101_v58, %v1102_v45  ;;  %v1238_v10 = vmax.f32 %v1236_v46, %v1237_v44  ;;  %v1302_v6 = vsel %vm1299_vm2, %v4984_v9, -1e+30  ;;  %v6374_v59 = vpop.permute.xlu1 %2215 }
 0xdf3   :  { %1346 = vst [vmem:[#allocation2] sm:$0x80] %v1345_v35  ;;  %v1172_v3 = vmax.f32 %v1170_v15, %v1171_v5  ;;  %v1304_v11 = vmax.f32 %v1303_v50, %v1302_v6  ;;  %v1990_v26 = vpop.permute.xlu0 %1989  ;;  %v2066_v9 = vsel %vm2063_vm8, %v5360_v38, -1e+30  ;;  %v2002_v50 = vsel %vm1999_vm4, %v5336_v60, -1e+30 }
 0xdf4   :  { %v1107_v27 = vsel %vm1104_vm14, %v1103_v55, 0.0  ;;  %v1239_v7 = vrot.slane %v1238_v10, 2  ;;  %vm1997_vm13 = vcmp.eq.s32.totalorder %v1990_v26, 1  ;;  %vm2095_vm8 = vcmp.eq.s32.totalorder %v6325_v20, 1 }
 0xdf5   :  { %1108 = vst [vmem:[#allocation2] sm:$0x1] %v1107_v27  ;;  %v1173_v57 = vrot.slane %v1172_v3, 1  ;;  %v1305_v29 = vrot.slane %v1304_v11, 4  ;;  %v2000_v0 = vsel %vm1997_vm13, %v5385_v62, -1e+30 }
 0xdf6   :  { %v1240_v32 = vmax.f32 %v1238_v10, %v1239_v7  ;;  %v2003_v19 = vmax.f32 %v2000_v0, %v6121_v23  ;;  %v6390_v43 = vpop.permute.xlu1 %2875  ;;  %vm2126_vm13 = vcmp.eq.s32.totalorder %v6350_v47, 1  ;;  %v2098_v37 = vsel %vm2095_vm8, %v5336_v60, -1e+30 }
 0xdf7   :  { %v1174_v14 = vmax.f32 %v1172_v3, %v1173_v57  ;;  %v1306_v51 = vmax.f32 %v1304_v11, %v1305_v29  ;;  %v2024_v30 = vpop.permute.xlu0 %2023 }
 0xdf8   :  { %v1241_v18 = vrot.slane %v1240_v32, 1  ;;  %v2004_v13 = vmax.f32 %v2003_v19, %v2002_v50  ;;  %vm2031_vm1 = vcmp.eq.s32.totalorder %v2024_v30, 1  ;;  %v2129_v30 = vsel %vm2126_vm13, %v5336_v60, -1e+30 }
 0xdf9   :  { %v1175_v52 = vsel %vm1104_vm14, %v1174_v14, 0.0  ;;  %v1307_v23 = vrot.slane %v1306_v51, 2  ;;  %v2034_v40 = vsel %vm2031_vm1, %v5385_v62, -1e+30 }
 0xdfa   :  { %1176 = vst [vmem:[#allocation2] sm:$0x4] %v1175_v52  ;;  %v1242_v21 = vmax.f32 %v1240_v32, %v1241_v18  ;;  %v2005_v49 = vrot.slane %v2004_v13, 4  ;;  %v2037_v17 = vmax.f32 %v2034_v40, %v2035_v36  ;;  %v2910_v56 = vpop.permute.xlu1 %2909  ;;  %v6437_v32 = vsel %vm2187_vm7, %v5360_v38, -1e+30 }
 0xdfb   :  { %v1308_v58 = vmax.f32 %v1306_v51, %v1307_v23  ;;  %v2055_v46 = vpop.permute.xlu0 %2054  ;;  %vm2917_vm6 = vcmp.eq.s32.totalorder %v2910_v56, 1 }
 0xdfc   :  { %v1243_v15 = vsel %vm1104_vm14, %v1242_v21, 0.0  ;;  %v2006_v8 = vmax.f32 %v2004_v13, %v2005_v49  ;;  %v2038_v16 = vmax.f32 %v2037_v17, %v2036_v12  ;;  %vm2062_vm9 = vcmp.eq.s32.totalorder %v2055_v46, 1 }
 0xdfd   :  { %1244 = vst [vmem:[#allocation2] sm:$0x10] %v1243_v15  ;;  %v1309_v42 = vrot.slane %v1308_v58, 1  ;;  %v2065_v44 = vsel %vm2062_vm9, %v5385_v62, -1e+30  ;;  %vm2219_vm9 = vcmp.eq.s32.totalorder %v6374_v59, 1 }
 0xdfe   :  { %v2007_v34 = vrot.slane %v2006_v8, 2  ;;  %v2039_v45 = vrot.slane %v2038_v16, 4  ;;  %v2913_v5 = vpop.permute.xlu1 %2912  ;;  %v6423_v55 = vsel %vm2917_vm6, %v6003_v4, -1e+30  ;;  %v2068_v10 = vmax.f32 %v2065_v44, %v2066_v9 }
 0xdff   :  { %v1310_v35 = vmax.f32 %v1308_v58, %v1309_v42  ;;  %vm2918_vm2 = vcmp.eq.s32.totalorder %v2913_v5, 1  ;;  %v2086_v6 = vpop.permute.xlu0 %2085  ;;  %v2160_v44 = vsel %vm2157_vm0, %v5336_v60, -1e+30 }
 0xe00   :  { %v2008_v36 = vmax.f32 %v2006_v8, %v2007_v34  ;;  %v2040_v2 = vmax.f32 %v2038_v16, %v2039_v45  ;;  %v6426_v3 = vsel %vm2918_vm2, %v5988_v22, -1e+30  ;;  %vm2093_vm4 = vcmp.eq.s32.totalorder %v2086_v6, 1 }
 0xe01   :  { %v1311_v11 = vsel %vm1104_vm14, %v1310_v35, 0.0  ;;  %v2069_v26 = vmax.f32 %v2068_v10, %v2067_v53  ;;  %v2923_v27 = vmax.f32 %v6423_v55, %v6426_v3  ;;  %v2096_v7 = vsel %vm2093_vm4, %v5385_v62, -1e+30 }
 0xe02   :  { %1312 = vst [vmem:[#allocation2] sm:$0x40] %v1311_v11  ;;  %v2009_v9 = vrot.slane %v2008_v36, 1  ;;  %v2041_v57 = vrot.slane %v2040_v2, 2  ;;  %v2099_v29 = vmax.f32 %v2096_v7, %v2097_v48  ;;  %v2941_v0 = vpop.permute.xlu1 %2940  ;;  %vm2218_vm14 = vcmp.eq.s32.totalorder %v6220_v39, 1 }
 0xe03   :  { %v2070_v19 = vrot.slane %v2069_v26, 4  ;;  %v2117_v50 = vpop.permute.xlu0 %2116  ;;  %vm2948_vm3 = vcmp.eq.s32.totalorder %v2941_v0, 1  ;;  %v2221_v45 = vsel %vm2218_vm14, %v5360_v38, -1e+30  ;;  %vm2883_vm2 = vcmp.eq.s32.totalorder %v6390_v43, 1 }
 0xe04   :  { %v2010_v14 = vmax.f32 %v2008_v36, %v2009_v9  ;;  %v2042_v47 = vmax.f32 %v2040_v2, %v2041_v57  ;;  %v2100_v51 = vmax.f32 %v2099_v29, %v2098_v37  ;;  %vm2124_vm10 = vcmp.eq.s32.totalorder %v2117_v50, 1 }
 0xe05   :  { %v2071_v18 = vmax.f32 %v2069_v26, %v2070_v19  ;;  %v2127_v20 = vsel %vm2124_vm10, %v5385_v62, -1e+30  ;;  %v6449_v40 = vsel %vm2948_vm3, %v6003_v4, -1e+30 }
 0xe06   :  { %v2014_v41 = vsel %vm2011_vm15, %v2010_v14, 0.0  ;;  %v2043_v13 = vrot.slane %v2042_v47, 1  ;;  %v2101_v48 = vrot.slane %v2100_v51, 4  ;;  %v2944_v52 = vpop.permute.xlu1 %2943  ;;  %v2130_v21 = vmax.f32 %v2127_v20, %v6403_v25 }
 0xe07   :  { %v2072_v23 = vrot.slane %v2071_v18, 2  ;;  %vm2949_vm5 = vcmp.eq.s32.totalorder %v2944_v52, 1  ;;  %v2148_v49 = vpop.permute.xlu0 %2147  ;;  %v2222_v52 = vsel %vm2219_vm9, %v5336_v60, -1e+30 }
 0xe08   :  { %v2044_v17 = vmax.f32 %v2042_v47, %v2043_v13  ;;  %v2102_v56 = vmax.f32 %v2100_v51, %v2101_v48  ;;  %v6453_v12 = vsel %vm2949_vm5, %v5988_v22, -1e+30  ;;  %vm2155_vm1 = vcmp.eq.s32.totalorder %v2148_v49, 1 }
 0xe09   :  { %v6455_v58 = vld [vmem:[#allocation2] sm:$0xff]  ;;  %v2073_v46 = vmax.f32 %v2071_v18, %v2072_v23  ;;  %v2131_v15 = vmax.f32 %v2130_v21, %v2129_v30  ;;  %v2954_v8 = vmax.f32 %v6449_v40, %v6453_v12  ;;  %v2158_v16 = vsel %vm2155_vm1, %v5385_v62, -1e+30 }
 0xe0a   :  { %2015 = vst [vmem:[#allocation2] sm:$0x1] %v2014_v41  ;;  %v2045_v25 = vsel %vm2011_vm15, %v2044_v17, 0.0  ;;  %v2103_v53 = vrot.slane %v2102_v56, 2  ;;  %v2161_v42 = vmax.f32 %v2158_v16, %v6408_v33  ;;  %v2972_v34 = vpop.permute.xlu1 %2971  ;;  %v2191_v33 = vsel %vm2188_vm11, %v5336_v60, -1e+30 }
 0xe0b   :  { %2046 = vst [vmem:[#allocation2] sm:$0x2] %v2045_v25  ;;  %v2074_v5 = vrot.slane %v2073_v46, 1  ;;  %v2132_v35 = vrot.slane %v2131_v15, 4  ;;  %v2179_v10 = vpop.permute.xlu0 %2178  ;;  %vm2979_vm6 = vcmp.eq.s32.totalorder %v2972_v34, 1 }
 0xe0c   :  { %v2104_v6 = vmax.f32 %v2102_v56, %v2103_v53  ;;  %v2162_v36 = vmax.f32 %v2161_v42, %v2160_v44  ;;  %vm2186_vm7 = vcmp.eq.s32.totalorder %v2179_v10, 1  ;;  %v6479_v29 = vsel %vm2979_vm6, %v6003_v4, -1e+30 }
 0xe0d   :  { %v2075_v2 = vmax.f32 %v2073_v46, %v2074_v5  ;;  %v2133_v11 = vmax.f32 %v2131_v15, %v2132_v35  ;;  %v2189_v38 = vsel %vm2186_vm7, %v5385_v62, -1e+30  ;;  %v2886_v49 = vsel %vm2883_vm2, %v6003_v4, -1e+30 }
 0xe0e   :  { %v2105_v39 = vrot.slane %v2104_v6, 1  ;;  %v2163_v28 = vrot.slane %v2162_v36, 4  ;;  %v2192_v26 = vmax.f32 %v2189_v38, %v6437_v32  ;;  %v2975_v7 = vpop.permute.xlu1 %2974 }
 0xe0f   :  { %v2076_v9 = vsel %vm2011_vm15, %v2075_v2, 0.0  ;;  %v2134_v57 = vrot.slane %v2133_v11, 2  ;;  %vm2980_vm8 = vcmp.eq.s32.totalorder %v2975_v7, 1  ;;  %v2210_v31 = vpop.permute.xlu0 %2209 }
 0xe10   :  { %2077 = vst [vmem:[#allocation2] sm:$0x4] %v2076_v9  ;;  %v2106_v0 = vmax.f32 %v2104_v6, %v2105_v39  ;;  %v2164_v37 = vmax.f32 %v2162_v36, %v2163_v28  ;;  %v2193_v19 = vmax.f32 %v2192_v26, %v2191_v33  ;;  %v6482_v50 = vsel %vm2980_vm8, %v5988_v22, -1e+30 }
 0xe11   :  { %v2135_v32 = vmax.f32 %v2133_v11, %v2134_v57  ;;  %v2985_v14 = vmax.f32 %v6479_v29, %v6482_v50  ;;  %vm2217_vm4 = vcmp.eq.s32.totalorder %v2210_v31, 1 }
 0xe12   :  { %v2107_v47 = vsel %vm2011_vm15, %v2106_v0, 0.0  ;;  %v2165_v51 = vrot.slane %v2164_v37, 2  ;;  %v2194_v30 = vrot.slane %v2193_v19, 4  ;;  %v2220_v18 = vsel %vm2217_vm4, %v5385_v62, -1e+30  ;;  %v3006_v41 = vpop.permute.xlu1 %3005 }
 0xe13   :  { %2108 = vst [vmem:[#allocation2] sm:$0x8] %v2107_v47  ;;  %v2136_v13 = vrot.slane %v2135_v32, 1  ;;  %v2223_v48 = vmax.f32 %v2220_v18, %v2221_v45  ;;  %v2879_v20 = vpop.permute.xlu0 %2878  ;;  %vm3011_vm14 = vcmp.eq.s32.totalorder %v3006_v41, 1  ;;  %vm2897_vm4 = vcmp.gt.f32.partialorder %v6134_v54, 0.0 }
 0xe14   :  { %v2166_v23 = vmax.f32 %v2164_v37, %v2165_v51  ;;  %v2195_v21 = vmax.f32 %v2193_v19, %v2194_v30  ;;  %vm2884_vm13 = vcmp.eq.s32.totalorder %v2879_v20, 1  ;;  %v6500_v45 = vsel %vm3011_vm14, %v5988_v22, -1e+30 }
 0xe15   :  { %v2137_v17 = vmax.f32 %v2135_v32, %v2136_v13  ;;  %v2224_v56 = vmax.f32 %v2223_v48, %v2222_v52  ;;  %v2887_v62 = vsel %vm2884_vm13, %v5988_v22, -1e+30 }
 0xe16   :  { %v2167_v46 = vrot.slane %v2166_v23, 1  ;;  %v2196_v15 = vrot.slane %v2195_v21, 2  ;;  %v2889_v16 = vmax.f32 %v2886_v49, %v2887_v62  ;;  %v3037_v25 = vpop.permute.xlu1 %3036 }
 0xe17   :  { %v2138_v59 = vsel %vm2011_vm15, %v2137_v17, 0.0  ;;  %v2225_v60 = vrot.slane %v2224_v56, 4  ;;  %v3003_v53 = vpop.permute.xlu0 %3002  ;;  %vm3042_vm0 = vcmp.eq.s32.totalorder %v3037_v25, 1 }
 0xe18   :  { %2139 = vst [vmem:[#allocation2] sm:$0x10] %v2138_v59  ;;  %v2168_v42 = vmax.f32 %v2166_v23, %v2167_v46  ;;  %v2197_v34 = vmax.f32 %v2195_v21, %v2196_v15  ;;  %vm3010_vm3 = vcmp.eq.s32.totalorder %v3003_v53, 1  ;;  %v6510_v38 = vsel %vm3042_vm0, %v5988_v22, -1e+30 }
 0xe19   :  { %v2226_v43 = vmax.f32 %v2224_v56, %v2225_v60  ;;  %v6503_v44 = vsel %vm3010_vm3, %v6003_v4, -1e+30 }
 0xe1a   :  { %v2169_v5 = vsel %vm2011_vm15, %v2168_v42, 0.0  ;;  %v2198_v35 = vrot.slane %v2197_v34, 1  ;;  %v3016_v10 = vmax.f32 %v6503_v44, %v6500_v45  ;;  %v3068_v6 = vpop.permute.xlu1 %3067 }
 0xe1b   :  { %2170 = vst [vmem:[#allocation2] sm:$0x20] %v2169_v5  ;;  %v2227_v36 = vrot.slane %v2226_v43, 2  ;;  %v3034_v33 = vpop.permute.xlu0 %3033  ;;  %vm3073_vm5 = vcmp.eq.s32.totalorder %v3068_v6, 1 }
 0xe1c   :  { %v2199_v2 = vmax.f32 %v2197_v34, %v2198_v35  ;;  %vm3041_vm10 = vcmp.eq.s32.totalorder %v3034_v33, 1  ;;  %v6520_v0 = vsel %vm3073_vm5, %v5988_v22, -1e+30 }
 0xe1d   :  { %v2228_v11 = vmax.f32 %v2226_v43, %v2227_v36  ;;  %v6513_v39 = vsel %vm3041_vm10, %v6003_v4, -1e+30 }
 0xe1e   :  { %v2200_v28 = vsel %vm2011_vm15, %v2199_v2, 0.0  ;;  %v3047_v26 = vmax.f32 %v6513_v39, %v6510_v38  ;;  %v3099_v7 = vpop.permute.xlu1 %3098 }
 0xe1f   :  { %2201 = vst [vmem:[#allocation2] sm:$0x40] %v2200_v28  ;;  %v2229_v9 = vrot.slane %v2228_v11, 1  ;;  %v3065_v57 = vpop.permute.xlu0 %3064  ;;  %vm3104_vm11 = vcmp.eq.s32.totalorder %v3099_v7, 1 }
 0xe20   :  { %vm3072_vm1 = vcmp.eq.s32.totalorder %v3065_v57, 1  ;;  %v3107_v18 = vsel %vm3104_vm11, %v5988_v22, -1e+30 }
 0xe21   :  { %v2230_v31 = vmax.f32 %v2228_v11, %v2229_v9  ;;  %v6523_v37 = vsel %vm3072_vm1, %v6003_v4, -1e+30 }
 0xe22   :  { %v3078_v19 = vmax.f32 %v6523_v37, %v6520_v0  ;;  %v2882_v32 = vpop.permute.xlu1 %2881 }
 0xe23   :  { %v2231_v47 = vsel %vm2011_vm15, %v2230_v31, 0.0  ;;  %vm2885_vm6 = vcmp.eq.s32.totalorder %v2882_v32, 1  ;;  %v3096_v51 = vpop.permute.xlu0 %3095 }
 0xe24   :  { %2232 = vst [vmem:[#allocation2] sm:$0x80] %v2231_v47  ;;  %v2888_v30 = vsel %vm2885_vm6, %v5973_v63, -1e+30  ;;  %vm3103_vm7 = vcmp.eq.s32.totalorder %v3096_v51, 1 }
 0xe25   :  { %v2890_v41 = vmax.f32 %v2889_v16, %v2888_v30  ;;  %v3106_v13 = vsel %vm3103_vm7, %v6003_v4, -1e+30 }
 0xe26   :  { %v3109_v48 = vmax.f32 %v3106_v13, %v3107_v18  ;;  %v2916_v20 = vpop.permute.xlu1 %2915 }
 0xe27   :  { %v2891_v52 = vrot.slane %v2890_v41, 4  ;;  %vm2919_vm9 = vcmp.eq.s32.totalorder %v2916_v20, 1  ;;  %v3102_v23 = vpop.permute.xlu0 %3101 }
 0xe28   :  { %v2922_v21 = vsel %vm2919_vm9, %v5973_v63, -1e+30  ;;  %vm3105_vm8 = vcmp.eq.s32.totalorder %v3102_v23, 1 }
 0xe29   :  { %v2892_v61 = vmax.f32 %v2890_v41, %v2891_v52  ;;  %v2924_v49 = vmax.f32 %v2923_v27, %v2922_v21  ;;  %v3108_v17 = vsel %vm3105_vm8, %v5973_v63, -1e+30 }
 0xe2a   :  { %v3110_v56 = vmax.f32 %v3109_v48, %v3108_v17  ;;  %v2947_v22 = vpop.permute.xlu1 %2946 }
 0xe2b   :  { %v2893_v62 = vrot.slane %v2892_v61, 2  ;;  %v2925_v46 = vrot.slane %v2924_v49, 4  ;;  %vm2950_vm15 = vcmp.eq.s32.totalorder %v2947_v22, 1 }
 0xe2c   :  { %v3111_v4 = vrot.slane %v3110_v56, 4  ;;  %v2953_v15 = vsel %vm2950_vm15, %v5973_v63, -1e+30 }
 0xe2d   :  { %v2894_v16 = vmax.f32 %v2892_v61, %v2893_v62  ;;  %v2926_v25 = vmax.f32 %v2924_v49, %v2925_v46  ;;  %v2955_v59 = vmax.f32 %v2954_v8, %v2953_v15  ;;  %v6546_v8 = vld [vmem:[#allocation2] sm:$0xff]  ;;  %v2863_v62 = vmax.f32 %v6134_v54, 1.0  ;;  %v3316_v54 = vld [vmem:[%s6671_s11 + $0x70] sm:$0xff] }
 0xe2e   :  { %v3112_v60 = vmax.f32 %v3110_v56, %v3111_v4  ;;  %v2978_v53 = vpop.permute.xlu1 %2977 }
 0xe2f   :  { %v2895_v55 = vrot.slane %v2894_v16, 1  ;;  %v2927_v3 = vrot.slane %v2926_v25, 2  ;;  %v2956_v27 = vrot.slane %v2955_v59, 4  ;;  %vm2981_vm2 = vcmp.eq.s32.totalorder %v2978_v53, 1 }
 0xe30   :  { %v3113_v42 = vrot.slane %v3112_v60, 2  ;;  %v2984_v34 = vsel %vm2981_vm2, %v5973_v63, -1e+30  ;;  %4319 = vrcp.f32 %v2863_v62 }
 0xe31   :  { %v2896_v43 = vmax.f32 %v2894_v16, %v2895_v55  ;;  %v2928_v5 = vmax.f32 %v2926_v25, %v2927_v3  ;;  %v2957_v35 = vmax.f32 %v2955_v59, %v2956_v27  ;;  %v2986_v6 = vmax.f32 %v2985_v14, %v2984_v34 }
 0xe32   :  { %v3114_v40 = vmax.f32 %v3112_v60, %v3113_v42  ;;  %v3009_v12 = vpop.permute.xlu1 %3008  ;;  %v2234_v34 = vadd.f32 %v6546_v8, %v6455_v58  ;;  %v3314_v58 = vld [vmem:[%s6671_s11 + $0x60] sm:$0xff]  ;;  %v3312_v8 = vld [vmem:[%s6671_s11 + $0x50] sm:$0xff] }
 0xe33   :  { %v2900_v36 = vsel %vm2897_vm4, %v2896_v43, 0.0  ;;  %v2929_v33 = vrot.slane %v2928_v5, 1  ;;  %v2958_v2 = vrot.slane %v2957_v35, 2  ;;  %v2987_v11 = vrot.slane %v2986_v6, 4 }
 0xe34   :  { %2901 = vst [vmem:[#allocation2] sm:$0x1] %v2900_v36  ;;  %v3115_v28 = vrot.slane %v3114_v40, 1  ;;  %vm3012_vm13 = vcmp.eq.s32.totalorder %v3009_v12, 1  ;;  %v3313_v12 = vld [vmem:[%s6671_s11 + $0x58] sm:$0xff]  ;;  %v3311_v36 = vld [vmem:[%s6671_s11 + $0x48] sm:$0xff] }
 0xe35   :  { %v2930_v7 = vmax.f32 %v2928_v5, %v2929_v33  ;;  %v2959_v9 = vmax.f32 %v2957_v35, %v2958_v2  ;;  %v2988_v57 = vmax.f32 %v2986_v6, %v2987_v11  ;;  %v3015_v29 = vsel %vm3012_vm13, %v5973_v63, -1e+30  ;;  %v3310_v33 = vld [vmem:[%s6671_s11 + $0x40] sm:$0xff]  ;;  %v3309_v2 = vld [vmem:[%s6671_s11 + $0x38] sm:$0xff]  ;;  %v3308_v11 = vld [vmem:[%s6671_s11 + $0x30] sm:$0xff] }
 0xe36   :  { %v3116_v50 = vmax.f32 %v3114_v40, %v3115_v28  ;;  %v3017_v14 = vmax.f32 %v3016_v10, %v3015_v29  ;;  %v3040_v31 = vpop.permute.xlu1 %3039  ;;  %v3317_v40 = vld [vmem:[%s6671_s11 + $0x78] sm:$0xff]  ;;  %v3307_v28 = vld [vmem:[%s6671_s11 + $0x28] sm:$0xff] }
 0xe37   :  { %v2931_v32 = vsel %vm2897_vm4, %v2930_v7, 0.0  ;;  %v2960_v47 = vrot.slane %v2959_v9, 1  ;;  %v2989_v51 = vrot.slane %v2988_v57, 2  ;;  %vm3043_vm14 = vcmp.eq.s32.totalorder %v3040_v31, 1  ;;  %v3306_v7 = vld [vmem:[%s6671_s11 + $0x20] sm:$0xff]  ;;  %v3303_v29 = vld [vmem:[%s6671_s11 + $0x8] sm:$0xff] }
 0xe38   :  { %2932 = vst [vmem:[#allocation2] sm:$0x2] %v2931_v32  ;;  %v3117_v30 = vsel %vm2897_vm4, %v3116_v50, 0.0  ;;  %v3018_v18 = vrot.slane %v3017_v14, 4  ;;  %v3046_v41 = vsel %vm3043_vm14, %v5973_v63, -1e+30 }
 0xe39   :  { %3118 = vst [vmem:[#allocation2] sm:$0x80] %v3117_v30  ;;  %v2961_v13 = vmax.f32 %v2959_v9, %v2960_v47  ;;  %v2990_v48 = vmax.f32 %v2988_v57, %v2989_v51  ;;  %v3048_v45 = vmax.f32 %v3047_v26, %v3046_v41  ;;  %v3305_v9 = vld [vmem:[%s6671_s11 + $0x18] sm:$0xff]  ;;  %v3304_v57 = vld [vmem:[%s6671_s11 + $0x10] sm:$0xff]  ;;  %v3302_v50 = vld [vmem:[%s6671_s11] sm:$0xff] }
 0xe3a   :  { %v3019_v44 = vmax.f32 %v3017_v14, %v3018_v18  ;;  %v3071_v10 = vpop.permute.xlu1 %3070  ;;  %v3531_v32 = vld [vmem:[%s6670_s10] ss:$0 sm:$0xff] }
 0xe3b   :  { %v2962_v20 = vsel %vm2897_vm4, %v2961_v13, 0.0  ;;  %v2991_v52 = vrot.slane %v2990_v48, 1  ;;  %v3049_v23 = vrot.slane %v3048_v45, 4  ;;  %vm3074_vm3 = vcmp.eq.s32.totalorder %v3071_v10, 1  ;;  %v3532_v13 = vld [vmem:[%s6672_s12] ss:$0 sm:$0xff] }
 0xe3c   :  { %2963 = vst [vmem:[#allocation2] sm:$0x4] %v2962_v20  ;;  %v3020_v21 = vrot.slane %v3019_v44, 2  ;;  %v3077_v61 = vsel %vm3074_vm3, %v5973_v63, -1e+30 }
 0xe3d   :  { %v2992_v49 = vmax.f32 %v2990_v48, %v2991_v52  ;;  %v3050_v17 = vmax.f32 %v3048_v45, %v3049_v23  ;;  %v3079_v56 = vmax.f32 %v3078_v19, %v3077_v61  ;;  %v4320_v3 = vpop.eup %4319  ;;  %v3409_v23 = vstv %s6674_s14 }
 0xe3e   :  { %v3021_v38 = vmax.f32 %v3019_v44, %v3020_v21 }
 0xe3f   :  { %v2993_v39 = vsel %vm2897_vm4, %v2992_v49, 0.0  ;;  %v3051_v26 = vrot.slane %v3050_v17, 2  ;;  %v3080_v22 = vrot.slane %v3079_v56, 4 }
 0xe40   :  { %2994 = vst [vmem:[#allocation2] sm:$0x8] %v2993_v39  ;;  %v3022_v46 = vrot.slane %v3021_v38, 1 }
 0xe41   :  { %v3052_v4 = vmax.f32 %v3050_v17, %v3051_v26  ;;  %v3081_v15 = vmax.f32 %v3079_v56, %v3080_v22 }
 0xe42   :  { %v3023_v16 = vmax.f32 %v3021_v38, %v3022_v46 }
 0xe43   :  { %v3053_v63 = vrot.slane %v3052_v4, 1  ;;  %v3082_v25 = vrot.slane %v3081_v15, 2 }
 0xe44   :  { %v3024_v0 = vsel %vm2897_vm4, %v3023_v16, 0.0 }
 0xe45   :  { %3025 = vst [vmem:[#allocation2] sm:$0x10] %v3024_v0  ;;  %v3054_v37 = vmax.f32 %v3052_v4, %v3053_v63  ;;  %v3083_v19 = vmax.f32 %v3081_v15, %v3082_v25 }
 0xe47   :  { %v3055_v59 = vsel %vm2897_vm4, %v3054_v37, 0.0  ;;  %v3084_v60 = vrot.slane %v3083_v19, 1 }
 0xe48   :  { %3056 = vst [vmem:[#allocation2] sm:$0x20] %v3055_v59 }
 0xe49   :  { %v3085_v53 = vmax.f32 %v3083_v19, %v3084_v60 }
 0xe4b   :  { %v3086_v55 = vsel %vm2897_vm4, %v3085_v53, 0.0 }
 0xe4c   :  { %3087 = vst [vmem:[#allocation2] sm:$0x40] %v3086_v55 }
 0xe51   :  { %v2859_v27 = vpop.f32.mrf.mxu1 }
 0xe52   :  { %v2866_v42 = vmul.f32 %v4320_v3, %v2859_v27 }
 0xe53   :  { %v4157_v43 = vpop.f32.mrf.mxu1  ;;  %v3119_v5 = vld [vmem:[#allocation2] sm:$0xff] }
 0xe54   :  { %v2867_v35 = vadd.f32 %v2866_v42, %v6167_v24  ;;  %v3120_v6 = vadd.f32 %v3119_v5, %v2234_v34  ;;  %v3315_v24 = vld [vmem:[%s6671_s11 + $0x68] sm:$0xff] }
 0xe56   :  { %4191 = vmatmul.mubr.f32.vlgmr.msra.gmra.mxu0 %v2867_v35  ;;  %4226 = vmatmul.mubr.f32.vlgmr.msra.gmra.mxu1 %v3120_v6 }
 0xe57   :  { %4229 = vmatpush3.msra.mxu0 %v3317_v40  ;;  %4260 = vmatprep.mubr.msk.f32.mxu0 %vm6878_vm12, %v4377_v1  ;;  %vm3404_vm12 = vcmask 523264  }
 0xe58   :  { %4230 = vmatprep.subr.mxu0 %v4377_v1 }
 0xe59   :  { %4231 = vmatpush3.msra.mxu0 %v3316_v54 }
 0xe5a   :  { %4232 = vmatprep.subr.mxu0 %v4377_v1 }
 0xe5b   :  { %4233 = vmatpush3.msra.mxu0 %v3315_v24 }
 0xe5c   :  { %4234 = vmatprep.subr.mxu0 %v4377_v1 }
 0xe5d   :  { %4235 = vmatpush3.msra.mxu0 %v3314_v58 }
 0xe5e   :  { %4236 = vmatprep.subr.mxu0 %v4377_v1 }
 0xe5f   :  { %4237 = vmatpush3.msra.mxu0 %v3313_v12 }
 0xe60   :  { %4238 = vmatprep.subr.mxu0 %v4377_v1 }
 0xe61   :  { %4239 = vmatpush3.msra.mxu0 %v3312_v8 }
 0xe62   :  { %4240 = vmatprep.subr.mxu0 %v4377_v1 }
 0xe63   :  { %4241 = vmatpush3.msra.mxu0 %v3311_v36 }
 0xe64   :  { %4242 = vmatprep.subr.mxu0 %v4377_v1 }
 0xe65   :  { %4243 = vmatpush3.msra.mxu0 %v3310_v33 }
 0xe66   :  { %4244 = vmatprep.subr.mxu0 %v4377_v1 }
 0xe67   :  { %4245 = vmatpush3.msra.mxu0 %v3309_v2 }
 0xe68   :  { %4246 = vmatprep.subr.mxu0 %v4377_v1 }
 0xe69   :  { %4247 = vmatpush3.msra.mxu0 %v3308_v11 }
 0xe6a   :  { %4248 = vmatprep.subr.mxu0 %v4377_v1 }
 0xe6b   :  { %4249 = vmatpush3.msra.mxu0 %v3307_v28 }
 0xe6c   :  { %4250 = vmatprep.subr.mxu0 %v4377_v1 }
 0xe6d   :  { %4251 = vmatpush3.msra.mxu0 %v3306_v7 }
 0xe6e   :  { %4252 = vmatprep.subr.mxu0 %v4377_v1 }
 0xe6f   :  { %4253 = vmatpush3.msra.mxu0 %v3305_v9 }
 0xe70   :  { %4254 = vmatprep.subr.mxu0 %v4377_v1 }
 0xe71   :  { %4255 = vmatpush3.msra.mxu0 %v3304_v57 }
 0xe72   :  { %4256 = vmatprep.subr.mxu0 %v4377_v1 }
 0xe73   :  { %4257 = vmatpush3.msra.mxu0 %v3303_v29 }
 0xe74   :  { %4258 = vmatprep.subr.mxu0 %v4377_v1  ;;  %v3533_v1 = vld [vmem:[%s6673_s13] ss:$0 sm:$0xff] }
 0xe75   :  { %4259 = vmatpush3.msra.mxu0 %v3302_v50 }
 0xf16   :  { %v3219_v14 = vpop.f32.mrf.mxu0  ;;  %v3289_v31 = vpop.f32.mrf.mxu1 }
 0xf17   :  { %v3290_v47 = vadd.f32 %v3289_v31, %v3219_v14 }
 0xf18   :  { %v4192_v51 = vpop.f32.mrf.mxu0  ;;  %v4227_v30 = vpop.f32.mrf.mxu1 }
 0xf19   :  { %v3300_v18 = vadd.f32 %v3531_v32, %v3290_v47 }
 0xf1b   :  { %v3301_v41 = vmax.f32 %v3300_v18, 0.0 }
 0xf1d   :  { %4261 = vmatmul.mubr.f32.vlgmr.msra.gmra.mxu0 %v3301_v41 }
 0xfdd   :  { %v3391_v48 = vpop.f32.mrf.mxu0 }
 0xfde   :  { %v3392_v45 = vadd.f32 %v3532_v13, %v3391_v48 }
 0xfdf   :  { %v4262_v44 = vpop.f32.mrf.mxu0 }
 0xfe0   :  { %v3395_v10 = vmax.f32 %v3392_v45, 0.0 }
 0xfe2   :  { %v3403_v20 = vmul.f32 %v3533_v1, %v3395_v10 }
 0xfe4   :  { %v3405_v52 = vsel %vm3404_vm12, %v3403_v20, 0.0 }
 0xfe5   :  { %3406 = vadd.xlane.f32.xlu1 %v3405_v52 }
0x106e   :  { %v3407_v21 = vpop.xlane.xlu1 %3406 }
0x106f   :  { %v3410_v61 = vadd.f32 %v3409_v23, %v3407_v21 }
0x1071   :  { %v3411_v49 = vsub.f32 0.0, %v3410_v61 }
0x1073   :  { %v3412_v17 = vmul.f32 1.442695, %v3411_v49 }
0x1075   :  { %4321 = vpow2.f32 %v3412_v17 }
0x1082   :  { %v4322_v56 = vpop.eup %4321 }
0x1083   :  { %v3414_v38 = vadd.f32 1.0, %v4322_v56 }
0x1085   :  { %4323 = vrcp.f32 %v3414_v38 }
0x1092   :  { %v4324_v39 = vpop.eup %4323 }
0x1093   :  { %3417 = vst [vmem:[%s6675_s15] sm:$0xff] %v4324_v39 }
0x1094   :  { %3422 = vsyncpa [#allocation5], 1 }
0x1095   :  { %3423 = vsyncpa [#allocation7], 1 }

</bundles_post_ra>
